<compile_context>
chip_gen: v7x
topology: tpu7x:2x2x1
jax: 0.10.0
libtpu: 0.0.40
codegen_flags: <defaults>
</compile_context>

<pallas_src>
import functools

import jax
import jax.numpy as jnp
from jax.experimental import pallas as pl
from jax.experimental.pallas import tpu as pltpu

IN_DIM = 4
HIDDEN = 512
OUT_DIM = 2


def _round_up(x, m):
    return (x + m - 1) // m * m


def _pass1_kernel(x_ref, w1_ref, b1_ref, w2_ref, b2_ref,
                  logits_ref, m_ref, s_ref, *, valid_rows):
    i = pl.program_id(0)

    @pl.when(i == 0)
    def _():
        m_ref[...] = jnp.full_like(m_ref, -jnp.inf)
        s_ref[...] = jnp.zeros_like(s_ref)

    x = x_ref[...]                                    # (blk, 4)
    blk = x.shape[0]

    # --- fc1 + ReLU on the VPU: the K=4 contraction as 4 broadcast FMAs ---------------
    h = jnp.broadcast_to(b1_ref[...], (blk, HIDDEN))
    for k in range(IN_DIM):                           # statically unrolled
        h = h + x[:, k:k + 1] * w1_ref[k:k + 1, :]
    h = jnp.maximum(h, 0.0)

    # --- fc2 on the MXU (K=512); the (512, 2) tile is padded internally by Mosaic -----
    logits = (jnp.dot(h, w2_ref[...], preferred_element_type=jnp.float32)
              + b2_ref[...])                          # (blk, 2)

    # Padded rows (ragged B) must not contribute to the dim=0 softmax.
    if valid_rows is not None:
        rows = i * blk + jax.lax.broadcasted_iota(jnp.int32, (blk, 1), 0)
        logits = jnp.where(rows < valid_rows, logits, -jnp.inf)

    logits_ref[...] = logits

    # --- online per-column (dim=0) max / shifted-sum across the batch grid axis -------
    m_old = m_ref[...]
    m_new = jnp.maximum(m_old, jnp.max(logits, axis=0, keepdims=True))
    s_ref[...] = (s_ref[...] * jnp.exp(m_old - m_new)
                  + jnp.sum(jnp.exp(logits - m_new), axis=0, keepdims=True))
    m_ref[...] = m_new


def _pass2_kernel(logits_ref, m_ref, s_ref, o_ref):
    e = jnp.exp(logits_ref[...] - m_ref[...])
    # Exact divide: column sums must be 1 to fp accuracy (feeds log-prob gradients).
    o_ref[...] = e / s_ref[...]


def policy_forward(x, w1, b1, w2, b2, *, block_rows=256):
    """x: (B, 4) f32; weights stored pre-transposed as (in, out)."""
    B = x.shape[0]
    blk = max(8, min(_round_up(block_rows, 8), _round_up(B, 8)))
    B_pad = _round_up(B, blk)
    if B_pad != B:
        x = jnp.pad(x, ((0, B_pad - B), (0, 0)))
    nb = B_pad // blk
    valid_rows = B if B_pad != B else None

    row_blk = lambda i: (i, 0)
    const = lambda i: (0, 0)
    bytes_w = 4 * (IN_DIM * HIDDEN + HIDDEN + HIDDEN * OUT_DIM + OUT_DIM)

    # ---------- pass 1: fc1 + fc2 + online column max / shifted sum over B -------------
    logits, m, s = pl.pallas_call(
        functools.partial(_pass1_kernel, valid_rows=valid_rows),
        grid=(nb,),
        in_specs=[
            pl.BlockSpec((blk, IN_DIM), row_blk),
            pl.BlockSpec((IN_DIM, HIDDEN), const),    # weights stay VMEM-resident
            pl.BlockSpec((1, HIDDEN), const),
            pl.BlockSpec((HIDDEN, OUT_DIM), const),
            pl.BlockSpec((1, OUT_DIM), const),
        ],
        out_specs=(
            pl.BlockSpec((blk, OUT_DIM), row_blk),    # logits
            pl.BlockSpec((1, OUT_DIM), const),        # running column max (accumulator)
            pl.BlockSpec((1, OUT_DIM), const),        # running shifted sum (accumulator)
        ),
        out_shape=(
            jax.ShapeDtypeStruct((B_pad, OUT_DIM), jnp.float32),
            jax.ShapeDtypeStruct((1, OUT_DIM), jnp.float32),
            jax.ShapeDtypeStruct((1, OUT_DIM), jnp.float32),
        ),
        compiler_params=pltpu.CompilerParams(
            dimension_semantics=("arbitrary",),       # sequential online reduction over B
            vmem_limit_bytes=32 * 1024 * 1024),
        cost_estimate=pl.CostEstimate(
            flops=2 * B_pad * (IN_DIM * HIDDEN + HIDDEN * OUT_DIM),
            transcendentals=2 * B_pad * OUT_DIM,
            bytes_accessed=B_pad * 4 * (IN_DIM + OUT_DIM) + bytes_w + 16),
    )(x, w1, b1, w2, b2)

    # ---------- pass 2: normalize each block with the final max / sum ------------------
    out = pl.pallas_call(
        _pass2_kernel,
        grid=(nb,),
        in_specs=[
            pl.BlockSpec((blk, OUT_DIM), row_blk),
            pl.BlockSpec((1, OUT_DIM), const),
            pl.BlockSpec((1, OUT_DIM), const),
        ],
        out_specs=pl.BlockSpec((blk, OUT_DIM), row_blk),
        out_shape=jax.ShapeDtypeStruct((B_pad, OUT_DIM), jnp.float32),
        compiler_params=pltpu.CompilerParams(
            dimension_semantics=("parallel",),        # embarrassingly parallel (2 TCs on v7x)
            vmem_limit_bytes=32 * 1024 * 1024),
        cost_estimate=pl.CostEstimate(
            flops=2 * B_pad * OUT_DIM,
            transcendentals=B_pad * OUT_DIM,
            bytes_accessed=2 * B_pad * OUT_DIM * 4 + 16),
    )(logits, m, s)

    return out[:B] if B_pad != B else out


def init_params(key):
    # Deterministic init mimicking nn.Linear's U(-1/sqrt(fan_in), 1/sqrt(fan_in)).
    k1, k2, k3, k4 = jax.random.split(key, 4)
    bound1 = 1.0 / jnp.sqrt(IN_DIM)
    bound2 = 1.0 / jnp.sqrt(HIDDEN)
    w1 = jax.random.uniform(k1, (IN_DIM, HIDDEN), jnp.float32, -bound1, bound1)
    b1 = jax.random.uniform(k2, (1, HIDDEN), jnp.float32, -bound1, bound1)
    w2 = jax.random.uniform(k3, (HIDDEN, OUT_DIM), jnp.float32, -bound2, bound2)
    b2 = jax.random.uniform(k4, (1, OUT_DIM), jnp.float32, -bound2, bound2)
    return w1, b1, w2, b2


def reference_forward(x, w1, b1, w2, b2):
    h = jnp.maximum(jnp.dot(x, w1, precision="highest") + b1, 0.0)
    logits = jnp.dot(h, w2, precision="highest") + b2
    return jax.nn.softmax(logits, axis=0)             # dim=0, as in the PyTorch module


if __name__ == "__main__":
    key = jax.random.PRNGKey(0)
    kx, kp = jax.random.split(key)
    w1, b1, w2, b2 = init_params(kp)

    # B=1000: batched rollout states, non-multiple of the 256-row block (exercises the
    #         padded/masked two-pass softmax path).  B=8: tiny single-block path.
    for B in (1000, 8):
        x = jax.random.normal(jax.random.fold_in(kx, B), (B, IN_DIM), jnp.float32)
        out = jax.block_until_ready(policy_forward(x, w1, b1, w2, b2))
        ref = reference_forward(x, w1, b1, w2, b2)
        assert out.shape == (B, OUT_DIM)
        assert jnp.allclose(out, ref, atol=1e-3, rtol=1e-3), (B, float(jnp.abs(out - ref).max()))
        # softmax is over dim=0 (batch), so each action COLUMN sums to 1 across the batch.
        assert jnp.allclose(out.sum(axis=0), jnp.ones((OUT_DIM,)), atol=1e-4), (
            B, out.sum(axis=0))

    print("KERNEL_OK")
</pallas_src>

<mosaic_0001>
module attributes {stable_mosaic.version = 11 : i64} {
  func.func @_pass1_kernel(%arg0: i32, %arg1: memref<256x4xf32, #tpu.memory_space<vmem>>, %arg2: memref<4x512xf32, #tpu.memory_space<vmem>>, %arg3: memref<1x512xf32, #tpu.memory_space<vmem>>, %arg4: memref<512x2xf32, #tpu.memory_space<vmem>>, %arg5: memref<1x2xf32, #tpu.memory_space<vmem>>, %arg6: memref<256x2xf32, #tpu.memory_space<vmem>>, %arg7: memref<1x2xf32, #tpu.memory_space<vmem>>, %arg8: memref<1x2xf32, #tpu.memory_space<vmem>>) attributes {dimension_semantics = [#tpu.dimension_semantics<arbitrary>], iteration_bounds = array<i64: 4>, scalar_prefetch = 0 : i64, scratch_operands = 0 : i64, tpu.core_type = #tpu.core_type<tc>, window_params = [{transform_indices = @transform_0, window_bounds = array<i64: 256, 4>}, {pipeline_mode = #tpu.pipeline_mode<synchronous>, transform_indices = @transform_1, window_bounds = array<i64: 4, 512>}, {pipeline_mode = #tpu.pipeline_mode<synchronous>, transform_indices = @transform_2, window_bounds = array<i64: 1, 512>}, {pipeline_mode = #tpu.pipeline_mode<synchronous>, transform_indices = @transform_3, window_bounds = array<i64: 512, 2>}, {pipeline_mode = #tpu.pipeline_mode<synchronous>, transform_indices = @transform_4, window_bounds = array<i64: 1, 2>}, {transform_indices = @transform_5, window_bounds = array<i64: 256, 2>}, {pipeline_mode = #tpu.pipeline_mode<synchronous>, transform_indices = @transform_6, window_bounds = array<i64: 1, 2>}, {pipeline_mode = #tpu.pipeline_mode<synchronous>, transform_indices = @transform_7, window_bounds = array<i64: 1, 2>}]} {
    %c0_i32 = arith.constant 0 : i32
    %0 = arith.cmpi eq, %arg0, %c0_i32 : i32
    %1 = arith.extui %0 : i1 to i32
    %c0_i32_0 = arith.constant 0 : i32
    %2 = arith.cmpi ne, %1, %c0_i32_0 : i32
    scf.if %2 {
      %cst_27 = arith.constant 0xFF800000 : f32
      %65 = vector.broadcast %cst_27 : f32 to vector<1x2xf32>
      %c0_28 = arith.constant 0 : index
      %c0_29 = arith.constant 0 : index
      %66 = vector.load %arg7[%c0_28, %c0_29] : memref<1x2xf32, #tpu.memory_space<vmem>>, vector<1x2xf32>
      tpu.vector_store %arg7[%c0_28, %c0_29], %65 {strides = array<i32>} : memref<1x2xf32, #tpu.memory_space<vmem>>, vector<1x2xf32>,
      %cst_30 = arith.constant 0.000000e+00 : f32
      %67 = vector.broadcast %cst_30 : f32 to vector<1x2xf32>
      %c0_31 = arith.constant 0 : index
      %c0_32 = arith.constant 0 : index
      %68 = vector.load %arg8[%c0_31, %c0_32] : memref<1x2xf32, #tpu.memory_space<vmem>>, vector<1x2xf32>
      tpu.vector_store %arg8[%c0_31, %c0_32], %67 {strides = array<i32>} : memref<1x2xf32, #tpu.memory_space<vmem>>, vector<1x2xf32>,
    } else {
    }
    %c0 = arith.constant 0 : index
    %c0_1 = arith.constant 0 : index
    %3 = vector.load %arg1[%c0, %c0_1] : memref<256x4xf32, #tpu.memory_space<vmem>>, vector<256x4xf32>
    %c0_2 = arith.constant 0 : index
    %c0_3 = arith.constant 0 : index
    %4 = vector.load %arg3[%c0_2, %c0_3] : memref<1x512xf32, #tpu.memory_space<vmem>>, vector<1x512xf32>
    %5 = vector.shape_cast %4 : vector<1x512xf32> to vector<1x512xf32>
    %6 = vector.broadcast %5 : vector<1x512xf32> to vector<256x512xf32>
    %7 = vector.extract_strided_slice %3 {offsets = [0, 0], sizes = [256, 1], strides = [1, 1]} : vector<256x4xf32> to vector<256x1xf32>
    %c0_4 = arith.constant 0 : index
    %c0_5 = arith.constant 0 : index
    %8 = vector.load %arg2[%c0_4, %c0_5] : memref<4x512xf32, #tpu.memory_space<vmem>>, vector<1x512xf32>
    %9 = vector.broadcast %7 : vector<256x1xf32> to vector<256x512xf32>
    %10 = vector.broadcast %8 : vector<1x512xf32> to vector<256x512xf32>
    %11 = arith.mulf %9, %10 : vector<256x512xf32>
    %12 = arith.addf %6, %11 : vector<256x512xf32>
    %13 = vector.extract_strided_slice %3 {offsets = [0, 1], sizes = [256, 1], strides = [1, 1]} : vector<256x4xf32> to vector<256x1xf32>
    %c1 = arith.constant 1 : index
    %c0_6 = arith.constant 0 : index
    %14 = vector.load %arg2[%c1, %c0_6] : memref<4x512xf32, #tpu.memory_space<vmem>>, vector<1x512xf32>
    %15 = vector.broadcast %13 : vector<256x1xf32> to vector<256x512xf32>
    %16 = vector.broadcast %14 : vector<1x512xf32> to vector<256x512xf32>
    %17 = arith.mulf %15, %16 : vector<256x512xf32>
    %18 = arith.addf %12, %17 : vector<256x512xf32>
    %19 = vector.extract_strided_slice %3 {offsets = [0, 2], sizes = [256, 1], strides = [1, 1]} : vector<256x4xf32> to vector<256x1xf32>
    %c2 = arith.constant 2 : index
    %c0_7 = arith.constant 0 : index
    %20 = vector.load %arg2[%c2, %c0_7] : memref<4x512xf32, #tpu.memory_space<vmem>>, vector<1x512xf32>
    %21 = vector.broadcast %19 : vector<256x1xf32> to vector<256x512xf32>
    %22 = vector.broadcast %20 : vector<1x512xf32> to vector<256x512xf32>
    %23 = arith.mulf %21, %22 : vector<256x512xf32>
    %24 = arith.addf %18, %23 : vector<256x512xf32>
    %25 = vector.extract_strided_slice %3 {offsets = [0, 3], sizes = [256, 1], strides = [1, 1]} : vector<256x4xf32> to vector<256x1xf32>
    %c3 = arith.constant 3 : index
    %c0_8 = arith.constant 0 : index
    %26 = vector.load %arg2[%c3, %c0_8] : memref<4x512xf32, #tpu.memory_space<vmem>>, vector<1x512xf32>
    %27 = vector.broadcast %25 : vector<256x1xf32> to vector<256x512xf32>
    %28 = vector.broadcast %26 : vector<1x512xf32> to vector<256x512xf32>
    %29 = arith.mulf %27, %28 : vector<256x512xf32>
    %30 = arith.addf %24, %29 : vector<256x512xf32>
    %cst = arith.constant 0.000000e+00 : f32
    %31 = vector.broadcast %cst : f32 to vector<256x512xf32>
    %32 = arith.maximumf %30, %31 : vector<256x512xf32>
    %c0_9 = arith.constant 0 : index
    %c0_10 = arith.constant 0 : index
    %33 = vector.load %arg4[%c0_9, %c0_10] : memref<512x2xf32, #tpu.memory_space<vmem>>, vector<512x2xf32>
    %cst_11 = arith.constant dense<0.000000e+00> : vector<256x2xf32>
    %34 = tpu.matmul %32, %33, %cst_11 {dimension_numbers = #tpu.dot_dimension_numbers<[1], [0], [0], [1], [0, 0, 1, 1], [], []>} : vector<256x512xf32>, vector<512x2xf32>, vector<256x2xf32> -> vector<256x2xf32>
    %c0_12 = arith.constant 0 : index
    %c0_13 = arith.constant 0 : index
    %35 = vector.load %arg5[%c0_12, %c0_13] : memref<1x2xf32, #tpu.memory_space<vmem>>, vector<1x2xf32>
    %36 = vector.broadcast %35 : vector<1x2xf32> to vector<256x2xf32>
    %37 = arith.addf %34, %36 : vector<256x2xf32>
    %c256_i32 = arith.constant 256 : i32
    %38 = arith.muli %arg0, %c256_i32 : i32
    %39 = tpu.iota {dimensions = array<i32: 0>} : vector<256x1xi32>
    %40 = vector.broadcast %38 : i32 to vector<256x1xi32>
    %41 = arith.addi %40, %39 : vector<256x1xi32>
    %c1000_i32 = arith.constant 1000 : i32
    %42 = vector.broadcast %c1000_i32 : i32 to vector<256x1xi32>
    %43 = arith.cmpi slt, %41, %42 : vector<256x1xi32>
    %cst_14 = arith.constant 0xFF800000 : f32
    %44 = vector.shape_cast %43 : vector<256x1xi1> to vector<256x1xi1>
    %45 = vector.broadcast %44 : vector<256x1xi1> to vector<256x2xi1>
    %46 = vector.broadcast %cst_14 : f32 to vector<256x2xf32>
    %47 = arith.select %45, %37, %46 : vector<256x2xi1>, vector<256x2xf32>
    %c0_15 = arith.constant 0 : index
    %c0_16 = arith.constant 0 : index
    %48 = vector.load %arg6[%c0_15, %c0_16] : memref<256x2xf32, #tpu.memory_space<vmem>>, vector<256x2xf32>
    tpu.vector_store %arg6[%c0_15, %c0_16], %47 {strides = array<i32>} : memref<256x2xf32, #tpu.memory_space<vmem>>, vector<256x2xf32>,
    %c0_17 = arith.constant 0 : index
    %c0_18 = arith.constant 0 : index
    %49 = vector.load %arg7[%c0_17, %c0_18] : memref<1x2xf32, #tpu.memory_space<vmem>>, vector<1x2xf32>
    %cst_19 = arith.constant dense<0xFF800000> : vector<2xf32>
    %50 = vector.multi_reduction <maximumf>, %47, %cst_19 [0] : vector<256x2xf32> to vector<2xf32>
    %51 = vector.shape_cast %50 : vector<2xf32> to vector<1x2xf32>
    %52 = arith.maximumf %49, %51 : vector<1x2xf32>
    %c0_20 = arith.constant 0 : index
    %c0_21 = arith.constant 0 : index
    %53 = vector.load %arg8[%c0_20, %c0_21] : memref<1x2xf32, #tpu.memory_space<vmem>>, vector<1x2xf32>
    %54 = arith.subf %49, %52 : vector<1x2xf32>
    %55 = math.exp %54 : vector<1x2xf32>
    %56 = arith.mulf %53, %55 : vector<1x2xf32>
    %57 = vector.broadcast %52 : vector<1x2xf32> to vector<256x2xf32>
    %58 = arith.subf %47, %57 : vector<256x2xf32>
    %59 = math.exp %58 : vector<256x2xf32>
    %cst_22 = arith.constant dense<0.000000e+00> : vector<2xf32>
    %60 = vector.multi_reduction <add>, %59, %cst_22 [0] : vector<256x2xf32> to vector<2xf32>
    %61 = vector.shape_cast %60 : vector<2xf32> to vector<1x2xf32>
    %62 = arith.addf %56, %61 : vector<1x2xf32>
    %c0_23 = arith.constant 0 : index
    %c0_24 = arith.constant 0 : index
    %63 = vector.load %arg8[%c0_23, %c0_24] : memref<1x2xf32, #tpu.memory_space<vmem>>, vector<1x2xf32>
    tpu.vector_store %arg8[%c0_23, %c0_24], %62 {strides = array<i32>} : memref<1x2xf32, #tpu.memory_space<vmem>>, vector<1x2xf32>,
    %c0_25 = arith.constant 0 : index
    %c0_26 = arith.constant 0 : index
    %64 = vector.load %arg7[%c0_25, %c0_26] : memref<1x2xf32, #tpu.memory_space<vmem>>, vector<1x2xf32>
    tpu.vector_store %arg7[%c0_25, %c0_26], %52 {strides = array<i32>} : memref<1x2xf32, #tpu.memory_space<vmem>>, vector<1x2xf32>,
    return
  }
  func.func @transform_0(%arg0: i32) -> (i32, i32) {
    %c0_i32 = arith.constant 0 : i32
    %c0_i32_0 = arith.constant 0 : i32
    return %arg0, %c0_i32 : i32, i32
  }
  func.func @transform_1(%arg0: i32) -> (i32, i32) {
    %c0_i32 = arith.constant 0 : i32
    %c0_i32_0 = arith.constant 0 : i32
    %c0_i32_1 = arith.constant 0 : i32
    return %c0_i32, %c0_i32_0 : i32, i32
  }
  func.func @transform_2(%arg0: i32) -> (i32, i32) {
    %c0_i32 = arith.constant 0 : i32
    %c0_i32_0 = arith.constant 0 : i32
    %c0_i32_1 = arith.constant 0 : i32
    return %c0_i32, %c0_i32_0 : i32, i32
  }
  func.func @transform_3(%arg0: i32) -> (i32, i32) {
    %c0_i32 = arith.constant 0 : i32
    %c0_i32_0 = arith.constant 0 : i32
    %c0_i32_1 = arith.constant 0 : i32
    return %c0_i32, %c0_i32_0 : i32, i32
  }
  func.func @transform_4(%arg0: i32) -> (i32, i32) {
    %c0_i32 = arith.constant 0 : i32
    %c0_i32_0 = arith.constant 0 : i32
    %c0_i32_1 = arith.constant 0 : i32
    return %c0_i32, %c0_i32_0 : i32, i32
  }
  func.func @transform_5(%arg0: i32) -> (i32, i32) {
    %c0_i32 = arith.constant 0 : i32
    %c0_i32_0 = arith.constant 0 : i32
    return %arg0, %c0_i32 : i32, i32
  }
  func.func @transform_6(%arg0: i32) -> (i32, i32) {
    %c0_i32 = arith.constant 0 : i32
    %c0_i32_0 = arith.constant 0 : i32
    %c0_i32_1 = arith.constant 0 : i32
    return %c0_i32, %c0_i32_0 : i32, i32
  }
  func.func @transform_7(%arg0: i32) -> (i32, i32) {
    %c0_i32 = arith.constant 0 : i32
    %c0_i32_0 = arith.constant 0 : i32
    %c0_i32_1 = arith.constant 0 : i32
    return %c0_i32, %c0_i32_0 : i32, i32
  }
}

</mosaic_0001>

<bundles_post_ra>
// kernel: tpu_custom_call.1
= control target key start
LH: loop header
LB: loop body
LE: loop exit
PB: predicated region body
PF: predicated region fallthrough
CT: control target
= control target key end

     0   :  { %13 = vsyncpa [#allocation3], 0  ;;  %s5869_s0 = inlined_call_operand.vmem [shape: f32[1024,4], index: 0, kind: input, shape index: {}]   ;;  %s5870_s1 = inlined_call_operand.vmem [shape: f32[4,512], index: 1, kind: input, shape index: {}]   ;;  %s5871_s2 = inlined_call_operand.vmem [shape: f32[1,512], index: 2, kind: input, shape index: {}]   ;;  %s5872_s3 = inlined_call_operand.vmem [shape: f32[512,2], index: 3, kind: input, shape index: {}]   ;;  %s5873_s4 = inlined_call_operand.vmem [shape: f32[1,2], index: 4, kind: input, shape index: {}]   ;;  %s5874_s5 = inlined_call_operand.vmem [shape: f32[1024,2], index: 5, kind: output, shape index: {0}]   ;;  %s5875_s6 = inlined_call_operand.hbm [shape: f32[1,2], index: 6, kind: output, shape index: {1}]   ;;  %s5876_s7 = inlined_call_operand.hbm [shape: f32[1,2], index: 7, kind: output, shape index: {2}]  }
   0x1   :  { %14 = vsyncpa [#allocation5], 0  ;;  %s3731_s24 = smov 0  }
   0x2 LB: > { %s3737_s25 = sadd.s32 4294967295, %s3680_s24   ;;  %p3233_p0 = scmp.ge.s32.totalorder %s3680_s24, 1  ;;  %s3680_s24 = sphi %s3731_s24, %s20_s24  }
   0x3   : > { %p235_p1 = scmp.lt.s32.totalorder %s3680_s24, 5 }
   0x5   : > { %p236_p2 = pnand %p3233_p0, %p235_p1 }
   0x7   : > { %239 = sbr.rel (%p236_p2) target bundleno = 939 (0x3ab), region = 40 }
   0xe   : > { %s3234_s26 = sshll.u32 %s3737_s25, 5  ;;  %p3238_p4 = scmp.ne.s32.totalorder %s3737_s25, 0 }
   0xf   : > { %p268_p3 = scmp.lt.s32.totalorder %s3234_s26, 127  ;;  %vm283_vm0 = vcmask (!%p3238_p4), 8192   ;;  %v3682_v0 = vmov (!%p3238_p4), -inf   ;;  %v3683_v1 = vmov (!%p3238_p4), 0.0  }
  0x10   : > { %282 = sbr.rel (%p3238_p4) target bundleno = 23 (0x17), region = 44  ;;  %284 = vst.msk [vmem:[#allocation2] sm:$0x1] (!%p3238_p4), %vm283_vm0, %v3682_v0  ;;  %285 = vst.msk [vmem:[#allocation4] sm:$0x1] (!%p3238_p4), %vm283_vm0, %v3683_v1 }
  0x11   : > { %s6084_s26 = smov (!%p268_p3, %s3234_s26), 127 }
  0x12   : > { %s3235_s27 = sshll.u32 %s6084_s26, 3 }
  0x13   : > { %s3745_s30 = scalar_lea.vmem %s5869_s0, %s3235_s27  ;;  %s3750_s10 = scalar_lea.vmem %s5874_s5, %s3235_s27 }
  0x17 PF: > { %v3754_v2 = vld [vmem:[%s3745_s30 + $0x8] sm:$0xff]  ;;  %v3757_v3 = vld [vmem:[%s3745_s30] sm:$0xff]  ;;  %v5877_v4 = vmov 0   ;;  %v3685_v6 = vmov 0.0|0.0   ;;  %v5881_v10 = vmov 2   ;;  %v2129_v13 = vld [vmem:[%s5872_s3 + $0x10] sm:$0xff] }
  0x18   : > { %3440 = vset.pattern.permute.xlu1 %v5877_v4  ;;  %3439 = vset.pattern.permute.xlu0 %v5877_v4  ;;  %v3764_v5 = vld [vmem:[%s3745_s30 + $0x20] sm:$0xff]  ;;  %v2128_v8 = vld [vmem:[%s5872_s3 + $0x8] sm:$0xff]  ;;  %v2130_v14 = vld [vmem:[%s5872_s3 + $0x18] sm:$0xff]  ;;  %v5879_v25 = vmov 1   ;;  %v5884_v30 = vmov 3   ;;  %s3243_s16 = sshll.u32 %s3737_s25, 8 }
  0x19   : > { %348 = vperm.xlu1 %3440, %v3754_v2   ;;  %343 = vperm.xlu0 %3439, %v3757_v3   ;;  %v2127_v7 = vld [vmem:[%s5872_s3] sm:$0xff]  ;;  %v2160_v12 = vld [vmem:[%s5872_s3 + $0x108] sm:$0xff]  ;;  %v3790_v15 = vld [vmem:[%s3745_s30 + $0x38] sm:$0xff]  ;;  %v3254_v19 = vpack.c.bf16 %v2130_v14, %v2129_v13  ;;  %vm2843_vm2 = vcmask 15360   ;;  %s3689_s20 = smov [#allocation2]   ;;  %p3418_p5 = scmp.eq.s32.totalorder %s3737_s25, 3 }
  0x1a   : > { %3250 = vmatprep.subr.bf16.mxu1 %v3685_v6  ;;  %3298 = vmatprep.subr.bf16.mxu0 %v3685_v6  ;;  %v2159_v9 = vld [vmem:[%s5872_s3 + $0x100] sm:$0xff]  ;;  %v3251_v11 = vpack.c.bf16 %v2128_v8, %v2127_v7  ;;  %v2161_v17 = vld [vmem:[%s5872_s3 + $0x110] sm:$0xff]  ;;  %v2162_v18 = vld [vmem:[%s5872_s3 + $0x118] sm:$0xff]  ;;  %s3143_s21 = sshll.u32 %s3689_s20, 4  ;;  %s3144_s21 = int_to_ptr.vmem [resolvable:$true] %s3143_s21 }
  0x1b   : > { %v3299_v16 = vpack.c.bf16 %v2160_v12, %v2159_v9  ;;  %v3302_v20 = vpack.c.bf16 %v2162_v18, %v2161_v17  ;;  %v2131_v21 = vld [vmem:[%s5872_s3 + $0x20] sm:$0xff]  ;;  %v2132_v22 = vld [vmem:[%s5872_s3 + $0x28] sm:$0xff]  ;;  %v2133_v28 = vld [vmem:[%s5872_s3 + $0x30] sm:$0xff]  ;;  %s3620_s22 = scalar_lea.vmem %s3144_s21, 32  ;;  %p3621_p9 = scmp.lt.s32.totalorder %s3144_s21, %s3144_s21 }
  0x1c   : > { %3252 = vmatpush1.bf16.msra.mxu1 %v3251_v11  ;;  %v2163_v23 = vld [vmem:[%s5872_s3 + $0x120] sm:$0xff]  ;;  %v2164_v24 = vld [vmem:[%s5872_s3 + $0x128] sm:$0xff]  ;;  %v3257_v26 = vpack.c.bf16 %v2132_v22, %v2131_v21  ;;  %v2134_v29 = vld [vmem:[%s5872_s3 + $0x38] sm:$0xff] }
  0x1d   : > { %3441 = vset.pattern.permute.xlu1 %v5881_v10  ;;  %363 = vperm.xlu0 %3439, %v3764_v5   ;;  %v3305_v27 = vpack.c.bf16 %v2164_v24, %v2163_v23  ;;  %v3824_v31 = vld [vmem:[%s3745_s30 + $0x10] sm:$0xff]  ;;  %v2166_v33 = vld [vmem:[%s5872_s3 + $0x138] sm:$0xff]  ;;  %v3260_v35 = vpack.c.bf16 %v2134_v29, %v2133_v28  ;;  %v2135_v37 = vld [vmem:[%s5872_s3 + $0x40] sm:$0xff] }
  0x1e   : > { %1188 = vperm.xlu1 %3441, %v3757_v3   ;;  %3300 = vmatpush1.bf16.msra.mxu0 %v3299_v16  ;;  %v2165_v32 = vld [vmem:[%s5872_s3 + $0x130] sm:$0xff]  ;;  %v3836_v34 = vld [vmem:[%s3745_s30 + $0x18] sm:$0xff]  ;;  %v2136_v38 = vld [vmem:[%s5872_s3 + $0x48] sm:$0xff] }
  0x1f   : > { %3253 = vmatprep.subr.bf16.mxu1 %v3685_v6  ;;  %3301 = vmatprep.subr.bf16.mxu0 %v3685_v6  ;;  %v3308_v36 = vpack.c.bf16 %v2166_v33, %v2165_v32  ;;  %v2167_v39 = vld [vmem:[%s5872_s3 + $0x140] sm:$0xff]  ;;  %v2168_v40 = vld [vmem:[%s5872_s3 + $0x148] sm:$0xff]  ;;  %v3855_v41 = vld [vmem:[%s3745_s30 + $0x30] sm:$0xff]  ;;  %v3263_v42 = vpack.c.bf16 %v2136_v38, %v2135_v37 }
  0x20   : > { %3255 = vmatpush1.bf16.msra.mxu1 %v3254_v19  ;;  %v3311_v43 = vpack.c.bf16 %v2168_v40, %v2167_v39  ;;  %v2137_v44 = vld [vmem:[%s5872_s3 + $0x50] sm:$0xff]  ;;  %v2138_v45 = vld [vmem:[%s5872_s3 + $0x58] sm:$0xff]  ;;  %v3875_v48 = vld [vmem:[%s3745_s30 + $0x48] sm:$0xff] }
  0x21   : > { %378 = vperm.xlu0 %3439, %v3790_v15   ;;  %3256 = vmatprep.subr.bf16.mxu1 %v3685_v6  ;;  %v2169_v46 = vld [vmem:[%s5872_s3 + $0x150] sm:$0xff]  ;;  %v2170_v47 = vld [vmem:[%s5872_s3 + $0x158] sm:$0xff]  ;;  %v3266_v49 = vpack.c.bf16 %v2138_v45, %v2137_v44  ;;  %v2139_v51 = vld [vmem:[%s5872_s3 + $0x60] sm:$0xff] }
  0x22   : > { %3442 = vset.pattern.permute.xlu1 %v5879_v25  ;;  %3303 = vmatpush1.bf16.msra.mxu0 %v3302_v20  ;;  %v3314_v50 = vpack.c.bf16 %v2170_v47, %v2169_v46  ;;  %v2140_v52 = vld [vmem:[%s5872_s3 + $0x68] sm:$0xff]  ;;  %v2171_v53 = vld [vmem:[%s5872_s3 + $0x160] sm:$0xff]  ;;  %v2141_v58 = vld [vmem:[%s5872_s3 + $0x70] sm:$0xff] }
  0x23   : > { %785 = vperm.xlu1 %3442, %v3754_v2   ;;  %3304 = vmatprep.subr.bf16.mxu0 %v3685_v6  ;;  %v2172_v54 = vld [vmem:[%s5872_s3 + $0x168] sm:$0xff]  ;;  %v3895_v55 = vld [vmem:[%s3745_s30 + $0x60] sm:$0xff]  ;;  %v3269_v56 = vpack.c.bf16 %v2140_v52, %v2139_v51  ;;  %v2142_v59 = vld [vmem:[%s5872_s3 + $0x78] sm:$0xff] }
  0x24   : > { %3258 = vmatpush1.bf16.msra.mxu1 %v3257_v26  ;;  %v3317_v57 = vpack.c.bf16 %v2172_v54, %v2171_v53  ;;  %v2173_v60 = vld [vmem:[%s5872_s3 + $0x170] sm:$0xff]  ;;  %v2174_v61 = vld [vmem:[%s5872_s3 + $0x178] sm:$0xff]  ;;  %v3272_v62 = vpack.c.bf16 %v2142_v59, %v2141_v58  ;;  %v2143_v0 = vld [vmem:[%s5872_s3 + $0x80] sm:$0xff] }
  0x25   : > { %3457 = vset.pattern.permute.xlu0 %v5884_v30  ;;  %3259 = vmatprep.subr.bf16.mxu1 %v3685_v6  ;;  %v3320_v63 = vpack.c.bf16 %v2174_v61, %v2173_v60  ;;  %v2144_v1 = vld [vmem:[%s5872_s3 + $0x88] sm:$0xff]  ;;  %v2145_v11 = vld [vmem:[%s5872_s3 + $0x90] sm:$0xff]  ;;  %v2146_v12 = vld [vmem:[%s5872_s3 + $0x98] sm:$0xff] }
  0x26   : > { %1595 = vperm.xlu0 %3457, %v3757_v3   ;;  %3306 = vmatpush1.bf16.msra.mxu0 %v3305_v27  ;;  %v2176_v7 = vld [vmem:[%s5872_s3 + $0x188] sm:$0xff]  ;;  %v3275_v8 = vpack.c.bf16 %v2144_v1, %v2143_v0  ;;  %v2178_v13 = vld [vmem:[%s5872_s3 + $0x198] sm:$0xff]  ;;  %v3278_v16 = vpack.c.bf16 %v2146_v12, %v2145_v11  ;;  %v2147_v18 = vld [vmem:[%s5872_s3 + $0xa0] sm:$0xff] }
  0x27   : > { %3443 = vset.pattern.permute.xlu1 %v5877_v4  ;;  %3307 = vmatprep.subr.bf16.mxu0 %v3685_v6  ;;  %v3949_v14 = vld [vmem:[%s3745_s30 + $0x28] sm:$0xff]  ;;  %v2179_v20 = vld [vmem:[%s5872_s3 + $0x1a0] sm:$0xff]  ;;  %v2149_v26 = vld [vmem:[%s5872_s3 + $0xb0] sm:$0xff] }
  0x28   : > { %353 = vperm.xlu1 %3443, %v3824_v31   ;;  %3261 = vmatpush1.bf16.msra.mxu1 %v3260_v35  ;;  %v2148_v19 = vld [vmem:[%s5872_s3 + $0xa8] sm:$0xff]  ;;  %v3968_v22 = vld [vmem:[%s3745_s30 + $0x40] sm:$0xff]  ;;  %v2150_v27 = vld [vmem:[%s5872_s3 + $0xb8] sm:$0xff] }
  0x29   : > { %3262 = vmatprep.subr.bf16.mxu1 %v3685_v6  ;;  %v2180_v21 = vld [vmem:[%s5872_s3 + $0x1a8] sm:$0xff]  ;;  %v3281_v23 = vpack.c.bf16 %v2148_v19, %v2147_v18  ;;  %v2181_v28 = vld [vmem:[%s5872_s3 + $0x1b0] sm:$0xff]  ;;  %v2182_v29 = vld [vmem:[%s5872_s3 + $0x1b8] sm:$0xff]  ;;  %v3284_v33 = vpack.c.bf16 %v2150_v27, %v2149_v26 }
  0x2a   : > { %1607 = vperm.xlu0 %3457, %v3836_v34   ;;  %3309 = vmatpush1.bf16.msra.mxu0 %v3308_v36  ;;  %v3329_v24 = vpack.c.bf16 %v2180_v21, %v2179_v20  ;;  %v3988_v32 = vld [vmem:[%s3745_s30 + $0x58] sm:$0xff]  ;;  %v2151_v35 = vld [vmem:[%s5872_s3 + $0xc0] sm:$0xff]  ;;  %v2152_v36 = vld [vmem:[%s5872_s3 + $0xc8] sm:$0xff] }
  0x2b   : > { %3310 = vmatprep.subr.bf16.mxu0 %v3685_v6  ;;  %v2183_v37 = vld [vmem:[%s5872_s3 + $0x1c0] sm:$0xff]  ;;  %v2184_v38 = vld [vmem:[%s5872_s3 + $0x1c8] sm:$0xff]  ;;  %v4008_v39 = vld [vmem:[%s3745_s30 + $0x70] sm:$0xff]  ;;  %v3287_v40 = vpack.c.bf16 %v2152_v36, %v2151_v35 }
  0x2c   : > { %3444 = vset.pattern.permute.xlu1 %v5881_v10  ;;  %3264 = vmatpush1.bf16.msra.mxu1 %v3263_v42  ;;  %v3335_v42 = vpack.c.bf16 %v2184_v38, %v2183_v37  ;;  %v2154_v44 = vld [vmem:[%s5872_s3 + $0xd8] sm:$0xff]  ;;  %v2185_v45 = vld [vmem:[%s5872_s3 + $0x1d0] sm:$0xff]  ;;  %v4028_v47 = vld [vmem:[%s3745_s30 + $0x88] sm:$0xff] }
  0x2d   : > { %1192 = vperm.xlu1 %3444, %v3754_v2   ;;  %3265 = vmatprep.subr.bf16.mxu1 %v3685_v6  ;;  %v2186_v46 = vld [vmem:[%s5872_s3 + $0x1d8] sm:$0xff]  ;;  %5969 = vst [vmem:[#allocation8_spill] sm:$0xff] %v4028_v47  ;;  %v2155_v51 = vld [vmem:[%s5872_s3 + $0xe0] sm:$0xff]  ;;  %v2156_v52 = vld [vmem:[%s5872_s3 + $0xe8] sm:$0xff] }
  0x2e   : > { %1619 = vperm.xlu0 %3457, %v3855_v41   ;;  %3312 = vmatpush1.bf16.msra.mxu0 %v3311_v43  ;;  %v2153_v43 = vld [vmem:[%s5872_s3 + $0xd0] sm:$0xff]  ;;  %v2187_v53 = vld [vmem:[%s5872_s3 + $0x1e0] sm:$0xff]  ;;  %v2188_v54 = vld [vmem:[%s5872_s3 + $0x1e8] sm:$0xff] }
  0x2f   : > { %3313 = vmatprep.subr.bf16.mxu0 %v3685_v6  ;;  %v3341_v58 = vpack.c.bf16 %v2188_v54, %v2187_v53  ;;  %v2157_v59 = vld [vmem:[%s5872_s3 + $0xf0] sm:$0xff]  ;;  %v2158_v60 = vld [vmem:[%s5872_s3 + $0xf8] sm:$0xff]  ;;  %v307_v20 = vld [vmem:[%s3745_s30 + $0xa8] sm:$0xff] }
  0x30   : > { %3267 = vmatpush1.bf16.msra.mxu1 %v3266_v49  ;;  %v3290_v49 = vpack.c.bf16 %v2154_v44, %v2153_v43  ;;  %v2189_v61 = vld [vmem:[%s5872_s3 + $0x1f0] sm:$0xff]  ;;  %v305_v1 = vld [vmem:[%s3745_s30 + $0x98] sm:$0xff]  ;;  %v340_v27 = vld [vmem:[%s5870_s1] ss:$4 sm:$0xf] }
  0x31   : > { %3445 = vset.pattern.permute.xlu1 %v5884_v30  ;;  %3268 = vmatprep.subr.bf16.mxu1 %v3685_v6  ;;  %v4118_v11 = vld [vmem:[%s3745_s30 + $0x78] sm:$0xff]  ;;  %v3239_v35 = vld [vmem:[%s5870_s1 + $0x1] ss:$4 sm:$0xf] }
  0x32   : > { %1599 = vperm.xlu1 %3445, %v3754_v2   ;;  %1631 = vperm.xlu0 %3457, %v3875_v48   ;;  %v2175_v2 = vld [vmem:[%s5872_s3 + $0x180] sm:$0xff]  ;;  %5971 = vst [vmem:[#allocation10_spill] sm:$0xff] %v4118_v11 }
  0x33   : > { %3315 = vmatpush1.bf16.msra.mxu0 %v3314_v50  ;;  %v3323_v9 = vpack.c.bf16 %v2176_v7, %v2175_v2  ;;  %v3338_v50 = vpack.c.bf16 %v2186_v46, %v2185_v45  ;;  %v308_v2 = vld [vmem:[%s3745_s30 + $0xb0] sm:$0xff]  ;;  %v311_v7 = vld [vmem:[%s3745_s30 + $0xc8] sm:$0xff] }
  0x34   : > { %3316 = vmatprep.subr.bf16.mxu0 %v3685_v6  ;;  %3270 = vmatpush1.bf16.msra.mxu1 %v3269_v56  ;;  %v306_v56 = vld [vmem:[%s3745_s30 + $0xa0] sm:$0xff] }
  0x35   : > { %3271 = vmatprep.subr.bf16.mxu1 %v3685_v6  ;;  %v3241_v43 = vld [vmem:[%s5870_s1 + $0x3] ss:$4 sm:$0xf] }
  0x36   : > { %3446 = vset.pattern.permute.xlu1 %v5877_v4  ;;  %1643 = vperm.xlu0 %3457, %v3895_v55  }
  0x37   : > { %358 = vperm.xlu1 %3446, %v3836_v34   ;;  %3318 = vmatpush1.bf16.msra.mxu0 %v3317_v57  ;;  %v3293_v57 = vpack.c.bf16 %v2156_v52, %v2155_v51 }
  0x38   : > { %3319 = vmatprep.subr.bf16.mxu0 %v3685_v6  ;;  %3273 = vmatpush1.bf16.msra.mxu1 %v3272_v62  ;;  %v2190_v62 = vld [vmem:[%s5872_s3 + $0x1f8] sm:$0xff] }
  0x39   : > { %3274 = vmatprep.subr.bf16.mxu1 %v3685_v6  ;;  %v3344_v0 = vpack.c.bf16 %v2190_v62, %v2189_v61 }
  0x3a   : > { %3476 = vset.pattern.permute.xlu0 %v5879_v25 }
  0x3b   : > { %3447 = vset.pattern.permute.xlu1 %v5879_v25  ;;  %781 = vperm.xlu0 %3476, %v3757_v3   ;;  %v2177_v3 = vld [vmem:[%s5872_s3 + $0x190] sm:$0xff] }
  0x3c   : > { %793 = vperm.xlu1 %3447, %v3836_v34   ;;  %3321 = vmatpush1.bf16.msra.mxu0 %v3320_v63  ;;  %v3326_v17 = vpack.c.bf16 %v2178_v13, %v2177_v3  ;;  %v3296_v63 = vpack.c.bf16 %v2158_v60, %v2157_v59  ;;  %v4127_v13 = vld [vmem:[%s3745_s30 + $0x90] sm:$0xff] }
  0x3d   : > { %3322 = vmatprep.subr.bf16.mxu0 %v3685_v6  ;;  %3276 = vmatpush1.bf16.msra.mxu1 %v3275_v8  ;;  %5972 = vst [vmem:[#allocation11_spill] sm:$0xff] %v4127_v13 }
  0x3e   : > { %3277 = vmatprep.subr.bf16.mxu1 %v3685_v6 }
  0x3f   : > { %789 = vperm.xlu0 %3476, %v3824_v31  }
  0x40   : > { %3448 = vset.pattern.permute.xlu1 %v5884_v30  ;;  %3324 = vmatpush1.bf16.msra.mxu0 %v3323_v9 }
  0x41   : > { %1603 = vperm.xlu1 %3448, %v3824_v31   ;;  %3325 = vmatprep.subr.bf16.mxu0 %v3685_v6 }
  0x42   : > { %3279 = vmatpush1.bf16.msra.mxu1 %v3278_v16 }
  0x43   : > { %801 = vperm.xlu0 %3476, %v3949_v14   ;;  %3280 = vmatprep.subr.bf16.mxu1 %v3685_v6 }
  0x44   : > { %3327 = vmatpush1.bf16.msra.mxu0 %v3326_v17 }
  0x45   : > { %3449 = vset.pattern.permute.xlu1 %v5881_v10  ;;  %3328 = vmatprep.subr.bf16.mxu0 %v3685_v6 }
  0x46   : > { %1200 = vperm.xlu1 %3449, %v3836_v34   ;;  %3282 = vmatpush1.bf16.msra.mxu1 %v3281_v23  ;;  %v3332_v34 = vpack.c.bf16 %v2182_v29, %v2181_v28  ;;  %v318_v28 = vld [vmem:[%s5871_s2] sm:$0xf] }
  0x47   : > { %813 = vperm.xlu0 %3476, %v3968_v22   ;;  %3283 = vmatprep.subr.bf16.mxu1 %v3685_v6 }
  0x48   : > { %3330 = vmatpush1.bf16.msra.mxu0 %v3329_v24 }
  0x49   : > { %3331 = vmatprep.subr.bf16.mxu0 %v3685_v6 }
  0x4a   : > { %3450 = vset.pattern.permute.xlu1 %v5879_v25  ;;  %3285 = vmatpush1.bf16.msra.mxu1 %v3284_v33 }
  0x4b   : > { %797 = vperm.xlu1 %3450, %v3764_v5   ;;  %825 = vperm.xlu0 %3476, %v3988_v32  }
  0x4c   : > { %3333 = vmatpush1.bf16.msra.mxu0 %v3332_v34  ;;  %3286 = vmatprep.subr.bf16.mxu1 %v3685_v6 }
  0x4d   : > { %3334 = vmatprep.subr.bf16.mxu0 %v3685_v6 }
  0x4e   : > { %3288 = vmatpush1.bf16.msra.mxu1 %v3287_v40 }
  0x4f   : > { %3451 = vset.pattern.permute.xlu1 %v5877_v4  ;;  %837 = vperm.xlu0 %3476, %v4008_v39  }
  0x50   : > { %368 = vperm.xlu1 %3451, %v3949_v14   ;;  %3336 = vmatpush1.bf16.msra.mxu0 %v3335_v42 }
  0x51   : > { %3289 = vmatprep.subr.bf16.mxu1 %v3685_v6  ;;  %3337 = vmatprep.subr.bf16.mxu0 %v3685_v6 }
  0x52   : > { %3291 = vmatpush1.bf16.msra.mxu1 %v3290_v49 }
  0x53   : > { %849 = vperm.xlu0 %3476, %v4028_v47   ;;  %3292 = vmatprep.subr.bf16.mxu1 %v3685_v6 }
  0x54   : > { %3452 = vset.pattern.permute.xlu1 %v5881_v10  ;;  %3339 = vmatpush1.bf16.msra.mxu0 %v3338_v50 }
  0x55   : > { %1204 = vperm.xlu1 %3452, %v3764_v5   ;;  %3340 = vmatprep.subr.bf16.mxu0 %v3685_v6 }
  0x56   : > { %3294 = vmatpush1.bf16.msra.mxu1 %v3293_v57  ;;  %v3240_v57 = vld [vmem:[%s5870_s1 + $0x2] ss:$4 sm:$0xf] }
  0x57   : > { %861 = vperm.xlu0 %3476, %v306_v56   ;;  %3295 = vmatprep.subr.bf16.mxu1 %v3685_v6 }
  0x58   : > { %3342 = vmatpush1.bf16.msra.mxu0 %v3341_v58 }
  0x59   : > { %3453 = vset.pattern.permute.xlu1 %v5884_v30  ;;  %3343 = vmatprep.subr.bf16.mxu0 %v3685_v6  ;;  %v296_v6 = vld [vmem:[%s3745_s30 + $0x50] sm:$0xff] }
  0x5a   : > { %1611 = vperm.xlu1 %3453, %v3764_v5   ;;  %3297 = vmatpush1.bf16.msra.mxu1 %v3296_v63  ;;  %v4084_v5 = vld [vmem:[%s3745_s30 + $0xb8] sm:$0xff] }
  0x5b   : > { %3495 = vset.pattern.permute.xlu0 %v5881_v10 }
  0x5c   : > { %1196 = vperm.xlu0 %3495, %v3824_v31   ;;  %3345 = vmatpush1.bf16.msra.mxu0 %v3344_v0  ;;  %v4094_v31 = vld [vmem:[%s3745_s30 + $0x68] sm:$0xff] }
  0x5e   : > { %3454 = vset.pattern.permute.xlu1 %v5877_v4 }
  0x5f   : > { %373 = vperm.xlu1 %3454, %v3855_v41  }
  0x60   : > { %1208 = vperm.xlu0 %3495, %v3949_v14  }
  0x63   : > { %3455 = vset.pattern.permute.xlu1 %v5879_v25 }
  0x64   : > { %805 = vperm.xlu1 %3455, %v3855_v41   ;;  %1220 = vperm.xlu0 %3495, %v3968_v22  }
  0x68   : > { %3456 = vset.pattern.permute.xlu1 %v5884_v30  ;;  %1232 = vperm.xlu0 %3495, %v3988_v32  }
  0x69   : > { %1615 = vperm.xlu1 %3456, %v3949_v14   ;;  %v320_v14 = vlaneseq }
  0x6b   : > { %v4136_v17 = vshrl.u32 %v320_v14, 7 }
  0x6c   : > { %1244 = vperm.xlu0 %3495, %v4008_v39  }
  0x6d   : > { %3458 = vset.pattern.permute.xlu1 %v5881_v10  ;;  %5974 = vst [vmem:[#allocation13_spill] sm:$0xff] %v4136_v17  ;;  %v326_v21 = vsub.s32 1, %v4136_v17  ;;  %v4149_v24 = vsub.s32 0, %v4136_v17  ;;  %v330_v26 = vsub.s32 2, %v4136_v17 }
  0x6e   : > { %1212 = vperm.xlu1 %3458, %v3855_v41   ;;  %v4100_v41 = vld [vmem:[%s3745_s30 + $0x80] sm:$0xff] }
  0x6f   : > { %5970 = vst [vmem:[#allocation9_spill] sm:$0xff] %v4100_v41  ;;  %5975 = vst [vmem:[#allocation14_spill] sm:$0xff] %v4149_v24  ;;  %v4160_v33 = vrot.slane %v340_v27, %v326_v21  ;;  %v4170_v37 = vrot.slane %v340_v27, %v4149_v24  ;;  %v4172_v38 = vrot.slane %v340_v27, %v330_v26 }
  0x70   : > { %1256 = vperm.xlu0 %3495, %v4028_v47   ;;  %v4176_v40 = vrot.slane %v318_v28, %v4149_v24  ;;  %v4178_v42 = vrot.slane %v318_v28, %v330_v26  ;;  %v4184_v44 = vrot.slane %v318_v28, %v326_v21  ;;  %v4189_v46 = vrot.slane %v3239_v35, %v4149_v24 }
  0x71   : > { %v4191_v49 = vrot.slane %v3239_v35, %v326_v21  ;;  %v4195_v52 = vrot.slane %v3239_v35, %v330_v26  ;;  %v4209_v60 = vrot.slane %v3241_v43, %v4149_v24  ;;  %v4211_v61 = vrot.slane %v3241_v43, %v330_v26 }
  0x72   : > { %3459 = vset.pattern.permute.xlu1 %v5879_v25  ;;  %5977 = vst [vmem:[#allocation16_spill] sm:$0xff] %v4176_v40  ;;  %5978 = vst [vmem:[#allocation17_spill] sm:$0xff] %v4178_v42  ;;  %v4230_v14 = vrot.slane %v3240_v57, %v4149_v24 }
  0x73   : > { %809 = vperm.xlu1 %3459, %v3790_v15   ;;  %5979 = vst [vmem:[#allocation18_spill] sm:$0xff] %v4184_v44  ;;  %5981 = vst [vmem:[#allocation20_spill] sm:$0xff] %v4189_v46 }
  0x74   : > { %1268 = vperm.xlu0 %3495, %v306_v56   ;;  %5982 = vst [vmem:[#allocation21_spill] sm:$0xff] %v4191_v49  ;;  %5983 = vst [vmem:[#allocation22_spill] sm:$0xff] %v4195_v52 }
  0x75   : > { %5990 = vst [vmem:[#allocation29_spill] sm:$0xff] %v4230_v14 }
  0x77   : > { %3460 = vset.pattern.permute.xlu1 %v5877_v4 }
  0x78   : > { %383 = vperm.xlu1 %3460, %v3968_v22   ;;  %1280 = vperm.xlu0 %3495, %v4084_v5  }
  0x7c   : > { %3461 = vset.pattern.permute.xlu1 %v5881_v10  ;;  %3506 = vset.pattern.permute.xlu0 %v5877_v4 }
  0x7d   : > { %1216 = vperm.xlu1 %3461, %v3790_v15   ;;  %393 = vperm.xlu0 %3506, %v296_v6  }
  0x81   : > { %3462 = vset.pattern.permute.xlu1 %v5884_v30  ;;  %408 = vperm.xlu0 %3506, %v4094_v31  }
  0x82   : > { %1623 = vperm.xlu1 %3462, %v3790_v15   ;;  %v314_v15 = vld [vmem:[%s3745_s30 + $0xe0] sm:$0xff] }
  0x85   : > { %423 = vperm.xlu0 %3506, %v4100_v41   ;;  %v5992_v41 = vmov 2  }
  0x86   : > { %3463 = vset.pattern.permute.xlu1 %v5877_v4 }
  0x87   : > { %388 = vperm.xlu1 %3463, %v3875_v48  }
  0x89   : > { %438 = vperm.xlu0 %3506, %v305_v1   ;;  %v4218_v1 = vrot.slane %v3241_v43, %v326_v21 }
  0x8b   : > { %3464 = vset.pattern.permute.xlu1 %v5879_v25  ;;  %5986 = vst [vmem:[#allocation25_spill] sm:$0xff] %v4218_v1 }
  0x8c   : > { %817 = vperm.xlu1 %3464, %v3875_v48  }
  0x8d   : > { %453 = vperm.xlu0 %3506, %v308_v2  }
  0x90   : > { %3465 = vset.pattern.permute.xlu1 %v5884_v30 }
  0x91   : > { %1627 = vperm.xlu1 %3465, %v3968_v22   ;;  %468 = vperm.xlu0 %3506, %v311_v7   ;;  %v334_v22 = vsub.s32 3, %v4136_v17  ;;  %v4223_v7 = vrot.slane %v3240_v57, %v326_v21 }
  0x93   : > { %v4162_v34 = vrot.slane %v340_v27, %v334_v22  ;;  %v4186_v45 = vrot.slane %v318_v28, %v334_v22  ;;  %v4197_v53 = vrot.slane %v3239_v35, %v334_v22  ;;  %v4220_v2 = vrot.slane %v3241_v43, %v334_v22  ;;  %5988 = vst [vmem:[#allocation27_spill] sm:$0xff] %v4223_v7 }
  0x95   : > { %3466 = vset.pattern.permute.xlu1 %v5881_v10  ;;  %483 = vperm.xlu0 %3506, %v314_v15   ;;  %5980 = vst [vmem:[#allocation19_spill] sm:$0xff] %v4186_v45  ;;  %5984 = vst [vmem:[#allocation23_spill] sm:$0xff] %v4197_v53  ;;  %v4225_v15 = vrot.slane %v3240_v57, %v334_v22 }
  0x96   : > { %1224 = vperm.xlu1 %3466, %v3875_v48   ;;  %5987 = vst [vmem:[#allocation26_spill] sm:$0xff] %v4220_v2 }
  0x98   : > { %v349_v8 = vpop.permute.xlu1 %348  ;;  %v344_v9 = vpop.permute.xlu0 %343 }
  0x99   : > { %3517 = vset.pattern.permute.xlu0 %v5884_v30  ;;  %v527_v50 = vmul.f32 %v4160_v33, %v349_v8  ;;  %v529_v51 = vmul.f32 %v4162_v34, %v349_v8  ;;  %v526_v58 = vmul.f32 %v4170_v37, %v349_v8  ;;  %v528_v59 = vmul.f32 %v4172_v38, %v349_v8 }
  0x9a   : > { %3467 = vset.pattern.permute.xlu1 %v5879_v25  ;;  %1655 = vperm.xlu0 %3517, %v4118_v11   ;;  %v522_v62 = vmul.f32 %v4170_v37, %v344_v9  ;;  %v523_v63 = vmul.f32 %v4160_v33, %v344_v9  ;;  %v524_v0 = vmul.f32 %v4172_v38, %v344_v9 }
  0x9b   : > { %821 = vperm.xlu1 %3467, %v296_v6   ;;  %v657_v27 = vadd.f32 %v529_v51, %v4186_v45  ;;  %v654_v35 = vadd.f32 %v526_v58, %v4176_v40  ;;  %v656_v43 = vadd.f32 %v528_v59, %v4178_v42 }
  0x9c   : > { %v4120_v12 = vpop.permute.xlu0 %363 }
  0x9d   : > { %v4123_v3 = vpop.permute.xlu1 %1188 }
  0x9e   : > { %1667 = vperm.xlu0 %3517, %v4127_v13  }
  0x9f   : > { %3468 = vset.pattern.permute.xlu1 %v5877_v4 }
  0xa0   : > { %398 = vperm.xlu1 %3468, %v3988_v32   ;;  %v4130_v48 = vpop.permute.xlu0 %378 }
  0xa1   : > { %5973 = vst [vmem:[#allocation12_spill] sm:$0xff] %v4130_v48 }
  0xa2   : > { %v4133_v16 = vpop.permute.xlu1 %785  ;;  %1679 = vperm.xlu0 %3517, %v307_v20   ;;  %v4232_v20 = vrot.slane %v3240_v57, %v330_v26  ;;  %v650_v26 = vadd.f32 %v522_v62, %v4176_v40  ;;  %v652_v57 = vadd.f32 %v524_v0, %v4178_v42  ;;  %v310_v62 = vld [vmem:[%s3745_s30 + $0xc0] sm:$0xff]  ;;  %v1337_v0 = vmul.f32 %v4223_v7, %v4123_v3 }
  0xa3   : > { %v934_v28 = vmul.f32 %v4191_v49, %v4133_v16  ;;  %v936_v21 = vmul.f32 %v4197_v53, %v4133_v16  ;;  %v933_v58 = vmul.f32 %v4189_v46, %v4133_v16  ;;  %v935_v59 = vmul.f32 %v4195_v52, %v4133_v16 }
  0xa4   : > { %3469 = vset.pattern.permute.xlu1 %v5881_v10  ;;  %5991 = vst [vmem:[#allocation30_spill] sm:$0xff] %v4232_v20  ;;  %v1336_v10 = vmul.f32 %v4230_v14, %v4123_v3  ;;  %v1338_v16 = vmul.f32 %v4232_v20, %v4123_v3 }
  0xa5   : > { %1228 = vperm.xlu1 %3469, %v296_v6   ;;  %v4138_v18 = vpop.permute.xlu0 %1595 }
  0xa6   : > { %1691 = vperm.xlu0 %3517, %v310_v62  }
  0xa7   : > { %v4140_v19 = vpop.permute.xlu1 %353 }
  0xa9   : > { %3470 = vset.pattern.permute.xlu1 %v5884_v30  ;;  %v4146_v23 = vpop.permute.xlu0 %1607 }
  0xaa   : > { %1635 = vperm.xlu1 %3470, %v296_v6   ;;  %v525_v6 = vmul.f32 %v4162_v34, %v344_v9  ;;  %v655_v9 = vadd.f32 %v527_v50, %v4184_v44  ;;  %v651_v50 = vadd.f32 %v523_v63, %v4184_v44  ;;  %v4264_v63 = vmul.f32 %v4172_v38, %v4120_v12 }
  0xac   : > { %v4158_v29 = vpop.permute.xlu1 %1192  ;;  %v653_v51 = vadd.f32 %v525_v6, %v4186_v45  ;;  %v1339_v6 = vmul.f32 %v4225_v15, %v4123_v3 }
  0xad   : > { %v4167_v36 = vpop.permute.xlu0 %1619  ;;  %v1341_v17 = vmul.f32 %v4223_v7, %v4158_v29 }
  0xae   : > { %5976 = vst [vmem:[#allocation15_spill] sm:$0xff] %v4167_v36  ;;  %3471 = vset.pattern.permute.xlu1 %v5877_v4  ;;  %v4250_v4 = vmul.f32 %v4170_v37, %v4120_v12 }
  0xaf   : > { %403 = vperm.xlu1 %3471, %v3895_v55  }
  0xb1   : > { %v4199_v54 = vpop.permute.xlu1 %1599  ;;  %v4201_v56 = vpop.permute.xlu0 %1631 }
  0xb2   : > { %5985 = vst [vmem:[#allocation24_spill] sm:$0xff] %v4201_v56  ;;  %v1748_v3 = vmul.f32 %v4218_v1, %v4199_v54 }
  0xb3   : > { %3472 = vset.pattern.permute.xlu1 %v5879_v25  ;;  %v4254_v25 = vmul.f32 %v4160_v33, %v4120_v12 }
  0xb4   : > { %829 = vperm.xlu1 %3472, %v3895_v55  }
  0xb5   : > { %v4227_v8 = vpop.permute.xlu0 %1643 }
  0xb6   : > { %5989 = vst [vmem:[#allocation28_spill] sm:$0xff] %v4227_v8  ;;  %v4240_v22 = vpop.permute.xlu1 %358  ;;  %v1064_v8 = vadd.f32 %v936_v21, %v657_v27  ;;  %v1063_v27 = vadd.f32 %v935_v59, %v656_v43 }
  0xb8   : > { %3473 = vset.pattern.permute.xlu1 %v5884_v30  ;;  %v1062_v30 = vadd.f32 %v934_v28, %v655_v9  ;;  %v1343_v9 = vmul.f32 %v4225_v15, %v4158_v29  ;;  %v1061_v28 = vadd.f32 %v933_v58, %v654_v35  ;;  %v1744_v35 = vmul.f32 %v4218_v1, %v4138_v18 }
  0xb9   : > { %1639 = vperm.xlu1 %3473, %v3988_v32  }
  0xba   : > { %v782_v24 = vpop.permute.xlu0 %781  ;;  %v1469_v43 = vadd.f32 %v1341_v17, %v1062_v30  ;;  %v1747_v30 = vmul.f32 %v4209_v60, %v4199_v54  ;;  %v1749_v17 = vmul.f32 %v4211_v61, %v4199_v54 }
  0xbb   : > { %v929_v32 = vmul.f32 %v4189_v46, %v782_v24  ;;  %v930_v56 = vmul.f32 %v4191_v49, %v782_v24  ;;  %v931_v13 = vmul.f32 %v4195_v52, %v782_v24  ;;  %v932_v48 = vmul.f32 %v4197_v53, %v782_v24  ;;  %v4281_v47 = vpop.permute.xlu1 %793  ;;  %v313_v46 = vld [vmem:[%s3745_s30 + $0xd8] sm:$0xff] }
  0xbc   : > { %v1743_v24 = vmul.f32 %v4209_v60, %v4138_v18  ;;  %v1745_v52 = vmul.f32 %v4211_v61, %v4138_v18  ;;  %1703 = vperm.xlu0 %3517, %v313_v46   ;;  %v1876_v59 = vadd.f32 %v1748_v3, %v1469_v43  ;;  %v4321_v3 = vadd.f32 %v4250_v4, %v4176_v40 }
  0xbd   : > { %v1057_v21 = vadd.f32 %v929_v32, %v650_v26  ;;  %v1059_v62 = vadd.f32 %v931_v13, %v652_v57  ;;  %3474 = vset.pattern.permute.xlu1 %v5992_v41  ;;  %v1058_v11 = vadd.f32 %v930_v56, %v651_v50  ;;  %v1060_v36 = vadd.f32 %v932_v48, %v653_v51 }
  0xbe   : > { %1236 = vperm.xlu1 %3474, %v3895_v55   ;;  %v4294_v7 = vpop.permute.xlu0 %789  ;;  %v1746_v13 = vmul.f32 %v4220_v2, %v4138_v18  ;;  %v1750_v48 = vmul.f32 %v4220_v2, %v4199_v54  ;;  %v1340_v56 = vmul.f32 %v4230_v14, %v4158_v29  ;;  %v1342_v26 = vmul.f32 %v4232_v20, %v4158_v29 }
  0xbf   : > { %v1465_v57 = vadd.f32 %v1337_v0, %v1058_v11  ;;  %v1467_v50 = vadd.f32 %v1339_v6, %v1060_v36  ;;  %v1464_v51 = vadd.f32 %v1336_v10, %v1057_v21  ;;  %v1466_v58 = vadd.f32 %v1338_v16, %v1059_v62 }
  0xc0   : > { %v4306_v55 = vpop.permute.xlu1 %1603  ;;  %v1471_v32 = vadd.f32 %v1343_v9, %v1064_v8  ;;  %v5994_v18 = vmov 1   ;;  %v541_v10 = vmul.f32 %v4162_v34, %v4120_v12  ;;  %v1468_v36 = vadd.f32 %v1340_v56, %v1061_v28 }
  0xc1   : > { %5993 = vst [vmem:[#allocation31_spill] sm:$0xff] %v4306_v55  ;;  %v1872_v29 = vadd.f32 %v1744_v35, %v1465_v57  ;;  %v1874_v46 = vadd.f32 %v1746_v13, %v1467_v50  ;;  %v1871_v20 = vadd.f32 %v1743_v24, %v1464_v51  ;;  %v1873_v55 = vadd.f32 %v1745_v52, %v1466_v58 }
  0xc2   : > { %3475 = vset.pattern.permute.xlu1 %v5994_v18  ;;  %v4313_v14 = vpop.permute.xlu0 %801  ;;  %v1878_v11 = vadd.f32 %v1750_v48, %v1471_v32  ;;  %v1470_v8 = vadd.f32 %v1342_v26, %v1063_v27  ;;  %3520 = vset.pattern.permute.xlu0 %v5994_v18  ;;  %v1875_v52 = vadd.f32 %v1747_v30, %v1468_v36  ;;  %v5996_v13 = vmov 0   ;;  %v5999_v36 = vld [vmem:[#allocation20_spill] sm:$0xff] }
  0xc3   : > { %833 = vperm.xlu1 %3475, %v4094_v31   ;;  %v2000_v0 = vmax.f32 %v1872_v29, 0.0  ;;  %v2002_v6 = vmax.f32 %v1874_v46, 0.0  ;;  %v1999_v16 = vmax.f32 %v1871_v20, 0.0  ;;  %v2001_v54 = vmax.f32 %v1873_v55, 0.0  ;;  %873 = vperm.xlu0 %3520, %v4084_v5   ;;  %v5998_v46 = vld [vmem:[#allocation27_spill] sm:$0xff] }
  0xc4   : > { %v4328_v12 = vadd.f32 %v4254_v25, %v4184_v44  ;;  %v4332_v28 = vadd.f32 %v4264_v63, %v4178_v42  ;;  %v2004_v20 = vmax.f32 %v1876_v59, 0.0  ;;  %v1877_v4 = vadd.f32 %v1749_v17, %v1470_v8 }
  0xc5   : > { %v4323_v9 = vpop.permute.xlu1 %1200  ;;  %2262 = vmatprep.mubr.f32.mxu1 %v2000_v0  ;;  %2487 = vmatprep.mubr.f32.mxu0 %v2002_v6  ;;  %v4337_v21 = vadd.f32 %v541_v10, %v4186_v45  ;;  %v530_v5 = vmul.f32 %v4170_v37, %v4140_v19  ;;  %v531_v25 = vmul.f32 %v4160_v33, %v4140_v19  ;;  %v2006_v62 = vmax.f32 %v1878_v11, 0.0  ;;  %v6000_v0 = vld [vmem:[#allocation22_spill] sm:$0xff] }
  0xc6   : > { %v4334_v27 = vpop.permute.xlu0 %813  ;;  %2263 = vmatmul.mubr.f32.vlgmr.msra.gmra.mrb[0].mxu1 %v1999_v16  ;;  %2488 = vmatmul.mubr.f32.vlgmr.msra.gmra.mrb[0].mxu0 %v2001_v54  ;;  %v532_v63 = vmul.f32 %v4172_v38, %v4140_v19  ;;  %v535_v24 = vmul.f32 %v4160_v33, %v4240_v22  ;;  %v537_v35 = vmul.f32 %v4162_v34, %v4240_v22  ;;  %v2003_v26 = vmax.f32 %v1875_v52, 0.0 }
  0xc7   : > { %5995 = vst [vmem:[#allocation32_spill] sm:$0xff] %v4334_v27  ;;  %3477 = vset.pattern.permute.xlu1 %v5996_v13  ;;  %2267 = vmatprep.mubr.f32.mxu1 %v2004_v20  ;;  %v533_v43 = vmul.f32 %v4162_v34, %v4140_v19  ;;  %v4354_v48 = vmul.f32 %v4209_v60, %v4146_v23  ;;  %v2005_v51 = vmax.f32 %v1877_v4, 0.0  ;;  %v6007_v27 = vmov 3  }
  0xc8   : > { %v1756_v56 = vmul.f32 %v4218_v1, %v4146_v23  ;;  %2492 = vmatprep.mubr.f32.mxu0 %v2006_v62  ;;  %413 = vperm.xlu1 %3477, %v4008_v39   ;;  %v4361_v55 = vmul.f32 %v4211_v61, %v4146_v23  ;;  %v942_v57 = vmul.f32 %v4191_v49, %v4281_v47 }
  0xc9   : > { %v944_v19 = vmul.f32 %v4197_v53, %v4281_v47  ;;  %v1758_v59 = vmul.f32 %v4220_v2, %v4146_v23  ;;  %v534_v32 = vmul.f32 %v4170_v37, %v4240_v22  ;;  %v536_v30 = vmul.f32 %v4172_v38, %v4240_v22 }
  0xca   : > { %v798_v50 = vpop.permute.xlu1 %797  ;;  %v4367_v58 = vpop.permute.xlu0 %825  ;;  %v658_v17 = vadd.f32 %v530_v5, %v4176_v40  ;;  %2268 = vmatmul.mubr.f32.gmra.mrb[2].mxu1 %v2003_v26  ;;  %2493 = vmatmul.mubr.f32.gmra.mrb[2].mxu0 %v2005_v51  ;;  %v663_v29 = vadd.f32 %v535_v24, %v4184_v44  ;;  %v1349_v10 = vmul.f32 %v5998_v46, %v4323_v9 }
  0xcb   : > { %5997 = vst [vmem:[#allocation33_spill] sm:$0xff] %v4367_v58  ;;  %v665_v11 = vadd.f32 %v537_v35, %v4186_v45  ;;  %v1351_v23 = vmul.f32 %v4225_v15, %v4323_v9  ;;  %v941_v8 = vmul.f32 %v5999_v36, %v4281_v47  ;;  %v943_v22 = vmul.f32 %v6000_v0, %v4281_v47  ;;  %v6002_v35 = vld [vmem:[#allocation15_spill] sm:$0xff] }
  0xcc   : > { %v659_v6 = vadd.f32 %v531_v25, %v4184_v44  ;;  %v660_v16 = vadd.f32 %v532_v63, %v4178_v42  ;;  %3478 = vset.pattern.permute.xlu1 %v5992_v41  ;;  %v937_v54 = vmul.f32 %v5999_v36, %v4294_v7  ;;  %v938_v52 = vmul.f32 %v4191_v49, %v4294_v7 }
  0xcd   : > { %1240 = vperm.xlu1 %3478, %v4094_v31   ;;  %v1070_v4 = vadd.f32 %v942_v57, %v663_v29  ;;  %v1072_v5 = vadd.f32 %v944_v19, %v665_v11  ;;  %v661_v47 = vadd.f32 %v533_v43, %v4186_v45  ;;  %v939_v25 = vmul.f32 %v6000_v0, %v4294_v7  ;;  %v6006_v29 = vld [vmem:[#allocation29_spill] sm:$0xff] }
  0xce   : > { %v4394_v20 = vpop.permute.xlu0 %837  ;;  %v940_v62 = vmul.f32 %v4197_v53, %v4294_v7  ;;  %v662_v24 = vadd.f32 %v534_v32, %v4176_v40  ;;  %v4404_v26 = vmul.f32 %v4209_v60, %v6002_v35  ;;  %v664_v57 = vadd.f32 %v536_v30, %v4178_v42  ;;  %v6009_v30 = vld [vmem:[#allocation30_spill] sm:$0xff] }
  0xcf   : > { %6001 = vst [vmem:[#allocation27_spill] sm:$0xff] %v4394_v20  ;;  %v369_v63 = vpop.permute.xlu1 %368  ;;  %v1477_v51 = vadd.f32 %v1349_v10, %v1070_v4  ;;  %v1479_v58 = vadd.f32 %v1351_v23, %v1072_v5  ;;  %v4409_v43 = vmul.f32 %v4218_v1, %v6002_v35  ;;  %v4413_v19 = vmul.f32 %v4220_v2, %v6002_v35 }
  0xd0   : > { %6003 = vst [vmem:[#allocation20_spill] sm:$0xff] %v4404_v26  ;;  %v1069_v7 = vadd.f32 %v941_v8, %v662_v24  ;;  %v1348_v32 = vmul.f32 %v6006_v29, %v4323_v9  ;;  %v1065_v11 = vadd.f32 %v937_v54, %v658_v17  ;;  %v1066_v20 = vadd.f32 %v938_v52, %v659_v6 }
  0xd1   : > { %6004 = vst [vmem:[#allocation34_spill] sm:$0xff] %v4409_v43  ;;  %6005 = vst [vmem:[#allocation35_spill] sm:$0xff] %v4413_v19  ;;  %3479 = vset.pattern.permute.xlu1 %v6007_v27  ;;  %v1071_v23 = vadd.f32 %v943_v22, %v664_v57  ;;  %v1350_v4 = vmul.f32 %v6009_v30, %v4323_v9  ;;  %v1067_v5 = vadd.f32 %v939_v25, %v660_v16 }
  0xd2   : > { %v4418_v10 = vpop.permute.xlu0 %849  ;;  %v1068_v26 = vadd.f32 %v940_v62, %v661_v47  ;;  %v949_v43 = vmul.f32 %v5999_v36, %v4313_v14  ;;  %v950_v8 = vmul.f32 %v4191_v49, %v4313_v14  ;;  %1647 = vperm.xlu1 %3479, %v4094_v31   ;;  %v951_v17 = vmul.f32 %v6000_v0, %v4313_v14 }
  0xd3   : > { %6008 = vst [vmem:[#allocation29_spill] sm:$0xff] %v4418_v10  ;;  %v952_v6 = vmul.f32 %v4197_v53, %v4313_v14  ;;  %v4431_v54 = vadd.f32 %v1756_v56, %v1477_v51  ;;  %v4433_v9 = vadd.f32 %v1758_v59, %v1479_v58  ;;  %v945_v16 = vmul.f32 %v5999_v36, %v798_v50  ;;  %v6013_v59 = vld [vmem:[#allocation31_spill] sm:$0xff] }
  0xd4   : > { %v1205_v22 = vpop.permute.xlu1 %1204  ;;  %v946_v52 = vmul.f32 %v4191_v49, %v798_v50  ;;  %v948_v47 = vmul.f32 %v4197_v53, %v798_v50  ;;  %v1476_v25 = vadd.f32 %v1348_v32, %v1069_v7  ;;  %v947_v31 = vmul.f32 %v6000_v0, %v798_v50  ;;  %v6014_v50 = vld [vmem:[#allocation10_spill] sm:$0xff] }
  0xd5   : > { %6010 = vst [vmem:[#allocation30_spill] sm:$0xff] %v4431_v54  ;;  %6011 = vst [vmem:[#allocation36_spill] sm:$0xff] %v4433_v9  ;;  %v543_v62 = vmul.f32 %v4160_v33, %v369_v63  ;;  %v545_v24 = vmul.f32 %v4162_v34, %v369_v63  ;;  %v1478_v14 = vadd.f32 %v1350_v4, %v1071_v23 }
  0xd6   : > { %v4441_v57 = vpop.permute.xlu0 %861  ;;  %v542_v56 = vmul.f32 %v4170_v37, %v369_v63  ;;  %v544_v58 = vmul.f32 %v4172_v38, %v369_v63  ;;  %3480 = vset.pattern.permute.xlu1 %v5996_v13  ;;  %v1752_v51 = vmul.f32 %v4218_v1, %v6013_v59  ;;  %v1754_v7 = vmul.f32 %v4220_v2, %v6013_v59 }
  0xd7   : > { %6012 = vst [vmem:[#allocation37_spill] sm:$0xff] %v4441_v57  ;;  %418 = vperm.xlu1 %3480, %v6014_v50   ;;  %v1751_v32 = vmul.f32 %v4209_v60, %v6013_v59  ;;  %v1753_v23 = vmul.f32 %v4211_v61, %v6013_v59  ;;  %v4458_v10 = vadd.f32 %v4354_v48, %v1476_v25 }
  0xd8   : > { %v1074_v19 = vadd.f32 %v946_v52, %v4328_v12  ;;  %v1076_v13 = vadd.f32 %v948_v47, %v4337_v21  ;;  %v1073_v35 = vadd.f32 %v945_v16, %v4321_v3  ;;  %v4464_v53 = vadd.f32 %v4361_v55, %v1478_v14 }
  0xd9   : > { %v1612_v57 = vpop.permute.xlu1 %1611  ;;  %v1075_v0 = vadd.f32 %v947_v31, %v4332_v28  ;;  %v671_v59 = vadd.f32 %v543_v62, %v4184_v44  ;;  %v673_v4 = vadd.f32 %v545_v24, %v4186_v45  ;;  %v1353_v9 = vmul.f32 %v5998_v46, %v1205_v22 }
  0xda   : > { %v1355_v48 = vmul.f32 %v4225_v15, %v1205_v22  ;;  %v670_v12 = vadd.f32 %v542_v56, %v4176_v40  ;;  %v672_v21 = vadd.f32 %v544_v58, %v4178_v42  ;;  %v1760_v52 = vmul.f32 %v4218_v1, %v1612_v57 }
  0xdb   : > { %v1197_v63 = vpop.permute.xlu0 %1196  ;;  %3481 = vset.pattern.permute.xlu1 %v5994_v18  ;;  %v1762_v47 = vmul.f32 %v4220_v2, %v1612_v57  ;;  %v1352_v25 = vmul.f32 %v6006_v29, %v1205_v22  ;;  %v1354_v31 = vmul.f32 %v6009_v30, %v1205_v22  ;;  %v1078_v42 = vadd.f32 %v950_v8, %v671_v59 }
  0xdc   : > { %v1344_v3 = vmul.f32 %v6006_v29, %v1197_v63  ;;  %v1345_v55 = vmul.f32 %v5998_v46, %v1197_v63  ;;  %v1346_v28 = vmul.f32 %v6009_v30, %v1197_v63  ;;  %v1347_v16 = vmul.f32 %v4225_v15, %v1197_v63  ;;  %841 = vperm.xlu1 %3481, %v6014_v50  }
  0xdd   : > { %v1080_v40 = vadd.f32 %v952_v6, %v673_v4  ;;  %v1077_v18 = vadd.f32 %v949_v43, %v670_v12  ;;  %v1079_v45 = vadd.f32 %v951_v17, %v672_v21  ;;  %v1481_v63 = vadd.f32 %v1353_v9, %v1074_v19  ;;  %v6015_v4 = vld [vmem:[#allocation21_spill] sm:$0xff] }
  0xde   : > { %v374_v62 = vpop.permute.xlu1 %373  ;;  %v1473_v24 = vadd.f32 %v1345_v55, %v1066_v20  ;;  %v1475_v14 = vadd.f32 %v1347_v16, %v1068_v26  ;;  %v1472_v56 = vadd.f32 %v1344_v3, %v1065_v11  ;;  %v1474_v58 = vadd.f32 %v1346_v28, %v1067_v5  ;;  %v6018_v3 = vld [vmem:[#allocation23_spill] sm:$0xff]  ;;  %v6021_v16 = vld [vmem:[#allocation36_spill] sm:$0xff] }
  0xdf   : > { %v1483_v44 = vadd.f32 %v1355_v48, %v1076_v13  ;;  %v1759_v54 = vmul.f32 %v4209_v60, %v1612_v57  ;;  %v1761_v1 = vmul.f32 %v4211_v61, %v1612_v57  ;;  %v1209_v2 = vpop.permute.xlu0 %1208  ;;  %v1888_v26 = vadd.f32 %v1760_v52, %v1481_v63  ;;  %v6016_v48 = vld [vmem:[#allocation22_spill] sm:$0xff] }
  0xe0   : > { %3482 = vset.pattern.permute.xlu1 %v6007_v27  ;;  %v1880_v50 = vadd.f32 %v1752_v51, %v1473_v24  ;;  %v1882_v22 = vadd.f32 %v1754_v7, %v1475_v14  ;;  %v1879_v49 = vadd.f32 %v1751_v32, %v1472_v56  ;;  %v1881_v20 = vadd.f32 %v1753_v23, %v1474_v58  ;;  %v6024_v14 = vld [vmem:[#allocation26_spill] sm:$0xff] }
  0xe1   : > { %1651 = vperm.xlu1 %3482, %v4008_v39   ;;  %v1890_v11 = vadd.f32 %v1762_v47, %v1483_v44  ;;  %v1480_v5 = vadd.f32 %v1352_v25, %v1073_v35  ;;  %v1482_v43 = vadd.f32 %v1354_v31, %v1075_v0  ;;  %v1357_v9 = vmul.f32 %v5998_v46, %v1209_v2 }
  0xe2   : > { %v2008_v19 = vmax.f32 %v1880_v50, 0.0  ;;  %v2010_v13 = vmax.f32 %v1882_v22, 0.0  ;;  %v2007_v17 = vmax.f32 %v1879_v49, 0.0  ;;  %v2009_v6 = vmax.f32 %v1881_v20, 0.0 }
  0xe3   : > { %v806_v8 = vpop.permute.xlu1 %805  ;;  %v1359_v57 = vmul.f32 %v4225_v15, %v1209_v2  ;;  %v1887_v51 = vadd.f32 %v1759_v54, %v1480_v5  ;;  %v4489_v7 = vadd.f32 %v1761_v1, %v1482_v43  ;;  %v546_v32 = vmul.f32 %v4170_v37, %v374_v62  ;;  %v4501_v54 = vld [vmem:[%s3745_s30 + $0xd0] sm:$0xff]  ;;  %v6026_v43 = vld [vmem:[#allocation19_spill] sm:$0xff] }
  0xe4   : > { %v547_v39 = vmul.f32 %v4160_v33, %v374_v62  ;;  %v548_v44 = vmul.f32 %v4172_v38, %v374_v62  ;;  %2272 = vmatprep.mubr.f32.mxu1 %v2008_v19  ;;  %2497 = vmatprep.mubr.f32.mxu0 %v2010_v13  ;;  %v2011_v0 = vmax.f32 %v4458_v10, 0.0  ;;  %v549_v49 = vmul.f32 %v4162_v34, %v374_v62  ;;  %v6017_v10 = vld [vmem:[#allocation10_spill] sm:$0xff]  ;;  %v6023_v62 = vld [vmem:[#allocation25_spill] sm:$0xff] }
  0xe5   : > { %v1356_v35 = vmul.f32 %v6006_v29, %v1209_v2  ;;  %v1358_v50 = vmul.f32 %v6009_v30, %v1209_v2  ;;  %3483 = vset.pattern.permute.xlu1 %v5992_v41  ;;  %2273 = vmatmul.mubr.f32.gmra.mrb[4].mxu1 %v2007_v17  ;;  %v2013_v1 = vmax.f32 %v4464_v53, 0.0  ;;  %v953_v23 = vmul.f32 %v5999_v36, %v806_v8  ;;  %v6019_v2 = vld [vmem:[#allocation30_spill] sm:$0xff]  ;;  %v6028_v17 = vld [vmem:[#allocation16_spill] sm:$0xff] }
  0xe6   : > { %v954_v59 = vmul.f32 %v6015_v4, %v806_v8  ;;  %v955_v12 = vmul.f32 %v6016_v48, %v806_v8  ;;  %2498 = vmatmul.mubr.f32.gmra.mrb[4].mxu0 %v2009_v6  ;;  %1248 = vperm.xlu1 %3483, %v6017_v10   ;;  %v2016_v21 = vmax.f32 %v1888_v26, 0.0  ;;  %v956_v55 = vmul.f32 %v6018_v3, %v806_v8  ;;  %v6025_v26 = vld [vmem:[#allocation18_spill] sm:$0xff] }
  0xe7   : > { %v6020_v28 = vmax.f32 %v6019_v2, 0.0  ;;  %v6022_v52 = vmax.f32 %v6021_v16, 0.0  ;;  %v2018_v47 = vmax.f32 %v1890_v11, 0.0  ;;  %v1485_v25 = vadd.f32 %v1357_v9, %v1078_v42  ;;  %885 = vperm.xlu0 %3520, %v4501_v54   ;;  %v4520_v11 = vld [vmem:[%s3745_s30 + $0xe8] sm:$0xff] }
  0xe8   : > { %v1616_v53 = vpop.permute.xlu1 %1615  ;;  %v1487_v31 = vadd.f32 %v1359_v57, %v1080_v40  ;;  %v1484_v22 = vadd.f32 %v1356_v35, %v1077_v18  ;;  %v1486_v20 = vadd.f32 %v1358_v50, %v1079_v45  ;;  %v675_v5 = vadd.f32 %v547_v39, %v6025_v26  ;;  %v6029_v57 = vld [vmem:[#allocation17_spill] sm:$0xff] }
  0xe9   : > { %2277 = vmatprep.mubr.f32.mxu1 %v6020_v28  ;;  %2502 = vmatprep.mubr.f32.mxu0 %v6022_v52  ;;  %v1764_v24 = vmul.f32 %v6023_v62, %v1616_v53  ;;  %v1766_v56 = vmul.f32 %v6024_v14, %v1616_v53  ;;  %v1763_v58 = vmul.f32 %v4209_v60, %v1616_v53  ;;  %v6027_v40 = vmov 1  }
  0xea   : > { %v1765_v63 = vmul.f32 %v4211_v61, %v1616_v53  ;;  %2278 = vmatmul.mubr.f32.gmra.mrb[6].mxu1 %v2011_v0  ;;  %v677_v8 = vadd.f32 %v549_v49, %v6026_v43  ;;  %2503 = vmatmul.mubr.f32.gmra.mrb[6].mxu0 %v2013_v1  ;;  %v2015_v42 = vmax.f32 %v1887_v51, 0.0  ;;  %v674_v6 = vadd.f32 %v546_v32, %v6028_v17  ;;  %v6030_v0 = vld [vmem:[#allocation9_spill] sm:$0xff] }
  0xeb   : > { %3484 = vset.pattern.permute.xlu1 %v6027_v40  ;;  %v1892_v19 = vadd.f32 %v1764_v24, %v1485_v25  ;;  %v1894_v13 = vadd.f32 %v1766_v56, %v1487_v31  ;;  %2282 = vmatprep.mubr.f32.mxu1 %v2016_v21  ;;  %v2017_v9 = vmax.f32 %v4489_v7, 0.0  ;;  %v1891_v18 = vadd.f32 %v1763_v58, %v1484_v22  ;;  %v6034_v56 = vld [vmem:[#allocation34_spill] sm:$0xff] }
  0xec   : > { %2507 = vmatprep.mubr.f32.mxu0 %v2018_v47  ;;  %v1082_v45 = vadd.f32 %v954_v59, %v675_v5  ;;  %v676_v39 = vadd.f32 %v548_v44, %v6029_v57  ;;  %845 = vperm.xlu1 %3484, %v6030_v0   ;;  %v1893_v1 = vadd.f32 %v1765_v63, %v1486_v20  ;;  %v6031_v59 = vld [vmem:[#allocation15_spill] sm:$0xff]  ;;  %v6032_v47 = vmov 0  }
  0xed   : > { %v1213_v49 = vpop.permute.xlu1 %1212  ;;  %v2020_v35 = vmax.f32 %v1892_v19, 0.0  ;;  %v2022_v50 = vmax.f32 %v1894_v13, 0.0  ;;  %v1084_v10 = vadd.f32 %v956_v55, %v677_v8  ;;  %897 = vperm.xlu0 %3520, %v4520_v11   ;;  %v1081_v21 = vadd.f32 %v953_v23, %v674_v6  ;;  %v6033_v23 = vld [vmem:[#allocation8_spill] sm:$0xff]  ;;  %v6035_v63 = vld [vmem:[#allocation35_spill] sm:$0xff] }
  0xee   : > { %2283 = vmatmul.mubr.f32.gmra.mrb[8].mxu1 %v2015_v42  ;;  %v1361_v51 = vmul.f32 %v5998_v46, %v1213_v49  ;;  %v1363_v32 = vmul.f32 %v4225_v15, %v1213_v49  ;;  %v1360_v7 = vmul.f32 %v6006_v29, %v1213_v49  ;;  %v1769_v44 = vmul.f32 %v4211_v61, %v6031_v59  ;;  %v6037_v13 = vld [vmem:[#allocation12_spill] sm:$0xff] }
  0xef   : > { %2508 = vmatmul.mubr.f32.gmra.mrb[8].mxu0 %v2017_v9  ;;  %2287 = vmatprep.mubr.f32.mxu1 %v2020_v35  ;;  %v1083_v2 = vadd.f32 %v955_v12, %v676_v39  ;;  %v1362_v28 = vmul.f32 %v6009_v30, %v1213_v49  ;;  %v2019_v55 = vmax.f32 %v1891_v18, 0.0  ;;  %v2021_v25 = vmax.f32 %v1893_v1, 0.0  ;;  %v6036_v12 = vld [vmem:[#allocation20_spill] sm:$0xff]  ;;  %v4551_v35 = vpop.permute.xlu0 %1220 }
  0xf0   : > { %2512 = vmatprep.mubr.f32.mxu0 %v2022_v50  ;;  %v1489_v16 = vadd.f32 %v1361_v51, %v1082_v45  ;;  %v1491_v52 = vadd.f32 %v1363_v32, %v1084_v10  ;;  %v1488_v53 = vadd.f32 %v1360_v7, %v1081_v21  ;;  %3485 = vset.pattern.permute.xlu1 %v6032_v47 }
  0xf1   : > { %v1490_v31 = vadd.f32 %v1362_v28, %v1083_v2  ;;  %428 = vperm.xlu1 %3485, %v6033_v23   ;;  %3523 = vset.pattern.permute.xlu0 %v5992_v41  ;;  %v550_v6 = vmul.f32 %v4170_v37, %v6037_v13  ;;  %v551_v9 = vmul.f32 %v4160_v33, %v6037_v13 }
  0xf2   : > { %2288 = vmatmul.mubr.f32.gmra.mrb[10].mxu1 %v2019_v55  ;;  %v810_v24 = vpop.permute.xlu1 %809  ;;  %v1896_v58 = vadd.f32 %v6034_v56, %v1489_v16  ;;  %v1898_v22 = vadd.f32 %v6035_v63, %v1491_v52  ;;  %v1895_v20 = vadd.f32 %v6036_v12, %v1488_v53  ;;  %1292 = vperm.xlu0 %3523, %v4501_v54  }
  0xf3   : > { %2513 = vmatmul.mubr.f32.gmra.mrb[10].mxu0 %v2021_v25  ;;  %v1897_v19 = vadd.f32 %v1769_v44, %v1490_v31  ;;  %v552_v18 = vmul.f32 %v4172_v38, %v6037_v13  ;;  %v553_v45 = vmul.f32 %v4162_v34, %v6037_v13  ;;  %v678_v54 = vadd.f32 %v550_v6, %v6028_v17  ;;  %v4564_v44 = vpop.permute.xlu0 %1232 }
  0xf4   : > { %v2024_v5 = vmax.f32 %v1896_v58, 0.0  ;;  %v2026_v8 = vmax.f32 %v1898_v22, 0.0  ;;  %v2023_v42 = vmax.f32 %v1895_v20, 0.0  ;;  %v679_v50 = vadd.f32 %v551_v9, %v6025_v26 }
  0xf5   : > { %3486 = vset.pattern.permute.xlu1 %v5992_v41  ;;  %v2025_v39 = vmax.f32 %v1897_v19, 0.0  ;;  %v680_v1 = vadd.f32 %v552_v18, %v6029_v57  ;;  %v681_v10 = vadd.f32 %v553_v45, %v6026_v43  ;;  %v957_v51 = vmul.f32 %v5999_v36, %v810_v24 }
  0xf6   : > { %2292 = vmatprep.mubr.f32.mxu1 %v2024_v5  ;;  %1252 = vperm.xlu1 %3486, %v6030_v0   ;;  %v958_v32 = vmul.f32 %v6015_v4, %v810_v24  ;;  %v959_v21 = vmul.f32 %v6016_v48, %v810_v24  ;;  %v960_v7 = vmul.f32 %v6018_v3, %v810_v24 }
  0xf7   : > { %2517 = vmatprep.mubr.f32.mxu0 %v2026_v8  ;;  %v384_v49 = vpop.permute.xlu1 %383  ;;  %2293 = vmatmul.mubr.f32.gmra.mrb[12].mxu1 %v2023_v42  ;;  %v1085_v53 = vadd.f32 %v957_v51, %v678_v54  ;;  %v4575_v12 = vpop.permute.xlu0 %1244 }
  0xf8   : > { %2518 = vmatmul.mubr.f32.gmra.mrb[12].mxu0 %v2025_v39  ;;  %1304 = vperm.xlu0 %3523, %v4520_v11   ;;  %v1086_v16 = vadd.f32 %v958_v32, %v679_v50  ;;  %v1088_v52 = vadd.f32 %v960_v7, %v681_v10  ;;  %v1087_v25 = vadd.f32 %v959_v21, %v680_v1  ;;  %v6039_v39 = vld [vmem:[#allocation32_spill] sm:$0xff] }
  0xf9   : > { %v554_v8 = vmul.f32 %v4170_v37, %v384_v49  ;;  %v555_v42 = vmul.f32 %v4160_v33, %v384_v49  ;;  %v556_v19 = vmul.f32 %v4172_v38, %v384_v49  ;;  %v557_v13 = vmul.f32 %v4162_v34, %v384_v49 }
  0xfa   : > { %3487 = vset.pattern.permute.xlu1 %v6007_v27  ;;  %v961_v54 = vmul.f32 %v5999_v36, %v6039_v39  ;;  %v962_v50 = vmul.f32 %v6015_v4, %v6039_v39  ;;  %v963_v1 = vmul.f32 %v6016_v48, %v6039_v39  ;;  %v964_v10 = vmul.f32 %v6018_v3, %v6039_v39 }
  0xfb   : > { %1659 = vperm.xlu1 %3487, %v6030_v0   ;;  %v6038_v0 = vld [vmem:[#allocation11_spill] sm:$0xff] }
  0xfc   : > { %v1217_v59 = vpop.permute.xlu1 %1216  ;;  %3528 = vset.pattern.permute.xlu0 %v6032_v47 }
  0xfd   : > { %v1365_v2 = vmul.f32 %v5998_v46, %v1217_v59  ;;  %v1367_v28 = vmul.f32 %v4225_v15, %v1217_v59  ;;  %v1364_v11 = vmul.f32 %v6006_v29, %v1217_v59  ;;  %v1366_v55 = vmul.f32 %v6009_v30, %v1217_v59 }
  0xfe   : > { %v683_v59 = vadd.f32 %v555_v42, %v6025_v26 }
  0xff   : > { %3488 = vset.pattern.permute.xlu1 %v6032_v47  ;;  %v1493_v23 = vadd.f32 %v1365_v2, %v1086_v16  ;;  %v1495_v24 = vadd.f32 %v1367_v28, %v1088_v52  ;;  %v1492_v56 = vadd.f32 %v1364_v11, %v1085_v53  ;;  %v1494_v58 = vadd.f32 %v1366_v55, %v1087_v25  ;;  %v4597_v55 = vpop.permute.xlu0 %1256 }
 0x100   : > { %433 = vperm.xlu1 %3488, %v6038_v0   ;;  %v685_v2 = vadd.f32 %v557_v13, %v6026_v43  ;;  %v682_v28 = vadd.f32 %v554_v8, %v6028_v17  ;;  %v684_v11 = vadd.f32 %v556_v19, %v6029_v57  ;;  %v1368_v16 = vmul.f32 %v6006_v29, %v4551_v35 }
 0x101   : > { %v1624_v31 = vpop.permute.xlu1 %1623  ;;  %v1369_v52 = vmul.f32 %v5998_v46, %v4551_v35  ;;  %v1370_v53 = vmul.f32 %v6009_v30, %v4551_v35  ;;  %v1371_v25 = vmul.f32 %v4225_v15, %v4551_v35 }
 0x102   : > { %v1772_v63 = vmul.f32 %v6023_v62, %v1624_v31  ;;  %v1774_v22 = vmul.f32 %v6024_v14, %v1624_v31  ;;  %v1771_v20 = vmul.f32 %v4209_v60, %v1624_v31  ;;  %v1773_v5 = vmul.f32 %v4211_v61, %v1624_v31  ;;  %v3600_v31 = vld [vmem:[%s3745_s30 + $0x88] sm:$0xff] }
 0x103   : > { %v4620_v13 = vpop.permute.xlu0 %1268 }
 0x104   : > { %v1900_v6 = vadd.f32 %v1772_v63, %v1493_v23  ;;  %v1902_v9 = vadd.f32 %v1774_v22, %v1495_v24  ;;  %v1899_v18 = vadd.f32 %v1771_v20, %v1492_v56  ;;  %v1901_v45 = vadd.f32 %v1773_v5, %v1494_v58  ;;  %3489 = vset.pattern.permute.xlu1 %v6027_v40  ;;  %v6040_v22 = vld [vmem:[#allocation24_spill] sm:$0xff] }
 0x105   : > { %853 = vperm.xlu1 %3489, %v6038_v0   ;;  %v1090_v24 = vadd.f32 %v962_v50, %v683_v59  ;;  %v1092_v56 = vadd.f32 %v964_v10, %v685_v2  ;;  %v1089_v58 = vadd.f32 %v961_v54, %v682_v28  ;;  %v1091_v63 = vadd.f32 %v963_v1, %v684_v11 }
 0x106   : > { %v389_v49 = vpop.permute.xlu1 %388  ;;  %v2028_v51 = vmax.f32 %v1900_v6, 0.0  ;;  %v2030_v32 = vmax.f32 %v1902_v9, 0.0  ;;  %v2027_v21 = vmax.f32 %v1899_v18, 0.0  ;;  %v2029_v7 = vmax.f32 %v1901_v45, 0.0 }
 0x107   : > { %v4611_v20 = vmul.f32 %v4209_v60, %v6040_v22  ;;  %v1780_v5 = vmul.f32 %v6023_v62, %v6040_v22  ;;  %v1782_v8 = vmul.f32 %v6024_v14, %v6040_v22  ;;  %v558_v35 = vmul.f32 %v4170_v37, %v389_v49 }
 0x108   : > { %2297 = vmatprep.mubr.f32.mxu1 %v2028_v51  ;;  %2522 = vmatprep.mubr.f32.mxu0 %v2030_v32  ;;  %v559_v42 = vmul.f32 %v4160_v33, %v389_v49  ;;  %v561_v19 = vmul.f32 %v4162_v34, %v389_v49  ;;  %v1497_v6 = vadd.f32 %v1369_v52, %v1090_v24 }
 0x109   : > { %2298 = vmatmul.mubr.f32.gmra.mrb[14].mxu1 %v2027_v21  ;;  %2523 = vmatmul.mubr.f32.gmra.mrb[14].mxu0 %v2029_v7  ;;  %v1499_v9 = vadd.f32 %v1371_v25, %v1092_v56  ;;  %v1496_v18 = vadd.f32 %v1368_v16, %v1089_v58  ;;  %v1498_v45 = vadd.f32 %v1370_v53, %v1091_v63  ;;  %v4637_v53 = vpop.permute.xlu0 %1280 }
 0x10a   : > { %3490 = vset.pattern.permute.xlu1 %v6007_v27  ;;  %v560_v39 = vmul.f32 %v4172_v38, %v389_v49  ;;  %v687_v59 = vadd.f32 %v559_v42, %v6025_v26  ;;  %v689_v2 = vadd.f32 %v561_v19, %v6026_v43  ;;  %v686_v28 = vadd.f32 %v558_v35, %v6028_v17 }
 0x10b   : > { %1663 = vperm.xlu1 %3490, %v3600_v31   ;;  %v818_v23 = vpop.permute.xlu1 %817  ;;  %6041 = vst [vmem:[#allocation31_spill] sm:$0xff] %v4637_v53 }
 0x10c   : > { %v965_v54 = vmul.f32 %v5999_v36, %v818_v23  ;;  %v966_v50 = vmul.f32 %v6015_v4, %v818_v23  ;;  %v968_v1 = vmul.f32 %v6018_v3, %v818_v23  ;;  %v967_v49 = vmul.f32 %v6016_v48, %v818_v23  ;;  %v3601_v23 = vld [vmem:[%s3745_s30 + $0x98] sm:$0xff] }
 0x10d   : > { %v688_v56 = vadd.f32 %v560_v39, %v6029_v57 }
 0x10e   : > { %v1094_v25 = vadd.f32 %v966_v50, %v687_v59  ;;  %v1096_v31 = vadd.f32 %v968_v1, %v689_v2  ;;  %v1093_v24 = vadd.f32 %v965_v54, %v686_v28  ;;  %v1781_v54 = vmul.f32 %v4211_v61, %v6040_v22 }
 0x10f   : > { %3491 = vset.pattern.permute.xlu1 %v5992_v41  ;;  %v1095_v39 = vadd.f32 %v967_v49, %v688_v56 }
 0x110   : > { %1260 = vperm.xlu1 %3491, %v6038_v0   ;;  %v1628_v10 = vpop.permute.xlu1 %1627 }
 0x111   : > { %v1776_v51 = vmul.f32 %v6023_v62, %v1628_v10  ;;  %v1778_v32 = vmul.f32 %v6024_v14, %v1628_v10  ;;  %v1775_v21 = vmul.f32 %v4209_v60, %v1628_v10  ;;  %v1777_v7 = vmul.f32 %v4211_v61, %v1628_v10 }
 0x113   : > { %v1904_v11 = vadd.f32 %v1776_v51, %v1497_v6  ;;  %v1906_v0 = vadd.f32 %v1778_v32, %v1499_v9  ;;  %v1903_v16 = vadd.f32 %v1775_v21, %v1496_v18  ;;  %v1905_v52 = vadd.f32 %v1777_v7, %v1498_v45  ;;  %v4649_v32 = vld [vmem:[%s3745_s30 + $0xa0] sm:$0xff]  ;;  %v394_v21 = vpop.permute.xlu0 %393 }
 0x114   : > { %3492 = vset.pattern.permute.xlu1 %v6027_v40 }
 0x115   : > { %857 = vperm.xlu1 %3492, %v3601_v23   ;;  %v1225_v58 = vpop.permute.xlu1 %1224  ;;  %v2032_v63 = vmax.f32 %v1904_v11, 0.0  ;;  %v2034_v42 = vmax.f32 %v1906_v0, 0.0  ;;  %v2031_v19 = vmax.f32 %v1903_v16, 0.0  ;;  %v2033_v35 = vmax.f32 %v1905_v52, 0.0 }
 0x116   : > { %v1373_v6 = vmul.f32 %v5998_v46, %v1225_v58  ;;  %v1375_v9 = vmul.f32 %v4225_v15, %v1225_v58  ;;  %v1372_v18 = vmul.f32 %v6006_v29, %v1225_v58  ;;  %v1374_v45 = vmul.f32 %v6009_v30, %v1225_v58 }
 0x117   : > { %2302 = vmatprep.mubr.f32.mxu1 %v2032_v63  ;;  %2527 = vmatprep.mubr.f32.mxu0 %v2034_v42  ;;  %v562_v16 = vmul.f32 %v4170_v37, %v394_v21  ;;  %v563_v52 = vmul.f32 %v4160_v33, %v394_v21 }
 0x118   : > { %2303 = vmatmul.mubr.f32.gmra.mrb[16].mxu1 %v2031_v19  ;;  %2528 = vmatmul.mubr.f32.gmra.mrb[16].mxu0 %v2033_v35  ;;  %v1501_v50 = vadd.f32 %v1373_v6, %v1094_v25  ;;  %v1503_v1 = vadd.f32 %v1375_v9, %v1096_v31  ;;  %v1500_v10 = vadd.f32 %v1372_v18, %v1093_v24 }
 0x119   : > { %3493 = vset.pattern.permute.xlu1 %v6032_v47  ;;  %v1502_v51 = vadd.f32 %v1374_v45, %v1095_v39  ;;  %v564_v25 = vmul.f32 %v4172_v38, %v394_v21  ;;  %v565_v31 = vmul.f32 %v4162_v34, %v394_v21  ;;  %v4674_v21 = vld [vmem:[%s3745_s30 + $0xa8] sm:$0xff] }
 0x11a   : > { %443 = vperm.xlu1 %3493, %v4649_v32   ;;  %v822_v7 = vpop.permute.xlu1 %821  ;;  %v1908_v59 = vadd.f32 %v1780_v5, %v1501_v50  ;;  %v1910_v2 = vadd.f32 %v1782_v8, %v1503_v1  ;;  %v1907_v22 = vadd.f32 %v4611_v20, %v1500_v10  ;;  %v690_v20 = vadd.f32 %v562_v16, %v6028_v17 }
 0x11b   : > { %v1909_v0 = vadd.f32 %v1781_v54, %v1502_v51  ;;  %v691_v8 = vadd.f32 %v563_v52, %v6025_v26  ;;  %v692_v56 = vadd.f32 %v564_v25, %v6029_v57  ;;  %v693_v58 = vadd.f32 %v565_v31, %v6026_v43 }
 0x11c   : > { %v2036_v28 = vmax.f32 %v1908_v59, 0.0  ;;  %v2038_v49 = vmax.f32 %v1910_v2, 0.0  ;;  %v2035_v11 = vmax.f32 %v1907_v22, 0.0  ;;  %v969_v63 = vmul.f32 %v5999_v36, %v822_v7 }
 0x11d   : > { %v2037_v24 = vmax.f32 %v1909_v0, 0.0  ;;  %v970_v42 = vmul.f32 %v6015_v4, %v822_v7  ;;  %v971_v19 = vmul.f32 %v6016_v48, %v822_v7  ;;  %v972_v35 = vmul.f32 %v6018_v3, %v822_v7 }
 0x11e   : > { %3494 = vset.pattern.permute.xlu1 %v5992_v41  ;;  %2307 = vmatprep.mubr.f32.mxu1 %v2036_v28  ;;  %v1097_v1 = vadd.f32 %v969_v63, %v690_v20 }
 0x11f   : > { %1264 = vperm.xlu1 %3494, %v3601_v23   ;;  %2532 = vmatprep.mubr.f32.mxu0 %v2038_v49  ;;  %v399_v5 = vpop.permute.xlu1 %398  ;;  %v1098_v39 = vadd.f32 %v970_v42, %v691_v8  ;;  %v1100_v50 = vadd.f32 %v972_v35, %v693_v58  ;;  %v1099_v10 = vadd.f32 %v971_v19, %v692_v56  ;;  %v6042_v56 = vld [vmem:[#allocation33_spill] sm:$0xff] }
 0x120   : > { %2308 = vmatmul.mubr.f32.gmra.mrb[18].mxu1 %v2035_v11  ;;  %2533 = vmatmul.mubr.f32.gmra.mrb[18].mxu0 %v2037_v24  ;;  %v567_v51 = vmul.f32 %v4160_v33, %v399_v5  ;;  %v566_v16 = vmul.f32 %v4170_v37, %v399_v5  ;;  %v568_v52 = vmul.f32 %v4172_v38, %v399_v5 }
 0x121   : > { %v569_v25 = vmul.f32 %v4162_v34, %v399_v5  ;;  %v973_v58 = vmul.f32 %v5999_v36, %v6042_v56  ;;  %v974_v63 = vmul.f32 %v6015_v4, %v6042_v56  ;;  %v975_v42 = vmul.f32 %v6016_v48, %v6042_v56 }
 0x122   : > { %v695_v19 = vadd.f32 %v567_v51, %v6025_v26  ;;  %v1381_v51 = vmul.f32 %v5998_v46, %v4564_v44 }
 0x123   : > { %3496 = vset.pattern.permute.xlu1 %v6007_v27 }
 0x124   : > { %1671 = vperm.xlu1 %3496, %v3601_v23   ;;  %v1229_v6 = vpop.permute.xlu1 %1228 }
 0x125   : > { %v1377_v9 = vmul.f32 %v5998_v46, %v1229_v6  ;;  %v1379_v18 = vmul.f32 %v4225_v15, %v1229_v6  ;;  %v1376_v45 = vmul.f32 %v6006_v29, %v1229_v6  ;;  %v1378_v54 = vmul.f32 %v6009_v30, %v1229_v6 }
 0x127   : > { %v1505_v7 = vadd.f32 %v1377_v9, %v1098_v39  ;;  %v1507_v59 = vadd.f32 %v1379_v18, %v1100_v50  ;;  %v1504_v2 = vadd.f32 %v1376_v45, %v1097_v1  ;;  %v1506_v22 = vadd.f32 %v1378_v54, %v1099_v10  ;;  %v317_v1 = vld [vmem:[%s3745_s30 + $0xf8] sm:$0xff] }
 0x128   : > { %3497 = vset.pattern.permute.xlu1 %v6032_v47  ;;  %v976_v45 = vmul.f32 %v6018_v3, %v6042_v56  ;;  %v697_v54 = vadd.f32 %v569_v25, %v6026_v43  ;;  %v694_v39 = vadd.f32 %v566_v16, %v6028_v17  ;;  %v696_v50 = vadd.f32 %v568_v52, %v6029_v57 }
 0x129   : > { %448 = vperm.xlu1 %3497, %v4674_v21   ;;  %v1636_v23 = vpop.permute.xlu1 %1635  ;;  %v1380_v10 = vmul.f32 %v6006_v29, %v4564_v44  ;;  %498 = vperm.xlu0 %3528, %v317_v1  }
 0x12a   : > { %v1784_v28 = vmul.f32 %v6023_v62, %v1636_v23  ;;  %v1786_v49 = vmul.f32 %v6024_v14, %v1636_v23  ;;  %v1783_v11 = vmul.f32 %v4209_v60, %v1636_v23  ;;  %v1785_v0 = vmul.f32 %v4211_v61, %v1636_v23 }
 0x12b   : > { %v1382_v23 = vmul.f32 %v6009_v30, %v4564_v44 }
 0x12c   : > { %v1912_v31 = vadd.f32 %v1784_v28, %v1505_v7  ;;  %v1914_v24 = vadd.f32 %v1786_v49, %v1507_v59  ;;  %v1911_v20 = vadd.f32 %v1783_v11, %v1504_v2  ;;  %v1913_v8 = vadd.f32 %v1785_v0, %v1506_v22  ;;  %v6043_v11 = vld [vmem:[#allocation28_spill] sm:$0xff] }
 0x12d   : > { %3498 = vset.pattern.permute.xlu1 %v6027_v40  ;;  %v1102_v7 = vadd.f32 %v974_v63, %v695_v19  ;;  %v1383_v59 = vmul.f32 %v4225_v15, %v4564_v44  ;;  %v1104_v22 = vadd.f32 %v976_v45, %v697_v54  ;;  %v1101_v28 = vadd.f32 %v973_v58, %v694_v39 }
 0x12e   : > { %865 = vperm.xlu1 %3498, %v4674_v21   ;;  %v404_v5 = vpop.permute.xlu1 %403  ;;  %v2040_v35 = vmax.f32 %v1912_v31, 0.0  ;;  %v2042_v6 = vmax.f32 %v1914_v24, 0.0  ;;  %v2039_v9 = vmax.f32 %v1911_v20, 0.0  ;;  %v2041_v18 = vmax.f32 %v1913_v8, 0.0  ;;  %v4725_v24 = vld [vmem:[%s3745_s30 + $0xf0] sm:$0xff]  ;;  %3531 = vset.pattern.permute.xlu0 %v6007_v27 }
 0x12f   : > { %v1103_v49 = vadd.f32 %v975_v42, %v696_v50  ;;  %v4711_v0 = vmul.f32 %v4209_v60, %v6043_v11  ;;  %v4715_v16 = vmul.f32 %v6023_v62, %v6043_v11  ;;  %v4719_v52 = vmul.f32 %v6024_v14, %v6043_v11  ;;  %1715 = vperm.xlu0 %3531, %v4725_v24  }
 0x130   : > { %2312 = vmatprep.mubr.f32.mxu1 %v2040_v35  ;;  %2537 = vmatprep.mubr.f32.mxu0 %v2042_v6  ;;  %v570_v44 = vmul.f32 %v4170_v37, %v404_v5  ;;  %v573_v25 = vmul.f32 %v4162_v34, %v404_v5  ;;  %v1509_v31 = vadd.f32 %v1381_v51, %v1102_v7 }
 0x131   : > { %2313 = vmatmul.mubr.f32.gmra.mrb[20].mxu1 %v2039_v9  ;;  %2538 = vmatmul.mubr.f32.gmra.mrb[20].mxu0 %v2041_v18  ;;  %v1511_v20 = vadd.f32 %v1383_v59, %v1104_v22  ;;  %v1508_v8 = vadd.f32 %v1380_v10, %v1101_v28  ;;  %v1510_v56 = vadd.f32 %v1382_v23, %v1103_v49  ;;  %v409_v23 = vpop.permute.xlu0 %408  ;;  %v4746_v49 = vld [vmem:[%s3745_s30 + $0xb0] sm:$0xff] }
 0x132   : > { %3499 = vset.pattern.permute.xlu1 %v6007_v27  ;;  %v572_v58 = vmul.f32 %v4172_v38, %v404_v5  ;;  %v701_v39 = vadd.f32 %v573_v25, %v6026_v43  ;;  %v698_v50 = vadd.f32 %v570_v44, %v6028_v17 }
 0x133   : > { %1675 = vperm.xlu1 %3499, %v4649_v32   ;;  %v830_v2 = vpop.permute.xlu1 %829  ;;  %v571_v32 = vmul.f32 %v4160_v33, %v404_v5 }
 0x134   : > { %v977_v63 = vmul.f32 %v5999_v36, %v830_v2  ;;  %v978_v42 = vmul.f32 %v6015_v4, %v830_v2  ;;  %v980_v19 = vmul.f32 %v6018_v3, %v830_v2  ;;  %v979_v5 = vmul.f32 %v6016_v48, %v830_v2 }
 0x135   : > { %v699_v54 = vadd.f32 %v571_v32, %v6025_v26  ;;  %v700_v28 = vadd.f32 %v572_v58, %v6029_v57  ;;  %v1793_v58 = vmul.f32 %v4211_v61, %v6043_v11 }
 0x136   : > { %v1108_v59 = vadd.f32 %v980_v19, %v701_v39  ;;  %v1105_v22 = vadd.f32 %v977_v63, %v698_v50  ;;  %v4755_v19 = vpop.permute.xlu0 %423 }
 0x137   : > { %3500 = vset.pattern.permute.xlu1 %v5992_v41  ;;  %v1106_v7 = vadd.f32 %v978_v42, %v699_v54  ;;  %v1107_v42 = vadd.f32 %v979_v5, %v700_v28 }
 0x138   : > { %1272 = vperm.xlu1 %3500, %v4674_v21   ;;  %v1640_v35 = vpop.permute.xlu1 %1639 }
 0x139   : > { %v1788_v6 = vmul.f32 %v6023_v62, %v1640_v35  ;;  %v1790_v9 = vmul.f32 %v6024_v14, %v1640_v35  ;;  %v1787_v18 = vmul.f32 %v4209_v60, %v1640_v35  ;;  %v1789_v45 = vmul.f32 %v4211_v61, %v1640_v35 }
 0x13a   : > { %v4770_v28 = vpop.permute.xlu0 %438 }
 0x13b   : > { %v1916_v1 = vadd.f32 %v1788_v6, %v1509_v31  ;;  %v1918_v21 = vadd.f32 %v1790_v9, %v1511_v20  ;;  %v1915_v10 = vadd.f32 %v1787_v18, %v1508_v8  ;;  %v1917_v51 = vadd.f32 %v1789_v45, %v1510_v56  ;;  %v4759_v45 = vld [vmem:[%s3745_s30 + $0xb8] sm:$0xff] }
 0x13c   : > { %3501 = vset.pattern.permute.xlu1 %v6027_v40 }
 0x13d   : > { %869 = vperm.xlu1 %3501, %v4746_v49   ;;  %v1237_v2 = vpop.permute.xlu1 %1236  ;;  %v2044_v32 = vmax.f32 %v1916_v1, 0.0  ;;  %v2046_v25 = vmax.f32 %v1918_v21, 0.0  ;;  %v2043_v44 = vmax.f32 %v1915_v10, 0.0  ;;  %v2045_v31 = vmax.f32 %v1917_v51, 0.0  ;;  %v6044_v51 = vld [vmem:[#allocation27_spill] sm:$0xff] }
 0x13e   : > { %v1385_v20 = vmul.f32 %v5998_v46, %v1237_v2  ;;  %v1387_v8 = vmul.f32 %v4225_v15, %v1237_v2  ;;  %v1384_v56 = vmul.f32 %v6006_v29, %v1237_v2  ;;  %v1386_v63 = vmul.f32 %v6009_v30, %v1237_v2 }
 0x13f   : > { %2317 = vmatprep.mubr.f32.mxu1 %v2044_v32  ;;  %2542 = vmatprep.mubr.f32.mxu0 %v2046_v25  ;;  %v987_v32 = vmul.f32 %v6016_v48, %v6044_v51  ;;  %v988_v25 = vmul.f32 %v6018_v3, %v6044_v51 }
 0x140   : > { %2318 = vmatmul.mubr.f32.gmra.mrb[22].mxu1 %v2043_v44  ;;  %2543 = vmatmul.mubr.f32.gmra.mrb[22].mxu0 %v2045_v31  ;;  %v1513_v35 = vadd.f32 %v1385_v20, %v1106_v7  ;;  %v1515_v6 = vadd.f32 %v1387_v8, %v1108_v59  ;;  %v1512_v9 = vadd.f32 %v1384_v56, %v1105_v22 }
 0x141   : > { %3502 = vset.pattern.permute.xlu1 %v6032_v47  ;;  %v1514_v18 = vadd.f32 %v1386_v63, %v1107_v42  ;;  %v985_v7 = vmul.f32 %v5999_v36, %v6044_v51  ;;  %v986_v59 = vmul.f32 %v6015_v4, %v6044_v51  ;;  %v574_v22 = vmul.f32 %v4170_v37, %v409_v23 }
 0x142   : > { %458 = vperm.xlu1 %3502, %v4759_v45   ;;  %v834_v54 = vpop.permute.xlu1 %833  ;;  %v1920_v11 = vadd.f32 %v4715_v16, %v1513_v35  ;;  %v1922_v39 = vadd.f32 %v4719_v52, %v1515_v6  ;;  %v1919_v5 = vadd.f32 %v4711_v0, %v1512_v9  ;;  %v575_v16 = vmul.f32 %v4160_v33, %v409_v23 }
 0x143   : > { %v1921_v10 = vadd.f32 %v1793_v58, %v1514_v18  ;;  %v576_v52 = vmul.f32 %v4172_v38, %v409_v23  ;;  %v577_v0 = vmul.f32 %v4162_v34, %v409_v23  ;;  %v1392_v44 = vmul.f32 %v6006_v29, %v4575_v12 }
 0x144   : > { %v2048_v50 = vmax.f32 %v1920_v11, 0.0  ;;  %v2050_v1 = vmax.f32 %v1922_v39, 0.0  ;;  %v2047_v21 = vmax.f32 %v1919_v5, 0.0  ;;  %v1393_v31 = vmul.f32 %v5998_v46, %v4575_v12 }
 0x145   : > { %v2049_v2 = vmax.f32 %v1921_v10, 0.0  ;;  %v1394_v23 = vmul.f32 %v6009_v30, %v4575_v12  ;;  %v1395_v20 = vmul.f32 %v4225_v15, %v4575_v12  ;;  %v702_v35 = vadd.f32 %v574_v22, %v6028_v17  ;;  %v4798_v12 = vpop.permute.xlu0 %453 }
 0x146   : > { %3503 = vset.pattern.permute.xlu1 %v5992_v41  ;;  %2322 = vmatprep.mubr.f32.mxu1 %v2048_v50  ;;  %v703_v6 = vadd.f32 %v575_v16, %v6025_v26  ;;  %v704_v9 = vadd.f32 %v576_v52, %v6029_v57  ;;  %v705_v18 = vadd.f32 %v577_v0, %v6026_v43 }
 0x147   : > { %1276 = vperm.xlu1 %3503, %v4746_v49   ;;  %2547 = vmatprep.mubr.f32.mxu0 %v2050_v1  ;;  %v414_v8 = vpop.permute.xlu1 %413  ;;  %6045 = vst [vmem:[#allocation21_spill] sm:$0xff] %v4798_v12  ;;  %v981_v1 = vmul.f32 %v5999_v36, %v834_v54  ;;  %v983_v10 = vmul.f32 %v6016_v48, %v834_v54 }
 0x148   : > { %2323 = vmatmul.mubr.f32.gmra.mrb[24].mxu1 %v2047_v21  ;;  %2548 = vmatmul.mubr.f32.gmra.mrb[24].mxu0 %v2049_v2  ;;  %v578_v56 = vmul.f32 %v4170_v37, %v414_v8  ;;  %v579_v63 = vmul.f32 %v4160_v33, %v414_v8  ;;  %v580_v58 = vmul.f32 %v4172_v38, %v414_v8 }
 0x149   : > { %v581_v42 = vmul.f32 %v4162_v34, %v414_v8  ;;  %v982_v21 = vmul.f32 %v6015_v4, %v834_v54  ;;  %v984_v51 = vmul.f32 %v6018_v3, %v834_v54 }
 0x14a   : > { %v707_v11 = vadd.f32 %v579_v63, %v6025_v26  ;;  %v706_v5 = vadd.f32 %v578_v56, %v6028_v17  ;;  %v708_v50 = vadd.f32 %v580_v58, %v6029_v57 }
 0x14b   : > { %3504 = vset.pattern.permute.xlu1 %v6007_v27  ;;  %v709_v39 = vadd.f32 %v581_v42, %v6026_v43 }
 0x14c   : > { %1683 = vperm.xlu1 %3504, %v4746_v49   ;;  %v1241_v22 = vpop.permute.xlu1 %1240  ;;  %v1114_v16 = vadd.f32 %v986_v59, %v707_v11  ;;  %v1113_v0 = vadd.f32 %v985_v7, %v706_v5  ;;  %v1115_v2 = vadd.f32 %v987_v32, %v708_v50  ;;  %v1110_v7 = vadd.f32 %v982_v21, %v703_v6  ;;  %v3606_v11 = vld [vmem:[%s3745_s30 + $0xc0] sm:$0xff] }
 0x14d   : > { %v1116_v52 = vadd.f32 %v988_v25, %v709_v39  ;;  %v1388_v8 = vmul.f32 %v6006_v29, %v1241_v22  ;;  %v1389_v56 = vmul.f32 %v5998_v46, %v1241_v22  ;;  %v1390_v63 = vmul.f32 %v6009_v30, %v1241_v22  ;;  %v4823_v39 = vpop.permute.xlu0 %468 }
 0x14e   : > { %v1391_v58 = vmul.f32 %v4225_v15, %v1241_v22  ;;  %v4813_v42 = vadd.f32 %v1393_v31, %v1114_v16  ;;  %v4817_v54 = vadd.f32 %v1392_v44, %v1113_v0  ;;  %v4819_v49 = vadd.f32 %v1394_v23, %v1115_v2  ;;  %6046 = vst [vmem:[#allocation22_spill] sm:$0xff] %v4823_v39 }
 0x14f   : > { %v4815_v53 = vadd.f32 %v1395_v20, %v1116_v52  ;;  %v1112_v59 = vadd.f32 %v984_v51, %v705_v18  ;;  %v1109_v32 = vadd.f32 %v981_v1, %v702_v35  ;;  %v1111_v25 = vadd.f32 %v983_v10, %v704_v9 }
 0x150   : > { %3505 = vset.pattern.permute.xlu1 %v6032_v47  ;;  %v1517_v50 = vadd.f32 %v1389_v56, %v1110_v7 }
 0x151   : > { %463 = vperm.xlu1 %3505, %v3606_v11   ;;  %v1648_v5 = vpop.permute.xlu1 %1647  ;;  %v1519_v31 = vadd.f32 %v1391_v58, %v1112_v59  ;;  %v1516_v22 = vadd.f32 %v1388_v8, %v1109_v32  ;;  %v1518_v20 = vadd.f32 %v1390_v63, %v1111_v25  ;;  %v4830_v0 = vpop.permute.xlu0 %483 }
 0x152   : > { %v1795_v44 = vmul.f32 %v4209_v60, %v1648_v5  ;;  %v1796_v23 = vmul.f32 %v6023_v62, %v1648_v5  ;;  %v1797_v16 = vmul.f32 %v4211_v61, %v1648_v5  ;;  %v1798_v6 = vmul.f32 %v6024_v14, %v1648_v5  ;;  %6047 = vst [vmem:[#allocation10_spill] sm:$0xff] %v4830_v0 }
 0x154   : > { %v1924_v35 = vadd.f32 %v1796_v23, %v1517_v50  ;;  %v1926_v9 = vadd.f32 %v1798_v6, %v1519_v31  ;;  %v1923_v18 = vadd.f32 %v1795_v44, %v1516_v22  ;;  %v1925_v1 = vadd.f32 %v1797_v16, %v1518_v20 }
 0x155   : > { %3507 = vset.pattern.permute.xlu1 %v6027_v40  ;;  %v1656_v56 = vpop.permute.xlu0 %1655 }
 0x156   : > { %877 = vperm.xlu1 %3507, %v3606_v11   ;;  %v419_v21 = vpop.permute.xlu1 %418  ;;  %v2052_v10 = vmax.f32 %v1924_v35, 0.0  ;;  %v2054_v51 = vmax.f32 %v1926_v9, 0.0  ;;  %v2051_v52 = vmax.f32 %v1923_v18, 0.0  ;;  %v2053_v2 = vmax.f32 %v1925_v1, 0.0 }
 0x157   : > { %v582_v63 = vmul.f32 %v4170_v37, %v419_v21  ;;  %v583_v58 = vmul.f32 %v4160_v33, %v419_v21  ;;  %v585_v7 = vmul.f32 %v4162_v34, %v419_v21  ;;  %v1803_v59 = vmul.f32 %v4209_v60, %v1656_v56 }
 0x158   : > { %2327 = vmatprep.mubr.f32.mxu1 %v2052_v10  ;;  %2552 = vmatprep.mubr.f32.mxu0 %v2054_v51  ;;  %v1804_v32 = vmul.f32 %v6023_v62, %v1656_v56  ;;  %v1806_v25 = vmul.f32 %v6024_v14, %v1656_v56 }
 0x159   : > { %2328 = vmatmul.mubr.f32.gmra.mrb[26].mxu1 %v2051_v52  ;;  %2553 = vmatmul.mubr.f32.gmra.mrb[26].mxu0 %v2053_v2  ;;  %v710_v16 = vadd.f32 %v582_v63, %v6028_v17  ;;  %v711_v6 = vadd.f32 %v583_v58, %v6025_v26  ;;  %v713_v35 = vadd.f32 %v585_v7, %v6026_v43  ;;  %v4860_v58 = vld [vmem:[%s3745_s30 + $0xc8] sm:$0xff] }
 0x15a   : > { %3508 = vset.pattern.permute.xlu1 %v6007_v27 }
 0x15b   : > { %1687 = vperm.xlu1 %3508, %v4759_v45   ;;  %v842_v8 = vpop.permute.xlu1 %841  ;;  %v584_v45 = vmul.f32 %v4172_v38, %v419_v21 }
 0x15c   : > { %v989_v5 = vmul.f32 %v5999_v36, %v842_v8  ;;  %v990_v50 = vmul.f32 %v6015_v4, %v842_v8  ;;  %v992_v31 = vmul.f32 %v6018_v3, %v842_v8  ;;  %v991_v9 = vmul.f32 %v6016_v48, %v842_v8 }
 0x15d   : > { %v712_v51 = vadd.f32 %v584_v45, %v6029_v57 }
 0x15e   : > { %v1117_v52 = vadd.f32 %v989_v5, %v710_v16  ;;  %v1118_v2 = vadd.f32 %v990_v50, %v711_v6  ;;  %v1120_v63 = vadd.f32 %v992_v31, %v713_v35  ;;  %v1805_v50 = vmul.f32 %v4211_v61, %v1656_v56 }
 0x15f   : > { %3509 = vset.pattern.permute.xlu1 %v5992_v41  ;;  %v1119_v5 = vadd.f32 %v991_v9, %v712_v51 }
 0x160   : > { %1284 = vperm.xlu1 %3509, %v3606_v11   ;;  %v1652_v22 = vpop.permute.xlu1 %1651 }
 0x161   : > { %v1799_v20 = vmul.f32 %v4209_v60, %v1652_v22  ;;  %v1800_v44 = vmul.f32 %v6023_v62, %v1652_v22  ;;  %v1801_v11 = vmul.f32 %v4211_v61, %v1652_v22  ;;  %v1802_v23 = vmul.f32 %v6024_v14, %v1652_v22 }
 0x163   : > { %v1928_v18 = vadd.f32 %v1800_v44, %v4813_v42  ;;  %v1930_v1 = vadd.f32 %v1802_v23, %v4815_v53  ;;  %v1927_v21 = vadd.f32 %v1799_v20, %v4817_v54  ;;  %v1929_v10 = vadd.f32 %v1801_v11, %v4819_v49  ;;  %v4870_v23 = vld [vmem:[%s3745_s30 + $0xd0] sm:$0xff] }
 0x164   : > { %3510 = vset.pattern.permute.xlu1 %v6027_v40 }
 0x165   : > { %881 = vperm.xlu1 %3510, %v4860_v58   ;;  %v1249_v8 = vpop.permute.xlu1 %1248  ;;  %v2056_v7 = vmax.f32 %v1928_v18, 0.0  ;;  %v2058_v22 = vmax.f32 %v1930_v1, 0.0  ;;  %v2055_v42 = vmax.f32 %v1927_v21, 0.0  ;;  %v2057_v44 = vmax.f32 %v1929_v10, 0.0  ;;  %v6048_v21 = vld [vmem:[#allocation29_spill] sm:$0xff] }
 0x166   : > { %v1396_v53 = vmul.f32 %v6006_v29, %v1249_v8  ;;  %v1397_v54 = vmul.f32 %v5998_v46, %v1249_v8  ;;  %v1398_v49 = vmul.f32 %v6009_v30, %v1249_v8  ;;  %v1399_v45 = vmul.f32 %v4225_v15, %v1249_v8 }
 0x167   : > { %2332 = vmatprep.mubr.f32.mxu1 %v2056_v7  ;;  %2557 = vmatprep.mubr.f32.mxu0 %v2058_v22  ;;  %v997_v56 = vmul.f32 %v5999_v36, %v6048_v21  ;;  %v998_v10 = vmul.f32 %v6015_v4, %v6048_v21  ;;  %v586_v8 = vmul.f32 %v4170_v37, %v4755_v19 }
 0x168   : > { %2333 = vmatmul.mubr.f32.gmra.mrb[28].mxu1 %v2055_v42  ;;  %v1525_v31 = vadd.f32 %v1397_v54, %v1118_v2  ;;  %v1527_v20 = vadd.f32 %v1399_v45, %v1120_v63  ;;  %v1524_v11 = vadd.f32 %v1396_v53, %v1117_v52  ;;  %2558 = vmatmul.mubr.f32.gmra.mrb[28].mxu0 %v2057_v44 }
 0x169   : > { %3511 = vset.pattern.permute.xlu1 %v6032_v47  ;;  %v1526_v16 = vadd.f32 %v1398_v49, %v1119_v5  ;;  %v999_v7 = vmul.f32 %v6016_v48, %v6048_v21  ;;  %v1000_v22 = vmul.f32 %v6018_v3, %v6048_v21  ;;  %v1404_v42 = vmul.f32 %v6006_v29, %v4597_v55 }
 0x16a   : > { %473 = vperm.xlu1 %3511, %v4870_v23   ;;  %v1932_v6 = vadd.f32 %v1804_v32, %v1525_v31  ;;  %v1934_v35 = vadd.f32 %v1806_v25, %v1527_v20  ;;  %v1931_v18 = vadd.f32 %v1803_v59, %v1524_v11  ;;  %v587_v59 = vmul.f32 %v4160_v33, %v4755_v19 }
 0x16b   : > { %v846_v9 = vpop.permute.xlu1 %845  ;;  %v1933_v1 = vadd.f32 %v1805_v50, %v1526_v16  ;;  %v588_v32 = vmul.f32 %v4172_v38, %v4755_v19  ;;  %v589_v25 = vmul.f32 %v4162_v34, %v4755_v19  ;;  %v1405_v44 = vmul.f32 %v5998_v46, %v4597_v55 }
 0x16c   : > { %v2060_v51 = vmax.f32 %v1932_v6, 0.0  ;;  %v2062_v52 = vmax.f32 %v1934_v35, 0.0  ;;  %v2059_v2 = vmax.f32 %v1931_v18, 0.0  ;;  %v1406_v53 = vmul.f32 %v6009_v30, %v4597_v55 }
 0x16d   : > { %v2061_v63 = vmax.f32 %v1933_v1, 0.0  ;;  %v1407_v19 = vmul.f32 %v4225_v15, %v4597_v55  ;;  %v714_v31 = vadd.f32 %v586_v8, %v6028_v17  ;;  %v715_v20 = vadd.f32 %v587_v59, %v6025_v26 }
 0x16e   : > { %3512 = vset.pattern.permute.xlu1 %v5992_v41  ;;  %2337 = vmatprep.mubr.f32.mxu1 %v2060_v51  ;;  %v716_v11 = vadd.f32 %v588_v32, %v6029_v57  ;;  %v717_v16 = vadd.f32 %v589_v25, %v6026_v43  ;;  %v993_v1 = vmul.f32 %v5999_v36, %v846_v9 }
 0x16f   : > { %1288 = vperm.xlu1 %3512, %v4860_v58   ;;  %2562 = vmatprep.mubr.f32.mxu0 %v2062_v52  ;;  %v994_v21 = vmul.f32 %v6015_v4, %v846_v9  ;;  %v995_v51 = vmul.f32 %v6016_v48, %v846_v9  ;;  %v996_v52 = vmul.f32 %v6018_v3, %v846_v9 }
 0x170   : > { %v429_v54 = vpop.permute.xlu1 %428  ;;  %2338 = vmatmul.mubr.f32.gmra.mrb[30].mxu1 %v2059_v2  ;;  %2563 = vmatmul.mubr.f32.gmra.mrb[30].mxu0 %v2061_v63  ;;  %v1121_v0 = vadd.f32 %v993_v1, %v714_v31 }
 0x171   : > { %v590_v49 = vmul.f32 %v4170_v37, %v429_v54  ;;  %v591_v45 = vmul.f32 %v4160_v33, %v429_v54  ;;  %v592_v5 = vmul.f32 %v4172_v38, %v429_v54  ;;  %v593_v50 = vmul.f32 %v4162_v34, %v429_v54 }
 0x173   : > { %3513 = vset.pattern.permute.xlu1 %v6007_v27  ;;  %v718_v55 = vadd.f32 %v590_v49, %v6028_v17  ;;  %v719_v6 = vadd.f32 %v591_v45, %v6025_v26  ;;  %v720_v35 = vadd.f32 %v592_v5, %v6029_v57  ;;  %v721_v18 = vadd.f32 %v593_v50, %v6026_v43 }
 0x174   : > { %1695 = vperm.xlu1 %3513, %v4860_v58  }
 0x175   : > { %v1253_v2 = vpop.permute.xlu1 %1252  ;;  %v1126_v63 = vadd.f32 %v998_v10, %v719_v6  ;;  %v1128_v8 = vadd.f32 %v1000_v22, %v721_v18  ;;  %v1125_v59 = vadd.f32 %v997_v56, %v718_v55  ;;  %v1127_v32 = vadd.f32 %v999_v7, %v720_v35  ;;  %v3609_v56 = vld [vmem:[%s3745_s30 + $0xd8] sm:$0xff] }
 0x176   : > { %v1400_v25 = vmul.f32 %v6006_v29, %v1253_v2  ;;  %v1401_v54 = vmul.f32 %v5998_v46, %v1253_v2  ;;  %v1402_v58 = vmul.f32 %v6009_v30, %v1253_v2  ;;  %v1403_v49 = vmul.f32 %v4225_v15, %v1253_v2 }
 0x177   : > { %v1533_v45 = vadd.f32 %v1405_v44, %v1126_v63  ;;  %v1535_v5 = vadd.f32 %v1407_v19, %v1128_v8  ;;  %v1532_v50 = vadd.f32 %v1404_v42, %v1125_v59  ;;  %v1534_v9 = vadd.f32 %v1406_v53, %v1127_v32 }
 0x178   : > { %3514 = vset.pattern.permute.xlu1 %v6032_v47  ;;  %v1122_v10 = vadd.f32 %v994_v21, %v715_v20  ;;  %v1123_v22 = vadd.f32 %v995_v51, %v716_v11  ;;  %v1124_v6 = vadd.f32 %v996_v52, %v717_v16  ;;  %v1528_v18 = vadd.f32 %v1400_v25, %v1121_v0  ;;  %v1668_v52 = vpop.permute.xlu0 %1667 }
 0x179   : > { %478 = vperm.xlu1 %3514, %v3609_v56   ;;  %v1815_v8 = vmul.f32 %v4209_v60, %v1668_v52  ;;  %v1816_v59 = vmul.f32 %v6023_v62, %v1668_v52  ;;  %v1818_v32 = vmul.f32 %v6024_v14, %v1668_v52 }
 0x17a   : > { %v1660_v7 = vpop.permute.xlu1 %1659  ;;  %v1529_v55 = vadd.f32 %v1401_v54, %v1122_v10  ;;  %v1531_v35 = vadd.f32 %v1403_v49, %v1124_v6  ;;  %v1530_v39 = vadd.f32 %v1402_v58, %v1123_v22 }
 0x17b   : > { %v1807_v12 = vmul.f32 %v4209_v60, %v1660_v7  ;;  %v1808_v2 = vmul.f32 %v6023_v62, %v1660_v7  ;;  %v1809_v44 = vmul.f32 %v4211_v61, %v1660_v7  ;;  %v1810_v42 = vmul.f32 %v6024_v14, %v1660_v7 }
 0x17d   : > { %3515 = vset.pattern.permute.xlu1 %v6027_v40  ;;  %v1936_v53 = vadd.f32 %v1808_v2, %v1529_v55  ;;  %v1938_v19 = vadd.f32 %v1810_v42, %v1531_v35  ;;  %v1935_v31 = vadd.f32 %v1807_v12, %v1528_v18  ;;  %v1937_v20 = vadd.f32 %v1809_v44, %v1530_v39 }
 0x17e   : > { %889 = vperm.xlu1 %3515, %v3609_v56  }
 0x17f   : > { %v434_v11 = vpop.permute.xlu1 %433  ;;  %v2064_v16 = vmax.f32 %v1936_v53, 0.0  ;;  %v2066_v1 = vmax.f32 %v1938_v19, 0.0  ;;  %v2063_v0 = vmax.f32 %v1935_v31, 0.0  ;;  %v2065_v21 = vmax.f32 %v1937_v20, 0.0 }
 0x180   : > { %v594_v63 = vmul.f32 %v4170_v37, %v434_v11  ;;  %v595_v12 = vmul.f32 %v4160_v33, %v434_v11  ;;  %v597_v39 = vmul.f32 %v4162_v34, %v434_v11 }
 0x181   : > { %2342 = vmatprep.mubr.f32.mxu1 %v2064_v16  ;;  %2567 = vmatprep.mubr.f32.mxu0 %v2066_v1  ;;  %v4952_v16 = vld [vmem:[%s3745_s30 + $0xe0] sm:$0xff] }
 0x182   : > { %3516 = vset.pattern.permute.xlu1 %v6007_v27  ;;  %2343 = vmatmul.mubr.f32.gmra.mrb[32].mxu1 %v2063_v0  ;;  %v722_v7 = vadd.f32 %v594_v63, %v6028_v17  ;;  %v723_v55 = vadd.f32 %v595_v12, %v6025_v26  ;;  %v725_v35 = vadd.f32 %v597_v39, %v6026_v43  ;;  %v6049_v12 = vld [vmem:[#allocation37_spill] sm:$0xff] }
 0x183   : > { %1699 = vperm.xlu1 %3516, %v4870_v23   ;;  %2568 = vmatmul.mubr.f32.gmra.mrb[32].mxu0 %v2065_v21  ;;  %v596_v23 = vmul.f32 %v4172_v38, %v434_v11  ;;  %v4962_v39 = vmul.f32 %v5999_v36, %v6049_v12 }
 0x184   : > { %v854_v51 = vpop.permute.xlu1 %853 }
 0x185   : > { %v1001_v25 = vmul.f32 %v5999_v36, %v854_v51  ;;  %v1002_v54 = vmul.f32 %v6015_v4, %v854_v51  ;;  %v1004_v58 = vmul.f32 %v6018_v3, %v854_v51  ;;  %v1003_v18 = vmul.f32 %v6016_v48, %v854_v51 }
 0x186   : > { %v724_v19 = vadd.f32 %v596_v23, %v6029_v57 }
 0x187   : > { %3518 = vset.pattern.permute.xlu1 %v5992_v41  ;;  %v1129_v31 = vadd.f32 %v1001_v25, %v722_v7  ;;  %v1130_v20 = vadd.f32 %v1002_v54, %v723_v55  ;;  %v1132_v11 = vadd.f32 %v1004_v58, %v725_v35  ;;  %v1817_v25 = vmul.f32 %v4211_v61, %v1668_v52 }
 0x188   : > { %1296 = vperm.xlu1 %3518, %v3609_v56   ;;  %v1131_v23 = vadd.f32 %v1003_v18, %v724_v19  ;;  %v598_v7 = vmul.f32 %v4170_v37, %v4770_v28  ;;  %v6050_v19 = vld [vmem:[#allocation13_spill] sm:$0xff] }
 0x18a   : > { %v1664_v49 = vpop.permute.xlu1 %1663 }
 0x18b   : > { %v1811_v10 = vmul.f32 %v4209_v60, %v1664_v49  ;;  %v1812_v22 = vmul.f32 %v6023_v62, %v1664_v49  ;;  %v1813_v6 = vmul.f32 %v4211_v61, %v1664_v49  ;;  %v1814_v56 = vmul.f32 %v6024_v14, %v1664_v49 }
 0x18c   : > { %3519 = vset.pattern.permute.xlu1 %v6027_v40 }
 0x18d   : > { %v1940_v2 = vadd.f32 %v1812_v22, %v1533_v45  ;;  %v1942_v44 = vadd.f32 %v1814_v56, %v1535_v5  ;;  %v1939_v42 = vadd.f32 %v1811_v10, %v1532_v50  ;;  %v1941_v53 = vadd.f32 %v1813_v6, %v1534_v9  ;;  %893 = vperm.xlu1 %3519, %v4952_v16   ;;  %v4977_v56 = vld [vmem:[%s3745_s30 + $0xe8] sm:$0xff] }
 0x18e   : > { %v4966_v10 = vstv %s3243_s16  ;;  %v4970_v22 = vmul.f32 %v6015_v4, %v6049_v12  ;;  %v4974_v6 = vmul.f32 %v6016_v48, %v6049_v12 }
 0x18f   : > { %v1261_v1 = vpop.permute.xlu1 %1260  ;;  %v2068_v0 = vmax.f32 %v1940_v2, 0.0  ;;  %v2070_v21 = vmax.f32 %v1942_v44, 0.0  ;;  %v2067_v51 = vmax.f32 %v1939_v42, 0.0  ;;  %v2069_v63 = vmax.f32 %v1941_v53, 0.0 }
 0x190   : > { %v1408_v45 = vmul.f32 %v6006_v29, %v1261_v1  ;;  %v1409_v5 = vmul.f32 %v5998_v46, %v1261_v1  ;;  %v1410_v50 = vmul.f32 %v6009_v30, %v1261_v1  ;;  %v1411_v9 = vmul.f32 %v4225_v15, %v1261_v1 }
 0x191   : > { %2347 = vmatprep.mubr.f32.mxu1 %v2068_v0  ;;  %2572 = vmatprep.mubr.f32.mxu0 %v2070_v21  ;;  %v599_v44 = vmul.f32 %v4160_v33, %v4770_v28  ;;  %v600_v42 = vmul.f32 %v4172_v38, %v4770_v28  ;;  %v601_v53 = vmul.f32 %v4162_v34, %v4770_v28  ;;  %v2651_v28 = vadd.s32 8, %v6050_v19 }
 0x192   : > { %3521 = vset.pattern.permute.xlu1 %v6032_v47  ;;  %2348 = vmatmul.mubr.f32.gmra.mrb[34].mxu1 %v2067_v51  ;;  %v1537_v54 = vadd.f32 %v1409_v5, %v1130_v20  ;;  %v1539_v58 = vadd.f32 %v1411_v9, %v1132_v11  ;;  %v1536_v49 = vadd.f32 %v1408_v45, %v1129_v31  ;;  %v5011_v5 = vld [vmem:[%s5873_s4] ss:$0 sm:$0xff] }
 0x193   : > { %488 = vperm.xlu1 %3521, %v4977_v56   ;;  %2573 = vmatmul.mubr.f32.gmra.mrb[34].mxu0 %v2069_v63  ;;  %v1538_v52 = vadd.f32 %v1410_v50, %v1131_v23  ;;  %v2683_v31 = vadd.s32 %v4966_v10, %v6050_v19  ;;  %v5002_v21 = vmul.f32 %v6009_v30, %v4620_v13 }
 0x194   : > { %v858_v55 = vpop.permute.xlu1 %857  ;;  %v1944_v35 = vadd.f32 %v1816_v59, %v1537_v54  ;;  %v1946_v18 = vadd.f32 %v1818_v32, %v1539_v58  ;;  %v1943_v2 = vadd.f32 %v1815_v8, %v1536_v49  ;;  %v1012_v59 = vmul.f32 %v6018_v3, %v6049_v12 }
 0x195   : > { %v1945_v0 = vadd.f32 %v1817_v25, %v1538_v52  ;;  %v4994_v8 = vmul.f32 %v6006_v29, %v4620_v13  ;;  %v1417_v32 = vmul.f32 %v5998_v46, %v4620_v13  ;;  %v1419_v51 = vmul.f32 %v4225_v15, %v4620_v13 }
 0x196   : > { %v2072_v20 = vmax.f32 %v1944_v35, 0.0  ;;  %v2074_v11 = vmax.f32 %v1946_v18, 0.0  ;;  %v2071_v1 = vmax.f32 %v1943_v2, 0.0  ;;  %v726_v63 = vadd.f32 %v598_v7, %v6028_v17 }
 0x197   : > { %3522 = vset.pattern.permute.xlu1 %v5992_v41  ;;  %v2073_v45 = vmax.f32 %v1945_v0, 0.0  ;;  %v727_v50 = vadd.f32 %v599_v44, %v6025_v26  ;;  %v728_v9 = vadd.f32 %v600_v42, %v6029_v57  ;;  %v729_v12 = vadd.f32 %v601_v53, %v6026_v43 }
 0x198   : > { %1300 = vperm.xlu1 %3522, %v4952_v16   ;;  %2352 = vmatprep.mubr.f32.mxu1 %v2072_v20  ;;  %vm2715_vm1 = vcmp.lt.s32.totalorder %v2683_v31, 1000  ;;  %v1005_v7 = vmul.f32 %v5999_v36, %v858_v55  ;;  %v2684_v44 = vadd.s32 %v4966_v10, %v2651_v28  ;;  %v1007_v0 = vmul.f32 %v6016_v48, %v858_v55 }
 0x199   : > { %2577 = vmatprep.mubr.f32.mxu0 %v2074_v11  ;;  %v444_v23 = vpop.permute.xlu1 %443  ;;  %2353 = vmatmul.mubr.f32.gmra.mrb[36].mxu1 %v2071_v1  ;;  %v2264_v49 = vpop.f32.mrb[0].mxu1  ;;  %v1006_v1 = vmul.f32 %v6015_v4, %v858_v55 }
 0x19a   : > { %v602_v13 = vmul.f32 %v4170_v37, %v444_v23  ;;  %v603_v25 = vmul.f32 %v4160_v33, %v444_v23  ;;  %v604_v54 = vmul.f32 %v4172_v38, %v444_v23  ;;  %v605_v58 = vmul.f32 %v4162_v34, %v444_v23  ;;  %2578 = vmatmul.mubr.f32.gmra.mrb[36].mxu0 %v2073_v45  ;;  %v2489_v52 = vpop.f32.mrb[0].mxu0  ;;  %v2266_v18 = vpop.f32.mrb[1].mxu1 }
 0x19b   : > { %v2265_v35 = vadd.f32 %v5011_v5, %v2264_v49  ;;  %v2491_v2 = vpop.f32.mrb[1].mxu0  ;;  %v1008_v45 = vmul.f32 %v6018_v3, %v858_v55  ;;  %vm2716_vm3 = vcmp.lt.s32.totalorder %v2684_v44, 1000  ;;  %v1134_v31 = vadd.f32 %v1006_v1, %v727_v50 }
 0x19c   : > { %v730_v42 = vadd.f32 %v602_v13, %v6028_v17  ;;  %v731_v53 = vadd.f32 %v603_v25, %v6025_v26  ;;  %v732_v20 = vadd.f32 %v604_v54, %v6029_v57  ;;  %v733_v11 = vadd.f32 %v605_v58, %v6026_v43  ;;  %3524 = vset.pattern.permute.xlu1 %v6007_v27 }
 0x19d   : > { %v2490_v23 = vadd.f32 %v2489_v52, %v2265_v35  ;;  %1707 = vperm.xlu1 %3524, %v4952_v16   ;;  %v2269_v13 = vpop.f32.mrb[2].mxu1  ;;  %v2494_v35 = vpop.f32.mrb[2].mxu0  ;;  %v1133_v57 = vadd.f32 %v1005_v7, %v726_v63 }
 0x19e   : > { %v1265_v28 = vpop.permute.xlu1 %1264  ;;  %v1138_v25 = vadd.f32 %v4970_v22, %v731_v53  ;;  %v1140_v49 = vadd.f32 %v1012_v59, %v733_v11  ;;  %v1137_v54 = vadd.f32 %v4962_v39, %v730_v42  ;;  %v1139_v58 = vadd.f32 %v4974_v6, %v732_v20  ;;  %v2271_v16 = vpop.f32.mrb[3].mxu1 }
 0x19f   : > { %v5036_v18 = vsel %vm2715_vm1, %v2490_v23, -inf  ;;  %v1412_v2 = vmul.f32 %v6006_v29, %v1265_v28  ;;  %v1413_v55 = vmul.f32 %v5998_v46, %v1265_v28  ;;  %v1414_v52 = vmul.f32 %v6009_v30, %v1265_v28  ;;  %v2496_v39 = vpop.f32.mrb[3].mxu0 }
 0x1a0   : > { %6051 = vst [vmem:[#allocation23_spill] sm:$0xff] %v5036_v18  ;;  %2844 = vst.msk [vmem:[%s3750_s10] sm:$0xff] %vm2843_vm2, %v5036_v18  ;;  %v2270_v22 = vadd.f32 %v5011_v5, %v2269_v13  ;;  %v5045_v6 = vadd.f32 %v1417_v32, %v1138_v25  ;;  %v1135_v59 = vadd.f32 %v1007_v0, %v728_v9 }
 0x1a1   : > { %v1415_v42 = vmul.f32 %v4225_v15, %v1265_v28  ;;  %3525 = vset.pattern.permute.xlu1 %v6032_v47  ;;  %v1547_v53 = vadd.f32 %v1419_v51, %v1140_v49  ;;  %v1544_v63 = vadd.f32 %v4994_v8, %v1137_v54  ;;  %v1546_v7 = vadd.f32 %v5002_v21, %v1139_v58 }
 0x1a2   : > { %v2495_v20 = vadd.f32 %v2494_v35, %v2270_v22  ;;  %493 = vperm.xlu1 %3525, %v4725_v24   ;;  %v1136_v11 = vadd.f32 %v1008_v45, %v729_v12  ;;  %v1541_v13 = vadd.f32 %v1413_v55, %v1134_v31  ;;  %v1540_v32 = vadd.f32 %v1412_v2, %v1133_v57  ;;  %v5066_v2 = vpop.permute.xlu0 %1679  ;;  %v6053_v35 = vld [vmem:[#allocation21_spill] sm:$0xff] }
 0x1a3   : > { %v1672_v23 = vpop.permute.xlu1 %1671  ;;  %v1542_v25 = vadd.f32 %v1414_v52, %v1135_v59  ;;  %v2652_v55 = vadd.s32 16, %v6050_v19  ;;  %v5073_v16 = vmul.f32 %v4170_v37, %v6053_v35  ;;  %v5077_v22 = vmul.f32 %v4160_v33, %v6053_v35 }
 0x1a4   : > { %v5053_v50 = vsel %vm2716_vm3, %v2495_v20, -inf  ;;  %v1819_v9 = vmul.f32 %v4209_v60, %v1672_v23  ;;  %v1820_v47 = vmul.f32 %v6023_v62, %v1672_v23  ;;  %v1821_v51 = vmul.f32 %v4211_v61, %v1672_v23 }
 0x1a5   : > { %6052 = vst [vmem:[#allocation30_spill] sm:$0xff] %v5053_v50  ;;  %2845 = vst.msk [vmem:[%s3750_s10 + $0x8] sm:$0xff] %vm2843_vm2, %v5053_v50  ;;  %v1822_v8 = vmul.f32 %v6024_v14, %v1672_v23  ;;  %v1543_v21 = vadd.f32 %v1415_v42, %v1136_v11  ;;  %v1830_v39 = vmul.f32 %v6024_v14, %v5066_v2  ;;  %v2653_v11 = vadd.s32 24, %v6050_v19 }
 0x1a6   : > { %3526 = vset.pattern.permute.xlu1 %v6027_v40  ;;  %v1948_v12 = vadd.f32 %v1820_v47, %v1541_v13  ;;  %v1947_v57 = vadd.f32 %v1819_v9, %v1540_v32  ;;  %v1949_v1 = vadd.f32 %v1821_v51, %v1542_v25  ;;  %v5087_v20 = vadd.s32 %v4966_v10, %v2652_v55  ;;  %v5094_v25 = vpop.permute.xlu0 %1691 }
 0x1a7   : > { %901 = vperm.xlu1 %3526, %v4725_v24   ;;  %v1950_v44 = vadd.f32 %v1822_v8, %v1543_v21 }
 0x1a8   : > { %v449_v0 = vpop.permute.xlu1 %448  ;;  %v2076_v45 = vmax.f32 %v1948_v12, 0.0  ;;  %v2075_v28 = vmax.f32 %v1947_v57, 0.0  ;;  %v2077_v49 = vmax.f32 %v1949_v1, 0.0  ;;  %vm2717_vm4 = vcmp.lt.s32.totalorder %v5087_v20, 1000 }
 0x1a9   : > { %v2078_v54 = vmax.f32 %v1950_v44, 0.0  ;;  %v606_v52 = vmul.f32 %v4170_v37, %v449_v0  ;;  %v607_v31 = vmul.f32 %v4160_v33, %v449_v0  ;;  %v609_v59 = vmul.f32 %v4162_v34, %v449_v0 }
 0x1aa   : > { %2357 = vmatprep.mubr.f32.mxu1 %v2076_v45  ;;  %v608_v9 = vmul.f32 %v4172_v38, %v449_v0  ;;  %v2654_v20 = vadd.s32 32, %v6050_v19 }
 0x1ab   : > { %3527 = vset.pattern.permute.xlu1 %v6007_v27  ;;  %2582 = vmatprep.mubr.f32.mxu0 %v2078_v54  ;;  %v734_v47 = vadd.f32 %v606_v52, %v6028_v17  ;;  %v735_v44 = vadd.f32 %v607_v31, %v6025_v26  ;;  %v737_v45 = vadd.f32 %v609_v59, %v6026_v43 }
 0x1ac   : > { %1711 = vperm.xlu1 %3527, %v4977_v56   ;;  %2358 = vmatmul.mubr.f32.gmra.mrb[38].mxu1 %v2075_v28  ;;  %v1828_v56 = vmul.f32 %v6023_v62, %v5066_v2 }
 0x1ad   : > { %2583 = vmatmul.mubr.f32.gmra.mrb[38].mxu0 %v2077_v49  ;;  %v866_v58 = vpop.permute.xlu1 %865  ;;  %v3612_v49 = vld [vmem:[%s3745_s30 + $0xf8] sm:$0xff] }
 0x1ae   : > { %v1014_v51 = vmul.f32 %v6015_v4, %v866_v58  ;;  %v1016_v8 = vmul.f32 %v6018_v3, %v866_v58  ;;  %v1013_v28 = vmul.f32 %v5999_v36, %v866_v58  ;;  %v1015_v0 = vmul.f32 %v6016_v48, %v866_v58 }
 0x1b0   : > { %3529 = vset.pattern.permute.xlu1 %v5992_v41  ;;  %v1142_v18 = vadd.f32 %v1014_v51, %v735_v44  ;;  %v1827_v44 = vmul.f32 %v4209_v60, %v5066_v2 }
 0x1b1   : > { %1308 = vperm.xlu1 %3529, %v4725_v24  }
 0x1b2   : > { %v1676_v42 = vpop.permute.xlu1 %1675 }
 0x1b3   : > { %v1823_v23 = vmul.f32 %v4209_v60, %v1676_v42  ;;  %v1824_v24 = vmul.f32 %v6023_v62, %v1676_v42  ;;  %v1825_v13 = vmul.f32 %v4211_v61, %v1676_v42  ;;  %v1826_v32 = vmul.f32 %v6024_v14, %v1676_v42 }
 0x1b5   : > { %3530 = vset.pattern.permute.xlu1 %v6027_v40  ;;  %v1952_v21 = vadd.f32 %v1824_v24, %v5045_v6  ;;  %v1954_v12 = vadd.f32 %v1826_v32, %v1547_v53  ;;  %v1951_v57 = vadd.f32 %v1823_v23, %v1544_v63  ;;  %v1953_v1 = vadd.f32 %v1825_v13, %v1546_v7  ;;  %v6054_v7 = vld [vmem:[#allocation17_spill] sm:$0xff]  ;;  %v5112_v24 = vpop.permute.xlu0 %1703 }
 0x1b6   : > { %905 = vperm.xlu1 %3530, %v3612_v49   ;;  %v1144_v6 = vadd.f32 %v1016_v8, %v737_v45  ;;  %v736_v31 = vadd.f32 %v608_v9, %v6054_v7 }
 0x1b7   : > { %v1273_v54 = vpop.permute.xlu1 %1272  ;;  %v2080_v55 = vmax.f32 %v1952_v21, 0.0  ;;  %v2082_v52 = vmax.f32 %v1954_v12, 0.0  ;;  %v2079_v42 = vmax.f32 %v1951_v57, 0.0  ;;  %v2081_v40 = vmax.f32 %v1953_v1, 0.0 }
 0x1b8   : > { %v1421_v53 = vmul.f32 %v5998_v46, %v1273_v54  ;;  %v1423_v63 = vmul.f32 %v4225_v15, %v1273_v54  ;;  %v1420_v59 = vmul.f32 %v6006_v29, %v1273_v54  ;;  %v1422_v23 = vmul.f32 %v6009_v30, %v1273_v54  ;;  %v2274_v58 = vpop.f32.mrb[4].mxu1 }
 0x1b9   : > { %2362 = vmatprep.mubr.f32.mxu1 %v2080_v55  ;;  %2587 = vmatprep.mubr.f32.mxu0 %v2082_v52  ;;  %v2275_v13 = vadd.f32 %v5011_v5, %v2274_v58  ;;  %v2499_v32 = vpop.f32.mrb[4].mxu0  ;;  %v2276_v51 = vpop.f32.mrb[5].mxu1  ;;  %v1141_v12 = vadd.f32 %v1013_v28, %v734_v47  ;;  %v1143_v9 = vadd.f32 %v1015_v0, %v736_v31 }
 0x1ba   : > { %3532 = vset.pattern.permute.xlu1 %v5992_v41  ;;  %2363 = vmatmul.mubr.f32.gmra.mrb[40].mxu1 %v2079_v42  ;;  %v1549_v8 = vadd.f32 %v1421_v53, %v1142_v18  ;;  %v1551_v21 = vadd.f32 %v1423_v63, %v1144_v6  ;;  %v2501_v57 = vpop.f32.mrb[5].mxu0  ;;  %v2686_v1 = vadd.s32 %v4966_v10, %v2653_v11 }
 0x1bb   : > { %1312 = vperm.xlu1 %3532, %v3612_v49   ;;  %2588 = vmatmul.mubr.f32.gmra.mrb[40].mxu0 %v2081_v40  ;;  %v2500_v41 = vadd.f32 %v2499_v32, %v2275_v13  ;;  %v1829_v18 = vmul.f32 %v4211_v61, %v5066_v2  ;;  %v1548_v28 = vadd.f32 %v1420_v59, %v1141_v12  ;;  %v5135_v59 = vpop.permute.xlu0 %873  ;;  %v2656_v12 = vadd.s32 48, %v6050_v19 }
 0x1bc   : > { %v870_v45 = vpop.permute.xlu1 %869  ;;  %v1956_v54 = vadd.f32 %v1828_v56, %v1549_v8  ;;  %v1958_v55 = vadd.f32 %v1830_v39, %v1551_v21  ;;  %v1550_v0 = vadd.f32 %v1422_v23, %v1143_v9  ;;  %v612_v56 = vmul.f32 %v4172_v38, %v6053_v35 }
 0x1bd   : > { %v2279_v47 = vpop.f32.mrb[6].mxu1  ;;  %v5123_v52 = vsel %vm2717_vm4, %v2500_v41, -inf  ;;  %v2504_v42 = vpop.f32.mrb[6].mxu0  ;;  %vm2718_vm5 = vcmp.lt.s32.totalorder %v2686_v1, 1000  ;;  %v2655_v39 = vadd.s32 40, %v6050_v19  ;;  %v613_v63 = vmul.f32 %v4162_v34, %v6053_v35 }
 0x1be   : > { %6055 = vst [vmem:[#allocation36_spill] sm:$0xff] %v5123_v52  ;;  %v2280_v11 = vadd.f32 %v5011_v5, %v2279_v47  ;;  %v2281_v40 = vpop.f32.mrb[7].mxu1  ;;  %v2084_v6 = vmax.f32 %v1956_v54, 0.0  ;;  %v2086_v53 = vmax.f32 %v1958_v55, 0.0  ;;  %2846 = vst.msk [vmem:[%s3750_s10 + $0x10] sm:$0xff] %vm2843_vm2, %v5123_v52  ;;  %v2506_v2 = vpop.f32.mrb[7].mxu0  ;;  %v738_v23 = vadd.f32 %v5073_v16, %v6028_v17 }
 0x1bf   : > { %3533 = vset.pattern.permute.xlu1 %v6007_v27  ;;  %v1955_v27 = vadd.f32 %v1827_v44, %v1548_v28  ;;  %v1957_v13 = vadd.f32 %v1829_v18, %v1550_v0  ;;  %v739_v51 = vadd.f32 %v5077_v22, %v6025_v26  ;;  %v740_v9 = vadd.f32 %v612_v56, %v6054_v7 }
 0x1c0   : > { %v2505_v31 = vadd.f32 %v2504_v42, %v2280_v11  ;;  %1719 = vperm.xlu1 %3533, %v3612_v49   ;;  %2367 = vmatprep.mubr.f32.mxu1 %v2084_v6  ;;  %v2687_v49 = vadd.s32 %v4966_v10, %v2654_v20  ;;  %v2688_v44 = vadd.s32 %v4966_v10, %v2655_v39 }
 0x1c1   : > { %2592 = vmatprep.mubr.f32.mxu0 %v2086_v53  ;;  %v5139_v58 = vpop.permute.xlu1 %458  ;;  %v2284_v32 = vpop.f32.mrb[8].mxu1  ;;  %v2083_v16 = vmax.f32 %v1955_v27, 0.0  ;;  %v2085_v57 = vmax.f32 %v1957_v13, 0.0  ;;  %v741_v22 = vadd.f32 %v613_v63, %v6026_v43  ;;  %v1017_v41 = vmul.f32 %v5999_v36, %v870_v45 }
 0x1c2   : > { %v5143_v8 = vsel %vm2718_vm5, %v2505_v31, -inf  ;;  %v2509_v35 = vpop.f32.mrb[8].mxu0  ;;  %v2286_v21 = vpop.f32.mrb[9].mxu1  ;;  %v1018_v54 = vmul.f32 %v6015_v4, %v870_v45  ;;  %v5157_v55 = vmul.f32 %v5999_v36, %v5135_v59  ;;  %v1019_v18 = vmul.f32 %v6016_v48, %v870_v45 }
 0x1c3   : > { %6056 = vst [vmem:[#allocation25_spill] sm:$0xff] %v5143_v8  ;;  %2847 = vst.msk [vmem:[%s3750_s10 + $0x18] sm:$0xff] %vm2843_vm2, %v5143_v8  ;;  %v2511_v1 = vpop.f32.mrb[9].mxu0  ;;  %v1020_v47 = vmul.f32 %v6018_v3, %v870_v45  ;;  %2368 = vmatmul.mubr.f32.gmra.mrb[42].mxu1 %v2083_v16  ;;  %2593 = vmatmul.mubr.f32.gmra.mrb[42].mxu0 %v2085_v57  ;;  %v2285_v28 = vadd.f32 %v5011_v5, %v2284_v32  ;;  %vm2719_vm6 = vcmp.lt.s32.totalorder %v2687_v49, 1000 }
 0x1c4   : > { %v5164_v20 = vmul.f32 %v6015_v4, %v5135_v59  ;;  %v2689_v6 = vadd.s32 %v4966_v10, %v2656_v12  ;;  %vm2720_vm7 = vcmp.lt.s32.totalorder %v2688_v44, 1000  ;;  %v1145_v63 = vadd.f32 %v1017_v41, %v738_v23 }
 0x1c5   : > { %v2289_v0 = vpop.f32.mrb[10].mxu1  ;;  %v2510_v53 = vadd.f32 %v2509_v35, %v2285_v28  ;;  %v1146_v32 = vadd.f32 %v1018_v54, %v739_v51  ;;  %v1147_v21 = vadd.f32 %v1019_v18, %v740_v9  ;;  %v1148_v16 = vadd.f32 %v1020_v47, %v741_v22 }
 0x1c6   : > { %v1277_v11 = vpop.permute.xlu1 %1276  ;;  %v2290_v42 = vadd.f32 %v5011_v5, %v2289_v0  ;;  %v2514_v40 = vpop.f32.mrb[10].mxu0  ;;  %v614_v35 = vmul.f32 %v4170_v37, %v5139_v58  ;;  %v1023_v23 = vmul.f32 %v6016_v48, %v5135_v59  ;;  %vm2721_vm8 = vcmp.lt.s32.totalorder %v2689_v6, 1000 }
 0x1c7   : > { %v1424_v45 = vmul.f32 %v6006_v29, %v1277_v11  ;;  %v1425_v56 = vmul.f32 %v5998_v46, %v1277_v11  ;;  %v2291_v2 = vpop.f32.mrb[11].mxu1  ;;  %v2516_v39 = vpop.f32.mrb[11].mxu0  ;;  %v1426_v31 = vmul.f32 %v6009_v30, %v1277_v11  ;;  %v1427_v27 = vmul.f32 %v4225_v15, %v1277_v11 }
 0x1c8   : > { %v2515_v13 = vadd.f32 %v2514_v40, %v2290_v42  ;;  %v5173_v12 = vsel %vm2719_vm6, %v2510_v53, -inf  ;;  %v615_v11 = vmul.f32 %v4160_v33, %v5139_v58  ;;  %v616_v42 = vmul.f32 %v4172_v38, %v5139_v58 }
 0x1c9   : > { %6057 = vst [vmem:[#allocation26_spill] sm:$0xff] %v5173_v12  ;;  %2848 = vst.msk [vmem:[%s3750_s10 + $0x20] sm:$0xff] %vm2843_vm2, %v5173_v12  ;;  %v1553_v49 = vadd.f32 %v1425_v56, %v1146_v32  ;;  %v1555_v1 = vadd.f32 %v1427_v27, %v1148_v16  ;;  %v1552_v44 = vadd.f32 %v1424_v45, %v1145_v63  ;;  %v2657_v32 = vadd.s32 56, %v6050_v19 }
 0x1ca   : > { %v5182_v57 = vsel %vm2720_vm7, %v2515_v13, -inf  ;;  %v2294_v9 = vpop.f32.mrb[12].mxu1  ;;  %v1554_v22 = vadd.f32 %v1426_v31, %v1147_v21  ;;  %v617_v40 = vmul.f32 %v4162_v34, %v5139_v58  ;;  %v742_v31 = vadd.f32 %v614_v35, %v6028_v17 }
 0x1cb   : > { %6058 = vst [vmem:[#allocation18_spill] sm:$0xff] %v5182_v57  ;;  %2849 = vst.msk [vmem:[%s3750_s10 + $0x28] sm:$0xff] %vm2843_vm2, %v5182_v57  ;;  %v1684_v51 = vpop.permute.xlu1 %1683  ;;  %v2519_v28 = vpop.f32.mrb[12].mxu0  ;;  %v2295_v53 = vadd.f32 %v5011_v5, %v2294_v9  ;;  %v1024_v27 = vmul.f32 %v6018_v3, %v5135_v59  ;;  %v743_v9 = vadd.f32 %v615_v11, %v6025_v26 }
 0x1cc   : > { %v1831_v41 = vmul.f32 %v4209_v60, %v1684_v51  ;;  %v1832_v54 = vmul.f32 %v6023_v62, %v1684_v51  ;;  %v1833_v18 = vmul.f32 %v4211_v61, %v1684_v51  ;;  %v1834_v47 = vmul.f32 %v6024_v14, %v1684_v51  ;;  %v2296_v0 = vpop.f32.mrb[13].mxu1  ;;  %v2521_v45 = vpop.f32.mrb[13].mxu0 }
 0x1cd   : > { %v2520_v13 = vadd.f32 %v2519_v28, %v2295_v53  ;;  %v2690_v59 = vadd.s32 %v4966_v10, %v2657_v32  ;;  %v1149_v35 = vadd.f32 %v5157_v55, %v742_v31  ;;  %v1839_v55 = vmul.f32 %v4209_v60, %v5094_v25 }
 0x1ce   : > { %v1960_v56 = vadd.f32 %v1832_v54, %v1553_v49  ;;  %v1962_v2 = vadd.f32 %v1834_v47, %v1555_v1  ;;  %v1959_v39 = vadd.f32 %v1831_v41, %v1552_v44  ;;  %v1961_v63 = vadd.f32 %v1833_v18, %v1554_v22  ;;  %v6060_v47 = vld [vmem:[#allocation31_spill] sm:$0xff] }
 0x1cf   : > { %v744_v49 = vadd.f32 %v616_v42, %v6054_v7  ;;  %v745_v1 = vadd.f32 %v617_v40, %v6026_v43  ;;  %v5206_v44 = vsel %vm2721_vm8, %v2520_v13, -inf  ;;  %v1150_v22 = vadd.f32 %v5164_v20, %v743_v9 }
 0x1d0   : > { %v464_v21 = vpop.permute.xlu1 %463  ;;  %v2088_v16 = vmax.f32 %v1960_v56, 0.0  ;;  %v2090_v51 = vmax.f32 %v1962_v2, 0.0  ;;  %v2087_v58 = vmax.f32 %v1959_v39, 0.0  ;;  %v2089_v0 = vmax.f32 %v1961_v63, 0.0  ;;  %6059 = vst [vmem:[#allocation19_spill] sm:$0xff] %v5206_v44  ;;  %2850 = vst.msk [vmem:[%s3750_s10 + $0x30] sm:$0xff] %vm2843_vm2, %v5206_v44 }
 0x1d1   : > { %v1151_v41 = vadd.f32 %v1023_v23, %v744_v49  ;;  %v1152_v54 = vadd.f32 %v1024_v27, %v745_v1  ;;  %v1428_v6 = vmul.f32 %v6006_v29, %v6060_v47  ;;  %v1429_v28 = vmul.f32 %v5998_v46, %v6060_v47 }
 0x1d2   : > { %2372 = vmatprep.mubr.f32.mxu1 %v2088_v16  ;;  %2597 = vmatprep.mubr.f32.mxu0 %v2090_v51  ;;  %v1430_v11 = vmul.f32 %v6009_v30, %v6060_v47  ;;  %v618_v42 = vmul.f32 %v4170_v37, %v464_v21  ;;  %v1431_v40 = vmul.f32 %v4225_v15, %v6060_v47  ;;  %vm2722_vm9 = vcmp.lt.s32.totalorder %v2690_v59, 1000 }
 0x1d3   : > { %2373 = vmatmul.mubr.f32.gmra.mrb[44].mxu1 %v2087_v58  ;;  %2598 = vmatmul.mubr.f32.gmra.mrb[44].mxu0 %v2089_v0  ;;  %v1840_v20 = vmul.f32 %v6023_v62, %v5094_v25  ;;  %v1842_v23 = vmul.f32 %v6024_v14, %v5094_v25  ;;  %v619_v53 = vmul.f32 %v4160_v33, %v464_v21 }
 0x1d4   : > { %v620_v45 = vmul.f32 %v4172_v38, %v464_v21  ;;  %v621_v56 = vmul.f32 %v4162_v34, %v464_v21  ;;  %v1557_v2 = vadd.f32 %v1429_v28, %v1150_v22  ;;  %v1559_v39 = vadd.f32 %v1431_v40, %v1152_v54 }
 0x1d5   : > { %v878_v18 = vpop.permute.xlu1 %877  ;;  %v1556_v63 = vadd.f32 %v1428_v6, %v1149_v35  ;;  %v1558_v31 = vadd.f32 %v1430_v11, %v1151_v41  ;;  %v746_v27 = vadd.f32 %v618_v42, %v6028_v17  ;;  %v747_v49 = vadd.f32 %v619_v53, %v6025_v26 }
 0x1d6   : > { %v1025_v13 = vmul.f32 %v5999_v36, %v878_v18  ;;  %v1026_v32 = vmul.f32 %v6015_v4, %v878_v18  ;;  %v1028_v16 = vmul.f32 %v6018_v3, %v878_v18  ;;  %v748_v1 = vadd.f32 %v620_v45, %v6054_v7 }
 0x1d7   : > { %v749_v35 = vadd.f32 %v621_v56, %v6026_v43  ;;  %v1027_v22 = vmul.f32 %v6016_v48, %v878_v18 }
 0x1d8   : > { %v1153_v44 = vadd.f32 %v1025_v13, %v746_v27  ;;  %v1154_v57 = vadd.f32 %v1026_v32, %v747_v49  ;;  %v1841_v27 = vmul.f32 %v4211_v61, %v5094_v25  ;;  %v6062_v25 = vld [vmem:[#allocation22_spill] sm:$0xff] }
 0x1da   : > { %v1688_v51 = vpop.permute.xlu1 %1687 }
 0x1db   : > { %v1835_v58 = vmul.f32 %v4209_v60, %v1688_v51  ;;  %v1836_v0 = vmul.f32 %v6023_v62, %v1688_v51  ;;  %v1837_v21 = vmul.f32 %v4211_v61, %v1688_v51  ;;  %v1838_v9 = vmul.f32 %v6024_v14, %v1688_v51 }
 0x1dc   : > { %v2299_v41 = vpop.f32.mrb[14].mxu1  ;;  %v2524_v54 = vpop.f32.mrb[14].mxu0  ;;  %v1156_v51 = vadd.f32 %v1028_v16, %v749_v35 }
 0x1dd   : > { %v2300_v47 = vadd.f32 %v5011_v5, %v2299_v41  ;;  %v2301_v6 = vpop.f32.mrb[15].mxu1  ;;  %v2526_v28 = vpop.f32.mrb[15].mxu0  ;;  %v1964_v11 = vadd.f32 %v1836_v0, %v1557_v2  ;;  %v1966_v42 = vadd.f32 %v1838_v9, %v1559_v39  ;;  %v1963_v40 = vadd.f32 %v1835_v58, %v1556_v63 }
 0x1de   : > { %v1965_v12 = vadd.f32 %v1837_v21, %v1558_v31  ;;  %v1155_v39 = vadd.f32 %v1027_v22, %v748_v1  ;;  %v622_v22 = vmul.f32 %v4170_v37, %v6062_v25 }
 0x1df   : > { %v2525_v53 = vadd.f32 %v2524_v54, %v2300_v47  ;;  %v1285_v45 = vpop.permute.xlu1 %1284  ;;  %v2092_v8 = vmax.f32 %v1964_v11, 0.0  ;;  %v2094_v56 = vmax.f32 %v1966_v42, 0.0  ;;  %v2091_v52 = vmax.f32 %v1963_v40, 0.0 }
 0x1e0   : > { %v1432_v18 = vmul.f32 %v6006_v29, %v1285_v45  ;;  %v1433_v50 = vmul.f32 %v5998_v46, %v1285_v45  ;;  %v1434_v41 = vmul.f32 %v6009_v30, %v1285_v45  ;;  %v1435_v2 = vmul.f32 %v4225_v15, %v1285_v45 }
 0x1e1   : > { %v5250_v63 = vsel %vm2722_vm9, %v2525_v53, -inf  ;;  %2377 = vmatprep.mubr.f32.mxu1 %v2092_v8  ;;  %2602 = vmatprep.mubr.f32.mxu0 %v2094_v56  ;;  %v2093_v31 = vmax.f32 %v1965_v12, 0.0  ;;  %v2658_v8 = vadd.s32 64, %v6050_v19  ;;  %v2659_v54 = vadd.s32 72, %v6050_v19 }
 0x1e2   : > { %6061 = vst [vmem:[#allocation16_spill] sm:$0xff] %v5250_v63  ;;  %2851 = vst.msk [vmem:[%s3750_s10 + $0x38] sm:$0xff] %vm2843_vm2, %v5250_v63  ;;  %2378 = vmatmul.mubr.f32.gmra.mrb[46].mxu1 %v2091_v52  ;;  %v1561_v13 = vadd.f32 %v1433_v50, %v1154_v57  ;;  %v1563_v32 = vadd.f32 %v1435_v2, %v1156_v51  ;;  %v1560_v16 = vadd.f32 %v1432_v18, %v1153_v44 }
 0x1e3   : > { %2603 = vmatmul.mubr.f32.gmra.mrb[46].mxu0 %v2093_v31  ;;  %v1562_v58 = vadd.f32 %v1434_v41, %v1155_v39  ;;  %v623_v50 = vmul.f32 %v4160_v33, %v6062_v25  ;;  %v624_v52 = vmul.f32 %v4172_v38, %v6062_v25  ;;  %v625_v57 = vmul.f32 %v4162_v34, %v6062_v25 }
 0x1e4   : > { %v882_v0 = vpop.permute.xlu1 %881  ;;  %v1968_v21 = vadd.f32 %v1840_v20, %v1561_v13  ;;  %v1970_v59 = vadd.f32 %v1842_v23, %v1563_v32  ;;  %v1967_v9 = vadd.f32 %v1839_v55, %v1560_v16  ;;  %v5266_v20 = vpop.permute.xlu0 %885  ;;  %v2691_v23 = vadd.s32 %v4966_v10, %v2658_v8 }
 0x1e5   : > { %v1969_v35 = vadd.f32 %v1841_v27, %v1562_v58  ;;  %v750_v47 = vadd.f32 %v622_v22, %v6028_v17  ;;  %v751_v11 = vadd.f32 %v623_v50, %v6025_v26  ;;  %v752_v42 = vadd.f32 %v624_v52, %v6054_v7 }
 0x1e6   : > { %v2096_v49 = vmax.f32 %v1968_v21, 0.0  ;;  %v2098_v12 = vmax.f32 %v1970_v59, 0.0  ;;  %v2095_v1 = vmax.f32 %v1967_v9, 0.0  ;;  %v753_v40 = vadd.f32 %v625_v57, %v6026_v43 }
 0x1e7   : > { %v2097_v44 = vmax.f32 %v1969_v35, 0.0  ;;  %v1029_v51 = vmul.f32 %v5999_v36, %v882_v0  ;;  %v1030_v56 = vmul.f32 %v6015_v4, %v882_v0  ;;  %v1031_v18 = vmul.f32 %v6016_v48, %v882_v0 }
 0x1e8   : > { %2382 = vmatprep.mubr.f32.mxu1 %v2096_v49  ;;  %2607 = vmatprep.mubr.f32.mxu0 %v2098_v12  ;;  %v1032_v41 = vmul.f32 %v6018_v3, %v882_v0  ;;  %vm2723_vm10 = vcmp.lt.s32.totalorder %v2691_v23, 1000  ;;  %v2692_v31 = vadd.s32 %v4966_v10, %v2659_v54  ;;  %v5287_v12 = vpop.permute.xlu0 %897 }
 0x1e9   : > { %v474_v55 = vpop.permute.xlu1 %473  ;;  %2383 = vmatmul.mubr.f32.gmra.mrb[48].mxu1 %v2095_v1  ;;  %2608 = vmatmul.mubr.f32.gmra.mrb[48].mxu0 %v2097_v44  ;;  %v1157_v58 = vadd.f32 %v1029_v51, %v750_v47  ;;  %v1158_v59 = vadd.f32 %v1030_v56, %v751_v11  ;;  %v1159_v9 = vadd.f32 %v1031_v18, %v752_v42 }
 0x1ea   : > { %v1160_v0 = vadd.f32 %v1032_v41, %v753_v40  ;;  %v626_v49 = vmul.f32 %v4170_v37, %v474_v55  ;;  %vm2724_vm11 = vcmp.lt.s32.totalorder %v2692_v31, 1000  ;;  %v628_v11 = vmul.f32 %v4172_v38, %v474_v55 }
 0x1eb   : > { %v2304_v6 = vpop.f32.mrb[16].mxu1  ;;  %v2529_v28 = vpop.f32.mrb[16].mxu0  ;;  %v629_v42 = vmul.f32 %v4162_v34, %v474_v55  ;;  %v1033_v41 = vmul.f32 %v5999_v36, %v5266_v20 }
 0x1ec   : > { %v2306_v53 = vpop.f32.mrb[17].mxu1  ;;  %v2531_v45 = vpop.f32.mrb[17].mxu0  ;;  %v2305_v2 = vadd.f32 %v5011_v5, %v2304_v6 }
 0x1ee   : > { %v1289_v39 = vpop.permute.xlu1 %1288  ;;  %v2530_v27 = vadd.f32 %v2529_v28, %v2305_v2  ;;  %v627_v28 = vmul.f32 %v4160_v33, %v474_v55  ;;  %v1034_v2 = vmul.f32 %v6015_v4, %v5266_v20 }
 0x1ef   : > { %v1436_v13 = vmul.f32 %v6006_v29, %v1289_v39  ;;  %v1437_v32 = vmul.f32 %v5998_v46, %v1289_v39  ;;  %v1438_v16 = vmul.f32 %v6009_v30, %v1289_v39  ;;  %v1439_v21 = vmul.f32 %v4225_v15, %v1289_v39 }
 0x1f0   : > { %v5284_v8 = vsel %vm2723_vm10, %v2530_v27, -inf  ;;  %v1035_v39 = vmul.f32 %v6016_v48, %v5266_v20 }
 0x1f1   : > { %6063 = vst [vmem:[#allocation9_spill] sm:$0xff] %v5284_v8  ;;  %2852 = vst.msk [vmem:[%s3750_s10 + $0x40] sm:$0xff] %vm2843_vm2, %v5284_v8  ;;  %v1565_v25 = vadd.f32 %v1437_v32, %v1158_v59  ;;  %v1567_v22 = vadd.f32 %v1439_v21, %v1160_v0  ;;  %v1564_v50 = vadd.f32 %v1436_v13, %v1157_v58 }
 0x1f2   : > { %v1566_v52 = vadd.f32 %v1438_v16, %v1159_v9  ;;  %v1036_v21 = vmul.f32 %v6018_v3, %v5266_v20  ;;  %v755_v59 = vadd.f32 %v627_v28, %v6025_v26  ;;  %v1293_v9 = vpop.permute.xlu0 %1292 }
 0x1f3   : > { %v1696_v1 = vpop.permute.xlu1 %1695  ;;  %v2309_v35 = vpop.f32.mrb[18].mxu1  ;;  %v1440_v20 = vmul.f32 %v6006_v29, %v1293_v9  ;;  %v1441_v31 = vmul.f32 %v5998_v46, %v1293_v9 }
 0x1f4   : > { %v1843_v57 = vmul.f32 %v4209_v60, %v1696_v1  ;;  %v1844_v44 = vmul.f32 %v6023_v62, %v1696_v1  ;;  %v1845_v23 = vmul.f32 %v4211_v61, %v1696_v1  ;;  %v1846_v54 = vmul.f32 %v6024_v14, %v1696_v1  ;;  %v2534_v47 = vpop.f32.mrb[18].mxu0  ;;  %v2311_v6 = vpop.f32.mrb[19].mxu1 }
 0x1f5   : > { %v2310_v40 = vadd.f32 %v5011_v5, %v2309_v35  ;;  %v2536_v51 = vpop.f32.mrb[19].mxu0  ;;  %v2660_v1 = vadd.s32 80, %v6050_v19  ;;  %v754_v35 = vadd.f32 %v626_v49, %v6028_v17 }
 0x1f6   : > { %v1972_v53 = vadd.f32 %v1844_v44, %v1565_v25  ;;  %v1974_v45 = vadd.f32 %v1846_v54, %v1567_v22  ;;  %v1971_v56 = vadd.f32 %v1843_v57, %v1564_v50  ;;  %v1973_v18 = vadd.f32 %v1845_v23, %v1566_v52 }
 0x1f7   : > { %v2535_v27 = vadd.f32 %v2534_v47, %v2310_v40  ;;  %v756_v25 = vadd.f32 %v628_v11, %v6054_v7  ;;  %v757_v22 = vadd.f32 %v629_v42, %v6026_v43  ;;  %v1442_v50 = vmul.f32 %v6009_v30, %v1293_v9 }
 0x1f8   : > { %v479_v13 = vpop.permute.xlu1 %478  ;;  %v2100_v55 = vmax.f32 %v1972_v53, 0.0  ;;  %v2102_v32 = vmax.f32 %v1974_v45, 0.0  ;;  %v2099_v16 = vmax.f32 %v1971_v56, 0.0  ;;  %v2101_v58 = vmax.f32 %v1973_v18, 0.0 }
 0x1f9   : > { %v5310_v0 = vsel %vm2724_vm11, %v2535_v27, -inf  ;;  %v2693_v49 = vadd.s32 %v4966_v10, %v2660_v1  ;;  %v1162_v57 = vadd.f32 %v1034_v2, %v755_v59  ;;  %v1443_v44 = vmul.f32 %v4225_v15, %v1293_v9 }
 0x1fa   : > { %6064 = vst [vmem:[#allocation15_spill] sm:$0xff] %v5310_v0  ;;  %2853 = vst.msk [vmem:[%s3750_s10 + $0x48] sm:$0xff] %vm2843_vm2, %v5310_v0  ;;  %2387 = vmatprep.mubr.f32.mxu1 %v2100_v55  ;;  %2612 = vmatprep.mubr.f32.mxu0 %v2102_v32  ;;  %v1164_v23 = vadd.f32 %v1036_v21, %v757_v22  ;;  %v1161_v54 = vadd.f32 %v1033_v41, %v754_v35 }
 0x1fb   : > { %2388 = vmatmul.mubr.f32.gmra.mrb[50].mxu1 %v2099_v16  ;;  %2613 = vmatmul.mubr.f32.gmra.mrb[50].mxu0 %v2101_v58  ;;  %v1163_v47 = vadd.f32 %v1035_v39, %v756_v25  ;;  %v630_v6 = vmul.f32 %v4170_v37, %v479_v13  ;;  %v631_v28 = vmul.f32 %v4160_v33, %v479_v13  ;;  %vm2725_vm12 = vcmp.lt.s32.totalorder %v2693_v49, 1000 }
 0x1fc   : > { %v1851_v11 = vmul.f32 %v4209_v60, %v5112_v24  ;;  %v632_v42 = vmul.f32 %v4172_v38, %v479_v13  ;;  %v1569_v40 = vadd.f32 %v1441_v31, %v1162_v57  ;;  %v633_v51 = vmul.f32 %v4162_v34, %v479_v13 }
 0x1fd   : > { %v890_v52 = vpop.permute.xlu1 %889  ;;  %v1571_v53 = vadd.f32 %v1443_v44, %v1164_v23  ;;  %v1568_v45 = vadd.f32 %v1440_v20, %v1161_v54  ;;  %v1570_v56 = vadd.f32 %v1442_v50, %v1163_v47  ;;  %v758_v18 = vadd.f32 %v630_v6, %v6028_v17 }
 0x1fe   : > { %v759_v41 = vadd.f32 %v631_v28, %v6025_v26  ;;  %v1037_v2 = vmul.f32 %v5999_v36, %v890_v52  ;;  %v1038_v39 = vmul.f32 %v6015_v4, %v890_v52  ;;  %v760_v59 = vadd.f32 %v632_v42, %v6054_v7 }
 0x1ff   : > { %v1039_v9 = vmul.f32 %v6016_v48, %v890_v52  ;;  %v1040_v1 = vmul.f32 %v6018_v3, %v890_v52  ;;  %v761_v44 = vadd.f32 %v633_v51, %v6026_v43  ;;  %v1852_v49 = vmul.f32 %v6023_v62, %v5112_v24 }
 0x200   : > { %v1165_v23 = vadd.f32 %v1037_v2, %v758_v18  ;;  %v1166_v54 = vadd.f32 %v1038_v39, %v759_v41  ;;  %v1853_v2 = vmul.f32 %v4211_v61, %v5112_v24 }
 0x202   : > { %v1700_v27 = vpop.permute.xlu1 %1699 }
 0x203   : > { %v1847_v55 = vmul.f32 %v4209_v60, %v1700_v27  ;;  %v1848_v32 = vmul.f32 %v6023_v62, %v1700_v27  ;;  %v1849_v16 = vmul.f32 %v4211_v61, %v1700_v27  ;;  %v1850_v13 = vmul.f32 %v6024_v14, %v1700_v27 }
 0x204   : > { %v2314_v58 = vpop.f32.mrb[20].mxu1  ;;  %v2539_v21 = vpop.f32.mrb[20].mxu0 }
 0x205   : > { %v2315_v35 = vadd.f32 %v5011_v5, %v2314_v58  ;;  %v2316_v25 = vpop.f32.mrb[21].mxu1  ;;  %v2541_v22 = vpop.f32.mrb[21].mxu0  ;;  %v1976_v20 = vadd.f32 %v1848_v32, %v1569_v40  ;;  %v1978_v31 = vadd.f32 %v1850_v13, %v1571_v53  ;;  %v1975_v50 = vadd.f32 %v1847_v55, %v1568_v45 }
 0x206   : > { %v1977_v57 = vadd.f32 %v1849_v16, %v1570_v56  ;;  %v1167_v45 = vadd.f32 %v1039_v9, %v760_v59  ;;  %v1168_v56 = vadd.f32 %v1040_v1, %v761_v44  ;;  %v1854_v32 = vmul.f32 %v6024_v14, %v5112_v24 }
 0x207   : > { %v2540_v47 = vadd.f32 %v2539_v21, %v2315_v35  ;;  %v1297_v6 = vpop.permute.xlu1 %1296  ;;  %v2104_v28 = vmax.f32 %v1976_v20, 0.0  ;;  %v2106_v42 = vmax.f32 %v1978_v31, 0.0  ;;  %v2103_v27 = vmax.f32 %v1975_v50, 0.0 }
 0x208   : > { %v2105_v0 = vmax.f32 %v1977_v57, 0.0  ;;  %v1444_v5 = vmul.f32 %v6006_v29, %v1297_v6  ;;  %v1445_v40 = vmul.f32 %v5998_v46, %v1297_v6  ;;  %v1446_v53 = vmul.f32 %v6009_v30, %v1297_v6 }
 0x209   : > { %v5344_v52 = vsel %vm2725_vm12, %v2540_v47, -inf  ;;  %v1447_v51 = vmul.f32 %v4225_v15, %v1297_v6  ;;  %2392 = vmatprep.mubr.f32.mxu1 %v2104_v28  ;;  %2617 = vmatprep.mubr.f32.mxu0 %v2106_v42  ;;  %v2661_v21 = vadd.s32 88, %v6050_v19  ;;  %v5373_v47 = vld [vmem:[%s5873_s4] ss:$0 sm:$0xff] }
 0x20a   : > { %6065 = vst [vmem:[#allocation8_spill] sm:$0xff] %v5344_v52  ;;  %2854 = vst.msk [vmem:[%s3750_s10 + $0x50] sm:$0xff] %vm2843_vm2, %v5344_v52  ;;  %2393 = vmatmul.mubr.f32.gmra.mrb[52].mxu1 %v2103_v27  ;;  %2618 = vmatmul.mubr.f32.gmra.mrb[52].mxu0 %v2105_v0  ;;  %v1573_v18 = vadd.f32 %v1445_v40, %v1166_v54  ;;  %v1572_v41 = vadd.f32 %v1444_v5, %v1165_v23  ;;  %v6066_v0 = vld [vmem:[#allocation10_spill] sm:$0xff]  ;;  %v2662_v54 = vadd.s32 96, %v6050_v19 }
 0x20b   : > { %v1575_v39 = vadd.f32 %v1447_v51, %v1168_v56  ;;  %v1574_v55 = vadd.f32 %v1446_v53, %v1167_v45  ;;  %v634_v25 = vmul.f32 %v4170_v37, %v6066_v0  ;;  %v2694_v31 = vadd.s32 %v4966_v10, %v2661_v21 }
 0x20c   : > { %v894_v16 = vpop.permute.xlu1 %893  ;;  %v1980_v13 = vadd.f32 %v1852_v49, %v1573_v18  ;;  %v1979_v58 = vadd.f32 %v1851_v11, %v1572_v41  ;;  %v635_v24 = vmul.f32 %v4160_v33, %v6066_v0  ;;  %v636_v11 = vmul.f32 %v4172_v38, %v6066_v0 }
 0x20d   : > { %v1982_v9 = vadd.f32 %v1854_v32, %v1575_v39  ;;  %v1981_v35 = vadd.f32 %v1853_v2, %v1574_v55  ;;  %v637_v57 = vmul.f32 %v4162_v34, %v6066_v0  ;;  %v762_v27 = vadd.f32 %v634_v25, %v6028_v17 }
 0x20e   : > { %v2108_v59 = vmax.f32 %v1980_v13, 0.0  ;;  %v2107_v1 = vmax.f32 %v1979_v58, 0.0  ;;  %v1042_v5 = vmul.f32 %v6015_v4, %v894_v16  ;;  %vm2726_vm13 = vcmp.lt.s32.totalorder %v2694_v31, 1000 }
 0x20f   : > { %v2110_v22 = vmax.f32 %v1982_v9, 0.0  ;;  %v2109_v20 = vmax.f32 %v1981_v35, 0.0  ;;  %v1041_v40 = vmul.f32 %v5999_v36, %v894_v16  ;;  %v1043_v53 = vmul.f32 %v6016_v48, %v894_v16 }
 0x210   : > { %2397 = vmatprep.mubr.f32.mxu1 %v2108_v59  ;;  %v1044_v45 = vmul.f32 %v6018_v3, %v894_v16  ;;  %v763_v51 = vadd.f32 %v635_v24, %v6025_v26  ;;  %v764_v49 = vadd.f32 %v636_v11, %v6054_v7  ;;  %v765_v18 = vadd.f32 %v637_v57, %v6026_v43 }
 0x211   : > { %2398 = vmatmul.mubr.f32.gmra.mrb[54].mxu1 %v2107_v1  ;;  %2622 = vmatprep.mubr.f32.mxu0 %v2110_v22  ;;  %v2695_v2 = vadd.s32 %v4966_v10, %v2662_v54  ;;  %v1169_v21 = vadd.f32 %v1041_v40, %v762_v27  ;;  %v1305_v1 = vpop.permute.xlu0 %1304  ;;  %v1045_v35 = vmul.f32 %v5999_v36, %v5287_v12 }
 0x212   : > { %v489_v50 = vpop.permute.xlu1 %488  ;;  %2623 = vmatmul.mubr.f32.gmra.mrb[54].mxu0 %v2109_v20  ;;  %v1170_v58 = vadd.f32 %v1042_v5, %v763_v51  ;;  %v1171_v59 = vadd.f32 %v1043_v53, %v764_v49  ;;  %v1172_v9 = vadd.f32 %v1044_v45, %v765_v18 }
 0x213   : > { %v2319_v44 = vpop.f32.mrb[22].mxu1  ;;  %v2544_v23 = vpop.f32.mrb[22].mxu0  ;;  %v638_v0 = vmul.f32 %v4170_v37, %v489_v50  ;;  %vm2727_vm14 = vcmp.lt.s32.totalorder %v2695_v2, 1000  ;;  %v639_v5 = vmul.f32 %v4160_v33, %v489_v50  ;;  %v640_v40 = vmul.f32 %v4172_v38, %v489_v50 }
 0x214   : > { %v2320_v6 = vadd.f32 %v5373_v47, %v2319_v44  ;;  %v2321_v28 = vpop.f32.mrb[23].mxu1  ;;  %v2546_v42 = vpop.f32.mrb[23].mxu0  ;;  %v641_v53 = vmul.f32 %v4162_v34, %v489_v50  ;;  %v1048_v50 = vmul.f32 %v6018_v3, %v5287_v12 }
 0x215   : > { %v768_v2 = vadd.f32 %v640_v40, %v6054_v7 }
 0x216   : > { %v2545_v56 = vadd.f32 %v2544_v23, %v2320_v6 }
 0x217   : > { %v1301_v41 = vpop.permute.xlu1 %1300 }
 0x218   : > { %v5385_v39 = vsel %vm2726_vm13, %v2545_v56, -inf  ;;  %v1448_v55 = vmul.f32 %v6006_v29, %v1301_v41  ;;  %v1449_v32 = vmul.f32 %v5998_v46, %v1301_v41  ;;  %v1450_v13 = vmul.f32 %v6009_v30, %v1301_v41 }
 0x219   : > { %6067 = vst [vmem:[#allocation34_spill] sm:$0xff] %v5385_v39  ;;  %2855 = vst.msk [vmem:[%s3750_s10 + $0x58] sm:$0xff] %vm2843_vm2, %v5385_v39  ;;  %v1451_v16 = vmul.f32 %v4225_v15, %v1301_v41  ;;  %v5405_v41 = vpop.permute.xlu0 %498 }
 0x21a   : > { %v1577_v20 = vadd.f32 %v1449_v32, %v1170_v58  ;;  %v1576_v44 = vadd.f32 %v1448_v55, %v1169_v21  ;;  %v1578_v23 = vadd.f32 %v1450_v13, %v1171_v59  ;;  %v1046_v55 = vmul.f32 %v6015_v4, %v5287_v12 }
 0x21b   : > { %v2324_v25 = vpop.f32.mrb[24].mxu1  ;;  %v2549_v22 = vpop.f32.mrb[24].mxu0  ;;  %v1579_v57 = vadd.f32 %v1451_v16, %v1172_v9  ;;  %v1047_v32 = vmul.f32 %v6016_v48, %v5287_v12  ;;  %v2663_v58 = vadd.s32 104, %v6050_v19 }
 0x21c   : > { %v1708_v31 = vpop.permute.xlu1 %1707  ;;  %v2325_v24 = vadd.f32 %v5373_v47, %v2324_v25  ;;  %v2326_v11 = vpop.f32.mrb[25].mxu1  ;;  %v766_v25 = vadd.f32 %v638_v0, %v6028_v17  ;;  %v1455_v0 = vmul.f32 %v4225_v15, %v1305_v1 }
 0x21d   : > { %v1855_v54 = vmul.f32 %v4209_v60, %v1708_v31  ;;  %v1856_v6 = vmul.f32 %v6023_v62, %v1708_v31  ;;  %v1857_v28 = vmul.f32 %v4211_v61, %v1708_v31  ;;  %v1858_v42 = vmul.f32 %v6024_v14, %v1708_v31  ;;  %v2551_v27 = vpop.f32.mrb[25].mxu0 }
 0x21e   : > { %v2550_v45 = vadd.f32 %v2549_v22, %v2325_v24  ;;  %v767_v22 = vadd.f32 %v639_v5, %v6025_v26  ;;  %v5425_v12 = vadd.s32 %v4966_v10, %v2663_v58  ;;  %v1452_v24 = vmul.f32 %v6006_v29, %v1305_v1 }
 0x21f   : > { %v1984_v56 = vadd.f32 %v1856_v6, %v1577_v20  ;;  %v1986_v51 = vadd.f32 %v1858_v42, %v1579_v57  ;;  %v1983_v49 = vadd.f32 %v1855_v54, %v1576_v44  ;;  %v1985_v18 = vadd.f32 %v1857_v28, %v1578_v23  ;;  %v1716_v44 = vpop.permute.xlu0 %1715 }
 0x220   : > { %v5412_v13 = vsel %vm2727_vm14, %v2550_v45, -inf  ;;  %v769_v20 = vadd.f32 %v641_v53, %v6026_v43  ;;  %v1453_v11 = vmul.f32 %v5998_v46, %v1305_v1  ;;  %v1454_v57 = vmul.f32 %v6009_v30, %v1305_v1 }
 0x221   : > { %6068 = vst [vmem:[#allocation35_spill] sm:$0xff] %v5412_v13  ;;  %2856 = vst.msk [vmem:[%s3750_s10 + $0x60] sm:$0xff] %vm2843_vm2, %v5412_v13  ;;  %v494_v16 = vpop.permute.xlu1 %493  ;;  %v2112_v21 = vmax.f32 %v1984_v56, 0.0  ;;  %v2114_v59 = vmax.f32 %v1986_v51, 0.0  ;;  %v2111_v9 = vmax.f32 %v1983_v49, 0.0  ;;  %v2113_v31 = vmax.f32 %v1985_v18, 0.0 }
 0x222   : > { %v1174_v54 = vadd.f32 %v1046_v55, %v767_v22  ;;  %v1176_v6 = vadd.f32 %v1048_v50, %v769_v20  ;;  %v1173_v28 = vadd.f32 %v1045_v35, %v766_v25  ;;  %v1175_v42 = vadd.f32 %v1047_v32, %v768_v2 }
 0x223   : > { %2402 = vmatprep.mubr.f32.mxu1 %v2112_v21  ;;  %2627 = vmatprep.mubr.f32.mxu0 %v2114_v59  ;;  %v642_v27 = vmul.f32 %v4170_v37, %v494_v16  ;;  %vm2728_vm15 = vcmp.lt.s32.totalorder %v5425_v12, 1000  ;;  %v1863_v5 = vmul.f32 %v4209_v60, %v1716_v44  ;;  %v1864_v40 = vmul.f32 %v6023_v62, %v1716_v44 }
 0x224   : > { %2403 = vmatmul.mubr.f32.gmra.mrb[56].mxu1 %v2111_v9  ;;  %2628 = vmatmul.mubr.f32.gmra.mrb[56].mxu0 %v2113_v31  ;;  %v643_v53 = vmul.f32 %v4160_v33, %v494_v16  ;;  %v644_v45 = vmul.f32 %v4172_v38, %v494_v16  ;;  %v645_v1 = vmul.f32 %v4162_v34, %v494_v16 }
 0x225   : > { %v1865_v56 = vmul.f32 %v4211_v61, %v1716_v44  ;;  %v1581_v51 = vadd.f32 %v1453_v11, %v1174_v54  ;;  %v1583_v49 = vadd.f32 %v1455_v0, %v1176_v6  ;;  %v1580_v35 = vadd.f32 %v1452_v24, %v1173_v28 }
 0x226   : > { %v902_v23 = vpop.permute.xlu1 %901  ;;  %v1582_v18 = vadd.f32 %v1454_v57, %v1175_v42  ;;  %v770_v55 = vadd.f32 %v642_v27, %v6028_v17  ;;  %v771_v22 = vadd.f32 %v643_v53, %v6025_v26  ;;  %v772_v2 = vadd.f32 %v644_v45, %v6054_v7 }
 0x227   : > { %v1049_v32 = vmul.f32 %v5999_v36, %v902_v23  ;;  %v1050_v58 = vmul.f32 %v6015_v4, %v902_v23  ;;  %v1051_v50 = vmul.f32 %v6016_v48, %v902_v23  ;;  %v773_v20 = vadd.f32 %v645_v1, %v6026_v43 }
 0x228   : > { %v1052_v31 = vmul.f32 %v6018_v3, %v902_v23 }
 0x229   : > { %v1177_v6 = vadd.f32 %v1049_v32, %v770_v55  ;;  %v1178_v28 = vadd.f32 %v1050_v58, %v771_v22  ;;  %v1179_v42 = vadd.f32 %v1051_v50, %v772_v2  ;;  %v1866_v55 = vmul.f32 %v6024_v14, %v1716_v44 }
 0x22b   : > { %v1712_v21 = vpop.permute.xlu1 %1711 }
 0x22c   : > { %v1859_v59 = vmul.f32 %v4209_v60, %v1712_v21  ;;  %v1860_v9 = vmul.f32 %v6023_v62, %v1712_v21  ;;  %v1861_v16 = vmul.f32 %v4211_v61, %v1712_v21  ;;  %v1862_v25 = vmul.f32 %v6024_v14, %v1712_v21  ;;  %v2329_v24 = vpop.f32.mrb[26].mxu1  ;;  %v2554_v13 = vpop.f32.mrb[26].mxu0 }
 0x22d   : > { %v2330_v27 = vadd.f32 %v5373_v47, %v2329_v24  ;;  %v2331_v21 = vpop.f32.mrb[27].mxu1  ;;  %v2556_v53 = vpop.f32.mrb[27].mxu0 }
 0x22e   : > { %v1988_v11 = vadd.f32 %v1860_v9, %v1581_v51  ;;  %v1990_v57 = vadd.f32 %v1862_v25, %v1583_v49  ;;  %v1987_v0 = vadd.f32 %v1859_v59, %v1580_v35  ;;  %v1989_v54 = vadd.f32 %v1861_v16, %v1582_v18 }
 0x22f   : > { %v2555_v63 = vadd.f32 %v2554_v13, %v2330_v27  ;;  %v1180_v35 = vadd.f32 %v1052_v31, %v773_v20  ;;  %v646_v59 = vmul.f32 %v4170_v37, %v5405_v41  ;;  %v647_v9 = vmul.f32 %v4160_v33, %v5405_v41 }
 0x230   : > { %v1309_v39 = vpop.permute.xlu1 %1308  ;;  %v2116_v52 = vmax.f32 %v1988_v11, 0.0  ;;  %v2118_v45 = vmax.f32 %v1990_v57, 0.0  ;;  %v2115_v8 = vmax.f32 %v1987_v0, 0.0  ;;  %v2117_v1 = vmax.f32 %v1989_v54, 0.0 }
 0x231   : > { %v1456_v23 = vmul.f32 %v6006_v29, %v1309_v39  ;;  %v1457_v51 = vmul.f32 %v5998_v46, %v1309_v39  ;;  %v1458_v49 = vmul.f32 %v6009_v30, %v1309_v39  ;;  %v1459_v18 = vmul.f32 %v4225_v15, %v1309_v39 }
 0x232   : > { %2407 = vmatprep.mubr.f32.mxu1 %v2116_v52  ;;  %2632 = vmatprep.mubr.f32.mxu0 %v2118_v45  ;;  %v5459_v32 = vsel %vm2728_vm15, %v2555_v63, -inf  ;;  %v649_v39 = vmul.f32 %v4162_v34, %v5405_v41  ;;  %v648_v16 = vmul.f32 %v4172_v38, %v5405_v41  ;;  %v2664_v25 = vadd.s32 112, %v6050_v19 }
 0x233   : > { %2408 = vmatmul.mubr.f32.gmra.mrb[58].mxu1 %v2115_v8  ;;  %2633 = vmatmul.mubr.f32.gmra.mrb[58].mxu0 %v2117_v1  ;;  %v1585_v13 = vadd.f32 %v1457_v51, %v1178_v28  ;;  %v1584_v58 = vadd.f32 %v1456_v23, %v1177_v6  ;;  %v1586_v50 = vadd.f32 %v1458_v49, %v1179_v42 }
 0x234   : > { %2857 = vst.msk [vmem:[%s3750_s10 + $0x68] sm:$0xff] %vm2843_vm2, %v5459_v32  ;;  %v1587_v52 = vadd.f32 %v1459_v18, %v1180_v35  ;;  %v774_v33 = vadd.f32 %v646_v59, %v6028_v17  ;;  %v775_v20 = vadd.f32 %v647_v9, %v6025_v26  ;;  %v777_v34 = vadd.f32 %v649_v39, %v6026_v43 }
 0x235   : > { %v906_v63 = vpop.permute.xlu1 %905  ;;  %v1992_v12 = vadd.f32 %v1864_v40, %v1585_v13  ;;  %v1991_v8 = vadd.f32 %v1863_v5, %v1584_v58  ;;  %v1993_v44 = vadd.f32 %v1865_v56, %v1586_v50  ;;  %v776_v41 = vadd.f32 %v648_v16, %v6054_v7 }
 0x236   : > { %v1994_v22 = vadd.f32 %v1866_v55, %v1587_v52  ;;  %v1053_v31 = vmul.f32 %v5999_v36, %v906_v63  ;;  %v1054_v5 = vmul.f32 %v6015_v4, %v906_v63  ;;  %v1056_v40 = vmul.f32 %v6018_v3, %v906_v63 }
 0x237   : > { %v2120_v37 = vmax.f32 %v1992_v12, 0.0  ;;  %v2119_v2 = vmax.f32 %v1991_v8, 0.0  ;;  %v2121_v24 = vmax.f32 %v1993_v44, 0.0  ;;  %v1055_v56 = vmul.f32 %v6016_v48, %v906_v63 }
 0x238   : > { %v2122_v38 = vmax.f32 %v1994_v22, 0.0  ;;  %v2697_v17 = vadd.s32 %v4966_v10, %v2664_v25  ;;  %v1181_v4 = vadd.f32 %v1053_v31, %v774_v33  ;;  %v1182_v57 = vadd.f32 %v1054_v5, %v775_v20 }
 0x239   : > { %2412 = vmatprep.mubr.f32.mxu1 %v2120_v37  ;;  %v1184_v0 = vadd.f32 %v1056_v40, %v777_v34  ;;  %v1183_v28 = vadd.f32 %v1055_v56, %v776_v41  ;;  %v2666_v8 = vadd.s32 128, %v6050_v19  ;;  %v2667_v31 = vadd.s32 136, %v6050_v19 }
 0x23a   : > { %v1313_v11 = vpop.permute.xlu1 %1312  ;;  %2413 = vmatmul.mubr.f32.gmra.mrb[60].mxu1 %v2119_v2  ;;  %2637 = vmatprep.mubr.f32.mxu0 %v2122_v38  ;;  %vm2729_vm0 = vcmp.lt.s32.totalorder %v2697_v17, 1000  ;;  %v2668_v41 = vadd.s32 144, %v6050_v19 }
 0x23b   : > { %v1460_v36 = vmul.f32 %v6006_v29, %v1313_v11  ;;  %v1461_v26 = vmul.f32 %v5998_v46, %v1313_v11  ;;  %v1463_v43 = vmul.f32 %v4225_v15, %v1313_v11  ;;  %2638 = vmatmul.mubr.f32.gmra.mrb[60].mxu0 %v2121_v24  ;;  %v2334_v3 = vpop.f32.mrb[28].mxu1  ;;  %v1462_v7 = vmul.f32 %v6009_v30, %v1313_v11  ;;  %v2559_v54 = vpop.f32.mrb[28].mxu0 }
 0x23c   : > { %v2335_v48 = vadd.f32 %v5373_v47, %v2334_v3  ;;  %v2336_v6 = vpop.f32.mrb[29].mxu1  ;;  %v2561_v42 = vpop.f32.mrb[29].mxu0  ;;  %v2665_v29 = vadd.s32 120, %v6050_v19  ;;  %v2699_v44 = vadd.s32 %v4966_v10, %v2666_v8  ;;  %v2700_v24 = vadd.s32 %v4966_v10, %v2667_v31 }
 0x23d   : > { %v1589_v15 = vadd.f32 %v1461_v26, %v1182_v57  ;;  %v1591_v21 = vadd.f32 %v1463_v43, %v1184_v0  ;;  %v1588_v53 = vadd.f32 %v1460_v36, %v1181_v4  ;;  %v1590_v49 = vadd.f32 %v1462_v7, %v1183_v28 }
 0x23e   : > { %v2560_v46 = vadd.f32 %v2559_v54, %v2335_v48  ;;  %v2698_v35 = vadd.s32 %v4966_v10, %v2665_v29  ;;  %vm2731_vm3 = vcmp.lt.s32.totalorder %v2699_v44, 1000  ;;  %vm2732_vm4 = vcmp.lt.s32.totalorder %v2700_v24, 1000 }
 0x23f   : > { %v1720_v27 = vpop.permute.xlu1 %1719  ;;  %v2701_v36 = vadd.s32 %v4966_v10, %v2668_v41  ;;  %v2669_v48 = vadd.s32 152, %v6050_v19 }
 0x240   : > { %v1867_v45 = vmul.f32 %v4209_v60, %v1720_v27  ;;  %v1868_v1 = vmul.f32 %v6023_v62, %v1720_v27  ;;  %v1869_v30 = vmul.f32 %v4211_v61, %v1720_v27  ;;  %v1870_v23 = vmul.f32 %v6024_v14, %v1720_v27 }
 0x241   : > { %v5492_v51 = vsel %vm2729_vm0, %v2560_v46, -inf  ;;  %vm2730_vm1 = vcmp.lt.s32.totalorder %v2698_v35, 1000  ;;  %vm2733_vm5 = vcmp.lt.s32.totalorder %v2701_v36, 1000  ;;  %v2702_v54 = vadd.s32 %v4966_v10, %v2669_v48 }
 0x242   : > { %2858 = vst.msk [vmem:[%s3750_s10 + $0x70] sm:$0xff] %vm2843_vm2, %v5492_v51  ;;  %v1996_v18 = vadd.f32 %v1868_v1, %v1589_v15  ;;  %v1998_v55 = vadd.f32 %v1870_v23, %v1591_v21  ;;  %v1995_v13 = vadd.f32 %v1867_v45, %v1588_v53  ;;  %v1997_v58 = vadd.f32 %v1869_v30, %v1590_v49 }
 0x243   : > { %v2339_v50 = vpop.f32.mrb[30].mxu1  ;;  %v2564_v60 = vpop.f32.mrb[30].mxu0  ;;  %vm2734_vm6 = vcmp.lt.s32.totalorder %v2702_v54, 1000  ;;  %v2670_v21 = vadd.s32 160, %v6050_v19 }
 0x244   : > { %v2124_v62 = vmax.f32 %v1996_v18, 0.0  ;;  %v2126_v59 = vmax.f32 %v1998_v55, 0.0  ;;  %v2123_v61 = vmax.f32 %v1995_v13, 0.0  ;;  %v2340_v14 = vadd.f32 %v5373_v47, %v2339_v50  ;;  %v2341_v9 = vpop.f32.mrb[31].mxu1  ;;  %v2566_v52 = vpop.f32.mrb[31].mxu0 }
 0x245   : > { %v2125_v39 = vmax.f32 %v1997_v58, 0.0  ;;  %v2703_v53 = vadd.s32 %v4966_v10, %v2670_v21  ;;  %v2671_v55 = vadd.s32 168, %v6050_v19  ;;  %v2672_v9 = vadd.s32 176, %v6050_v19 }
 0x246   : > { %2417 = vmatprep.mubr.f32.mxu1 %v2124_v62  ;;  %2642 = vmatprep.mubr.f32.mxu0 %v2126_v59  ;;  %v2565_v63 = vadd.f32 %v2564_v60, %v2340_v14 }
 0x247   : > { %2418 = vmatmul.mubr.f32.gmra.mrb[62].mxu1 %v2123_v61  ;;  %2643 = vmatmul.mubr.f32.gmra.mrb[62].mxu0 %v2125_v39  ;;  %vm2735_vm7 = vcmp.lt.s32.totalorder %v2703_v53, 1000  ;;  %v2704_v13 = vadd.s32 %v4966_v10, %v2671_v55  ;;  %v2705_v52 = vadd.s32 %v4966_v10, %v2672_v9 }
 0x248   : > { %v5499_v12 = vsel %vm2730_vm1, %v2565_v63, -inf }
 0x249   : > { %2859 = vst.msk [vmem:[%s3750_s10 + $0x78] sm:$0xff] %vm2843_vm2, %v5499_v12  ;;  %vm2736_vm8 = vcmp.lt.s32.totalorder %v2704_v13, 1000  ;;  %vm2737_vm9 = vcmp.lt.s32.totalorder %v2705_v52, 1000  ;;  %v6075_v52 = vld [vmem:[#allocation19_spill] sm:$0xff] }
 0x255   : > { %v2344_v16 = vpop.f32.mrb[32].mxu1 }
 0x256   : > { %v2345_v25 = vadd.f32 %v5373_v47, %v2344_v16  ;;  %v2569_v37 = vpop.f32.mrb[32].mxu0  ;;  %v2346_v22 = vpop.f32.mrb[33].mxu1 }
 0x257   : > { %v2571_v2 = vpop.f32.mrb[33].mxu0  ;;  %v2673_v22 = vadd.s32 184, %v6050_v19 }
 0x258   : > { %v2570_v33 = vadd.f32 %v2569_v37, %v2345_v25 }
 0x259   : > { %v2706_v2 = vadd.s32 %v4966_v10, %v2673_v22 }
 0x25a   : > { %v5507_v20 = vsel %vm2731_vm3, %v2570_v33, -inf }
 0x25b   : > { %2860 = vst.msk [vmem:[%s3750_s10 + $0x80] sm:$0xff] %vm2843_vm2, %v5507_v20  ;;  %vm2738_vm10 = vcmp.lt.s32.totalorder %v2706_v2, 1000 }
 0x265   : > { %v2349_v34 = vpop.f32.mrb[34].mxu1 }
 0x266   : > { %v2350_v5 = vadd.f32 %v5373_v47, %v2349_v34  ;;  %v2574_v40 = vpop.f32.mrb[34].mxu0  ;;  %v2351_v38 = vpop.f32.mrb[35].mxu1 }
 0x267   : > { %v2576_v56 = vpop.f32.mrb[35].mxu0 }
 0x268   : > { %v2575_v11 = vadd.f32 %v2574_v40, %v2350_v5  ;;  %v2674_v5 = vadd.s32 192, %v6050_v19 }
 0x26a   : > { %v5516_v17 = vsel %vm2732_vm4, %v2575_v11, -inf  ;;  %v2707_v56 = vadd.s32 %v4966_v10, %v2674_v5  ;;  %v6077_v5 = vld [vmem:[#allocation9_spill] sm:$0xff]  ;;  %vm3124_vm4 = vcmask 8192  }
 0x26b   : > { %2861 = vst.msk [vmem:[%s3750_s10 + $0x88] sm:$0xff] %vm2843_vm2, %v5516_v17 }
 0x26c   : > { %v2354_v26 = vpop.f32.mrb[36].mxu1  ;;  %vm2739_vm11 = vcmp.lt.s32.totalorder %v2707_v56, 1000 }
 0x26d   : > { %v2355_v43 = vadd.f32 %v5373_v47, %v2354_v26  ;;  %v2579_v4 = vpop.f32.mrb[36].mxu0  ;;  %v2356_v3 = vpop.f32.mrb[37].mxu1 }
 0x26e   : > { %v2581_v57 = vpop.f32.mrb[37].mxu0 }
 0x26f   : > { %v2580_v0 = vadd.f32 %v2579_v4, %v2355_v43 }
 0x271   : > { %v5523_v7 = vsel %vm2733_vm5, %v2580_v0, -inf  ;;  %v2675_v0 = vadd.s32 200, %v6050_v19 }
 0x272   : > { %2862 = vst.msk [vmem:[%s3750_s10 + $0x90] sm:$0xff] %vm2843_vm2, %v5523_v7 }
 0x273   : > { %v2708_v48 = vadd.s32 %v4966_v10, %v2675_v0 }
 0x275   : > { %vm2740_vm12 = vcmp.lt.s32.totalorder %v2708_v48, 1000 }
 0x27f   : > { %v2359_v6 = vpop.f32.mrb[38].mxu1 }
 0x280   : > { %v2584_v28 = vpop.f32.mrb[38].mxu0  ;;  %v2360_v42 = vadd.f32 %v5373_v47, %v2359_v6  ;;  %v2361_v29 = vpop.f32.mrb[39].mxu1 }
 0x281   : > { %v2586_v46 = vpop.f32.mrb[39].mxu0 }
 0x282   : > { %v2585_v27 = vadd.f32 %v2584_v28, %v2360_v42 }
 0x284   : > { %v5531_v15 = vsel %vm2734_vm6, %v2585_v27, -inf  ;;  %v6069_v27 = vld [vmem:[#allocation30_spill] sm:$0xff] }
 0x285   : > { %2863 = vst.msk [vmem:[%s3750_s10 + $0x98] sm:$0xff] %vm2843_vm2, %v5531_v15  ;;  %v2878_v21 = vsel %vm2843_vm2, %v6069_v27, -inf }
 0x28d   : > { %v2364_v45 = vpop.f32.mrb[40].mxu1 }
 0x28e   : > { %v2365_v1 = vadd.f32 %v5373_v47, %v2364_v45  ;;  %v2589_v30 = vpop.f32.mrb[40].mxu0  ;;  %v2366_v23 = vpop.f32.mrb[41].mxu1  ;;  %v6070_v45 = vld [vmem:[#allocation23_spill] sm:$0xff] }
 0x28f   : > { %v2591_v49 = vpop.f32.mrb[41].mxu0 }
 0x290   : > { %v2590_v35 = vadd.f32 %v2589_v30, %v2365_v1  ;;  %v2877_v1 = vsel %vm2843_vm2, %v6070_v45, -inf  ;;  %v6071_v30 = vld [vmem:[#allocation36_spill] sm:$0xff] }
 0x291   : > { %v2879_v23 = vsel %vm2843_vm2, %v6071_v30, -inf  ;;  %v2882_v49 = vmax.f32 %v2877_v1, %v2878_v21  ;;  %v6081_v1 = vld [vmem:[#allocation35_spill] sm:$0xff] }
 0x292   : > { %v5539_v18 = vsel %vm2735_vm7, %v2590_v35, -inf  ;;  %v6072_v35 = vld [vmem:[#allocation25_spill] sm:$0xff] }
 0x293   : > { %2864 = vst.msk [vmem:[%s3750_s10 + $0xa0] sm:$0xff] %vm2843_vm2, %v5539_v18  ;;  %v2880_v55 = vsel %vm2843_vm2, %v6072_v35, -inf  ;;  %v2884_v13 = vmax.f32 %v2879_v23, %v2882_v49  ;;  %v2897_v23 = vsel %vm2843_vm2, %v6081_v1, -inf }
 0x296   : > { %v2369_v58 = vpop.f32.mrb[42].mxu1  ;;  %v2594_v50 = vpop.f32.mrb[42].mxu0 }
 0x297   : > { %v2370_v60 = vadd.f32 %v5373_v47, %v2369_v58  ;;  %v2371_v62 = vpop.f32.mrb[43].mxu1  ;;  %v2596_v59 = vpop.f32.mrb[43].mxu0  ;;  %v6073_v58 = vld [vmem:[#allocation26_spill] sm:$0xff] }
 0x298   : > { %v2886_v62 = vmax.f32 %v2880_v55, %v2884_v13  ;;  %v6074_v59 = vld [vmem:[#allocation18_spill] sm:$0xff] }
 0x299   : > { %v2595_v61 = vadd.f32 %v2594_v50, %v2370_v60  ;;  %v2881_v50 = vsel %vm2843_vm2, %v6073_v58, -inf  ;;  %v2676_v60 = vadd.s32 208, %v6050_v19 }
 0x29a   : > { %v2888_v9 = vmax.f32 %v2881_v50, %v2886_v62  ;;  %v2899_v50 = vsel %vm2843_vm2, %v5459_v32, -inf }
 0x29b   : > { %v5547_v14 = vsel %vm2736_vm8, %v2595_v61, -inf  ;;  %v2883_v61 = vsel %vm2843_vm2, %v6074_v59, -inf }
 0x29c   : > { %2865 = vst.msk [vmem:[%s3750_s10 + $0xa8] sm:$0xff] %vm2843_vm2, %v5547_v14 }
 0x2a6   : > { %v2374_v39 = vpop.f32.mrb[44].mxu1  ;;  %v2599_v8 = vpop.f32.mrb[44].mxu0 }
 0x2a7   : > { %v2375_v63 = vadd.f32 %v5373_v47, %v2374_v39  ;;  %v2376_v44 = vpop.f32.mrb[45].mxu1  ;;  %v2601_v16 = vpop.f32.mrb[45].mxu0  ;;  %v2885_v39 = vsel %vm2843_vm2, %v6075_v52, -inf }
 0x2a8   : > { %v6076_v44 = vld [vmem:[#allocation16_spill] sm:$0xff] }
 0x2a9   : > { %v2600_v25 = vadd.f32 %v2599_v8, %v2375_v63  ;;  %v2709_v63 = vadd.s32 %v4966_v10, %v2676_v60  ;;  %v2890_v8 = vmax.f32 %v2883_v61, %v2888_v9  ;;  %v2887_v16 = vsel %vm2843_vm2, %v6076_v44, -inf }
 0x2aa   : > { %v2901_v61 = vsel %vm2843_vm2, %v5492_v51, -inf }
 0x2ab   : > { %v5555_v37 = vsel %vm2737_vm9, %v2600_v25, -inf  ;;  %v2892_v2 = vmax.f32 %v2885_v39, %v2890_v8  ;;  %vm2741_vm13 = vcmp.lt.s32.totalorder %v2709_v63, 1000  ;;  %v2903_v39 = vsel %vm2843_vm2, %v5499_v12, -inf }
 0x2ac   : > { %2866 = vst.msk [vmem:[%s3750_s10 + $0xb0] sm:$0xff] %vm2843_vm2, %v5555_v37  ;;  %v2905_v8 = vsel %vm2843_vm2, %v5507_v20, -inf }
 0x2b5   : > { %v2379_v33 = vpop.f32.mrb[46].mxu1 }
 0x2b6   : > { %v2380_v31 = vadd.f32 %v5373_v47, %v2379_v33  ;;  %v2604_v24 = vpop.f32.mrb[46].mxu0  ;;  %v2381_v34 = vpop.f32.mrb[47].mxu1 }
 0x2b7   : > { %v2606_v40 = vpop.f32.mrb[47].mxu0  ;;  %v2677_v34 = vadd.s32 216, %v6050_v19 }
 0x2b8   : > { %v2605_v38 = vadd.f32 %v2604_v24, %v2380_v31  ;;  %v2889_v40 = vsel %vm2843_vm2, %v6077_v5, -inf }
 0x2ba   : > { %v5564_v41 = vsel %vm2738_vm10, %v2605_v38, -inf  ;;  %v2894_v38 = vmax.f32 %v2887_v16, %v2892_v2 }
 0x2bb   : > { %2867 = vst.msk [vmem:[%s3750_s10 + $0xb8] sm:$0xff] %vm2843_vm2, %v5564_v41 }
 0x2bc   : > { %v2384_v11 = vpop.f32.mrb[48].mxu1  ;;  %v2609_v26 = vpop.f32.mrb[48].mxu0 }
 0x2bd   : > { %v2385_v36 = vadd.f32 %v5373_v47, %v2384_v11  ;;  %v2386_v43 = vpop.f32.mrb[49].mxu1  ;;  %v2611_v4 = vpop.f32.mrb[49].mxu0  ;;  %v6078_v11 = vld [vmem:[#allocation15_spill] sm:$0xff] }
 0x2be   : > { %v2710_v4 = vadd.s32 %v4966_v10, %v2677_v34  ;;  %v2911_v34 = vsel %vm2843_vm2, %v5531_v15, -inf }
 0x2bf   : > { %v2610_v3 = vadd.f32 %v2609_v26, %v2385_v36  ;;  %v2891_v36 = vsel %vm2843_vm2, %v6078_v11, -inf  ;;  %v2896_v26 = vmax.f32 %v2889_v40, %v2894_v38 }
 0x2c0   : > { %vm2742_vm14 = vcmp.lt.s32.totalorder %v2710_v4, 1000 }
 0x2c1   : > { %v5571_v57 = vsel %vm2739_vm11, %v2610_v3, -inf  ;;  %v6079_v3 = vld [vmem:[#allocation8_spill] sm:$0xff]  ;;  %v2898_v48 = vmax.f32 %v2891_v36, %v2896_v26 }
 0x2c2   : > { %2868 = vst.msk [vmem:[%s3750_s10 + $0xc0] sm:$0xff] %vm2843_vm2, %v5571_v57  ;;  %v2893_v0 = vsel %vm2843_vm2, %v6079_v3, -inf }
 0x2ce   : > { %v2389_v54 = vpop.f32.mrb[50].mxu1  ;;  %v2614_v28 = vpop.f32.mrb[50].mxu0 }
 0x2cf   : > { %v2390_v6 = vadd.f32 %v5373_v47, %v2389_v54  ;;  %v2391_v42 = vpop.f32.mrb[51].mxu1  ;;  %v2616_v29 = vpop.f32.mrb[51].mxu0 }
 0x2d1   : > { %v2615_v46 = vadd.f32 %v2614_v28, %v2390_v6  ;;  %v6080_v6 = vld [vmem:[#allocation34_spill] sm:$0xff] }
 0x2d2   : > { %v2895_v28 = vsel %vm2843_vm2, %v6080_v6, -inf }
 0x2d3   : > { %v5581_v53 = vsel %vm2740_vm12, %v2615_v46, -inf  ;;  %v2900_v46 = vmax.f32 %v2893_v0, %v2898_v48 }
 0x2d4   : > { %2869 = vst.msk [vmem:[%s3750_s10 + $0xc8] sm:$0xff] %vm2843_vm2, %v5581_v53 }
 0x2d5   : > { %v2902_v13 = vmax.f32 %v2895_v28, %v2900_v46 }
 0x2d7   : > { %v2904_v62 = vmax.f32 %v2897_v23, %v2902_v13  ;;  %v2919_v23 = vsel %vm2843_vm2, %v5564_v41, -inf  ;;  %v2679_v13 = vadd.s32 232, %v6050_v19 }
 0x2d9   : > { %v2906_v9 = vmax.f32 %v2899_v50, %v2904_v62  ;;  %v2923_v62 = vsel %vm2843_vm2, %v5581_v53, -inf }
 0x2db   : > { %v2908_v63 = vmax.f32 %v2901_v61, %v2906_v9 }
 0x2dd   : > { %v2394_v25 = vpop.f32.mrb[52].mxu1  ;;  %v2619_v22 = vpop.f32.mrb[52].mxu0  ;;  %v2910_v16 = vmax.f32 %v2903_v39, %v2908_v63  ;;  %v2712_v39 = vadd.s32 %v4966_v10, %v2679_v13  ;;  %v2681_v13 = vadd.s32 248, %v6050_v19 }
 0x2de   : > { %v2395_v33 = vadd.f32 %v5373_v47, %v2394_v25  ;;  %v2396_v31 = vpop.f32.mrb[53].mxu1  ;;  %v2621_v24 = vpop.f32.mrb[53].mxu0  ;;  %v2678_v25 = vadd.s32 224, %v6050_v19 }
 0x2df   : > { %v2912_v2 = vmax.f32 %v2905_v8, %v2910_v16  ;;  %vm2744_vm0 = vcmp.lt.s32.totalorder %v2712_v39, 1000 }
 0x2e0   : > { %v2620_v56 = vadd.f32 %v2619_v22, %v2395_v33  ;;  %v2907_v22 = vsel %vm2843_vm2, %v5516_v17, -inf  ;;  %v2909_v33 = vsel %vm2843_vm2, %v5523_v7, -inf  ;;  %v2711_v24 = vadd.s32 %v4966_v10, %v2678_v25 }
 0x2e1   : > { %v2914_v31 = vmax.f32 %v2907_v22, %v2912_v2 }
 0x2e2   : > { %v5608_v43 = vsel %vm2741_vm13, %v2620_v56, -inf  ;;  %v2913_v56 = vsel %vm2843_vm2, %v5539_v18, -inf  ;;  %vm2743_vm15 = vcmp.lt.s32.totalorder %v2711_v24, 1000  ;;  %v2680_v24 = vadd.s32 240, %v6050_v19 }
 0x2e3   : > { %2870 = vst.msk [vmem:[%s3750_s10 + $0xd0] sm:$0xff] %vm2843_vm2, %v5608_v43  ;;  %v2916_v40 = vmax.f32 %v2909_v33, %v2914_v31  ;;  %v2925_v9 = vsel %vm2843_vm2, %v5608_v43, -inf }
 0x2e4   : > { %v2399_v54 = vpop.f32.mrb[54].mxu1 }
 0x2e5   : > { %v2400_v42 = vadd.f32 %v5373_v47, %v2399_v54  ;;  %v2401_v29 = vpop.f32.mrb[55].mxu1  ;;  %v2624_v21 = vpop.f32.mrb[54].mxu0  ;;  %v2918_v0 = vmax.f32 %v2911_v34, %v2916_v40  ;;  %v2915_v54 = vsel %vm2843_vm2, %v5547_v14, -inf }
 0x2e6   : > { %v2626_v55 = vpop.f32.mrb[55].mxu0  ;;  %v2917_v29 = vsel %vm2843_vm2, %v5555_v37, -inf }
 0x2e7   : > { %v2625_v49 = vadd.f32 %v2624_v21, %v2400_v42  ;;  %v2920_v42 = vmax.f32 %v2913_v56, %v2918_v0  ;;  %v2921_v55 = vsel %vm2843_vm2, %v5571_v57, -inf }
 0x2e9   : > { %v5623_v60 = vsel %vm2742_vm14, %v2625_v49, -inf  ;;  %v2922_v21 = vmax.f32 %v2915_v54, %v2920_v42 }
 0x2ea   : > { %2871 = vst.msk [vmem:[%s3750_s10 + $0xd8] sm:$0xff] %vm2843_vm2, %v5623_v60  ;;  %v2927_v8 = vsel %vm2843_vm2, %v5623_v60, -inf }
 0x2eb   : > { %v2924_v49 = vmax.f32 %v2917_v29, %v2922_v21 }
 0x2ed   : > { %v2926_v50 = vmax.f32 %v2919_v23, %v2924_v49 }
 0x2ef   : > { %v2928_v61 = vmax.f32 %v2921_v55, %v2926_v50  ;;  %v2714_v50 = vadd.s32 %v4966_v10, %v2681_v13 }
 0x2f1   : > { %v2930_v63 = vmax.f32 %v2923_v62, %v2928_v61  ;;  %vm2746_vm3 = vcmp.lt.s32.totalorder %v2714_v50, 1000 }
 0x2f3   : > { %v2932_v22 = vmax.f32 %v2925_v9, %v2930_v63 }
 0x2f5   : > { %v2937_v40 = vmax.f32 %v2927_v8, %v2932_v22 }
 0x2f7   : > { %v2404_v38 = vpop.f32.mrb[56].mxu1  ;;  %v2629_v26 = vpop.f32.mrb[56].mxu0 }
 0x2f8   : > { %v2405_v36 = vadd.f32 %v5373_v47, %v2404_v38  ;;  %v2406_v4 = vpop.f32.mrb[57].mxu1  ;;  %v2631_v48 = vpop.f32.mrb[57].mxu0 }
 0x2fa   : > { %v2630_v28 = vadd.f32 %v2629_v26, %v2405_v36  ;;  %v2713_v26 = vadd.s32 %v4966_v10, %v2680_v24 }
 0x2fc   : > { %v5649_v46 = vsel %vm2743_vm15, %v2630_v28, -inf  ;;  %vm2745_vm1 = vcmp.lt.s32.totalorder %v2713_v26, 1000 }
 0x2fd   : > { %2872 = vst.msk [vmem:[%s3750_s10 + $0xe0] sm:$0xff] %vm2843_vm2, %v5649_v46  ;;  %v2929_v34 = vsel %vm2843_vm2, %v5649_v46, -inf }
 0x2fe   : > { %v2934_v56 = vmax.f32 %v2929_v34, %v2937_v40  ;;  %v6082_v40 = vld [vmem:[#allocation14_spill] sm:$0xff] }
 0x306   : > { %v2409_v16 = vpop.f32.mrb[58].mxu1  ;;  %v2634_v25 = vpop.f32.mrb[58].mxu0 }
 0x307   : > { %v2410_v2 = vadd.f32 %v5373_v47, %v2409_v16  ;;  %v2411_v33 = vpop.f32.mrb[59].mxu1  ;;  %v2636_v31 = vpop.f32.mrb[59].mxu0 }
 0x308   : > { %v5696_v31 = vld [vmem:[#allocation2] sm:$0x1] }
 0x309   : > { %v2635_v38 = vadd.f32 %v2634_v25, %v2410_v2 }
 0x30b   : > { %v5670_v36 = vsel %vm2744_vm0, %v2635_v38, -inf }
 0x30c   : > { %2873 = vst.msk [vmem:[%s3750_s10 + $0xe8] sm:$0xff] %vm2843_vm2, %v5670_v36  ;;  %v2931_v4 = vsel %vm2843_vm2, %v5670_v36, -inf }
 0x30d   : > { %v2936_v0 = vmax.f32 %v2931_v4, %v2934_v56  ;;  %v2414_v48 = vpop.f32.mrb[60].mxu1 }
 0x30e   : > { %v2415_v54 = vadd.f32 %v5373_v47, %v2414_v48  ;;  %v2416_v28 = vpop.f32.mrb[61].mxu1  ;;  %v2639_v42 = vpop.f32.mrb[60].mxu0 }
 0x30f   : > { %v2641_v21 = vpop.f32.mrb[61].mxu0 }
 0x310   : > { %v2640_v29 = vadd.f32 %v2639_v42, %v2415_v54 }
 0x312   : > { %v5679_v23 = vsel %vm2745_vm1, %v2640_v29, -inf }
 0x313   : > { %2874 = vst.msk [vmem:[%s3750_s10 + $0xf0] sm:$0xff] %vm2843_vm2, %v5679_v23  ;;  %v2933_v49 = vsel %vm2843_vm2, %v5679_v23, -inf }
 0x314   : > { %v2938_v55 = vmax.f32 %v2933_v49, %v2936_v0 }
 0x31a   : > { %v2419_v62 = vpop.f32.mrb[62].mxu1  ;;  %v2644_v61 = vpop.f32.mrb[62].mxu0 }
 0x31b   : > { %v2420_v9 = vadd.f32 %v5373_v47, %v2419_v62  ;;  %v2421_v39 = vpop.f32.mrb[63].mxu1  ;;  %v2646_v63 = vpop.f32.mrb[63].mxu0 }
 0x31d   : > { %v2645_v8 = vadd.f32 %v2644_v61, %v2420_v9 }
 0x31f   : > { %v5689_v16 = vsel %vm2746_vm3, %v2645_v8, -inf }
 0x320   : > { %2875 = vst.msk [vmem:[%s3750_s10 + $0xf8] sm:$0xff] %vm2843_vm2, %v5689_v16  ;;  %v2935_v25 = vsel %vm2843_vm2, %v5689_v16, -inf  ;;  %s3614_s10 = scalar_lea.vmem %s3144_s21, 16 }
 0x321   : > { %v2939_v19 = vmax.f32 %v2935_v25, %v2938_v55  ;;  %p3615_p6 = scmp.ne.s32.totalorder %s3144_s21, %s3614_s10  ;;  %p3622_p10 = scmp.lt.s32.totalorder %s3620_s22, %s3614_s10 }
 0x323   : > { %v2940_v22 = vrot.slane %v2939_v19, 4  ;;  %p3616_p7 = pnand %p3615_p6, %p3418_p5  ;;  %p3623_p11 = por %p3622_p10, %p3621_p9 }
 0x325   : > { %v2941_v10 = vmax.f32 %v2939_v19, %v2940_v22  ;;  %p3617_p8 = pneg %p3616_p7 }
 0x327   : > { %v2942_v2 = vrot.slane %v2941_v10, 2  ;;  %p3624_p12 = pnand %p3623_p11, %p3617_p8 }
 0x329   : > { %v2943_v33 = vmax.f32 %v2941_v10, %v2942_v2 }
 0x32b   : > { %v2944_v47 = vrot.slane %v2943_v33, 1 }
 0x32d   : > { %v2945_v24 = vmax.f32 %v2943_v33, %v2944_v47 }
 0x32f   : > { %v5700_v34 = vmax.f32 %v5696_v31, %v2945_v24 }
 0x331   : > { %v5704_v38 = vrot.slane %v5700_v34, %v6082_v40  ;;  %v2948_v56 = vsub.f32 %v5696_v31, %v5700_v34  ;;  %3126 = vst.msk [vmem:[#allocation2] sm:$0x1] %vm3124_vm4, %v5700_v34 }
 0x332   : > { %3627 = shalt.err (!%p3624_p12)
}
 0x333   : > { %s3628_s27 = scalar_lea.hbm %s5875_s6, 16 }
 0x334   : > { %p3629_p13 = scmp.ne.s32.totalorder %s5875_s6, %s3628_s27  ;;  %p3634_p2 = scmp.lt.u32.totalorder %s3628_s27, %s5875_s6 }
 0x336   : > { %p3630_p0 = pnand %p3629_p13, %p3418_p5 }
 0x338   : > { %p3631_p1 = pneg %p3630_p0 }
 0x33a   : > { %p3636_p3 = pnand %p3634_p2, %p3631_p1 }
 0x33c   : > { %3639 = shalt.err (!%p3636_p3)
}
 0x33d   : > { %3411 = dma.vmem_to_hbm [thread:$0]  (%p3418_p5), %s3144_s21, 16, %s5875_s6, [#allocation3]   ;;  %v2989_v26 = vsub.f32 %v5689_v16, %v5704_v38  ;;  %v2958_v4 = vsub.f32 %v6070_v45, %v5704_v38  ;;  %v2959_v0 = vsub.f32 %v6069_v27, %v5704_v38  ;;  %v2960_v48 = vsub.f32 %v6071_v30, %v5704_v38 }
 0x33e   : > { %v2961_v54 = vsub.f32 %v6072_v35, %v5704_v38  ;;  %v2962_v28 = vsub.f32 %v6073_v58, %v5704_v38  ;;  %v2986_v42 = vsub.f32 %v5649_v46, %v5704_v38  ;;  %v2987_v29 = vsub.f32 %v5670_v36, %v5704_v38  ;;  %s3690_s13 = smov [#allocation4]  }
 0x33f   : > { %v2988_v45 = vsub.f32 %v5679_v23, %v5704_v38  ;;  %v2990_v21 = vmul.f32 1.442695, %v2958_v4  ;;  %v2992_v27 = vmul.f32 1.442695, %v2959_v0  ;;  %v2963_v30 = vsub.f32 %v6074_v59, %v5704_v38  ;;  %s3154_s14 = sshll.u32 %s3690_s13, 4  ;;  %s3155_s14 = int_to_ptr.vmem [resolvable:$true] %s3154_s14 }
 0x340   : > { %v2994_v49 = vmul.f32 1.442695, %v2960_v48  ;;  %v2996_v55 = vmul.f32 1.442695, %v2961_v54  ;;  %v2964_v35 = vsub.f32 %v6075_v52, %v5704_v38  ;;  %v2998_v58 = vmul.f32 1.442695, %v2962_v28  ;;  %p3647_p8 = scmp.lt.s32.totalorder %s3155_s14, %s3155_s14 }
 0x341   : > { %3534 = vpow2.f32 %v2990_v21  ;;  %v2965_v13 = vsub.f32 %v6076_v44, %v5704_v38  ;;  %v3000_v50 = vmul.f32 1.442695, %v2963_v30  ;;  %v2966_v62 = vsub.f32 %v6077_v5, %v5704_v38  ;;  %s3640_s15 = scalar_lea.vmem %s3155_s14, 16  ;;  %s3646_s16 = scalar_lea.vmem %s3155_s14, 32 }
 0x342   : > { %3536 = vpow2.f32 %v2992_v27  ;;  %v3002_v61 = vmul.f32 1.442695, %v2964_v35  ;;  %v2967_v59 = vsub.f32 %v6078_v11, %v5704_v38  ;;  %v2968_v52 = vsub.f32 %v6079_v3, %v5704_v38  ;;  %p3641_p4 = scmp.ne.s32.totalorder %s3155_s14, %s3640_s15  ;;  %p3648_p9 = scmp.lt.s32.totalorder %s3646_s16, %s3640_s15 }
 0x343   : > { %3538 = vpow2.f32 %v2994_v49  ;;  %v3004_v9 = vmul.f32 1.442695, %v2965_v13  ;;  %v3006_v39 = vmul.f32 1.442695, %v2966_v62  ;;  %v2969_v44 = vsub.f32 %v6080_v6, %v5704_v38 }
 0x344   : > { %3540 = vpow2.f32 %v2996_v55  ;;  %v3008_v25 = vmul.f32 1.442695, %v2967_v59  ;;  %v2970_v10 = vsub.f32 %v6081_v1, %v5704_v38  ;;  %v3010_v2 = vmul.f32 1.442695, %v2968_v52  ;;  %p3642_p6 = pnand %p3641_p4, %p3418_p5  ;;  %p3649_p10 = por %p3648_p9, %p3647_p8 }
 0x345   : > { %3542 = vpow2.f32 %v2998_v58  ;;  %v2971_v6 = vsub.f32 %v5459_v32, %v5704_v38  ;;  %v3012_v24 = vmul.f32 1.442695, %v2969_v44  ;;  %v2972_v48 = vsub.f32 %v5492_v51, %v5704_v38 }
 0x346   : > { %3544 = vpow2.f32 %v3000_v50  ;;  %v3014_v54 = vmul.f32 1.442695, %v2970_v10  ;;  %v2973_v27 = vsub.f32 %v5499_v12, %v5704_v38  ;;  %v2974_v35 = vsub.f32 %v5507_v20, %v5704_v38  ;;  %p3643_p7 = pneg %p3642_p6 }
 0x347   : > { %3546 = vpow2.f32 %v3002_v61  ;;  %v3016_v30 = vmul.f32 1.442695, %v2971_v6  ;;  %v3018_v58 = vmul.f32 1.442695, %v2972_v48  ;;  %v2975_v62 = vsub.f32 %v5516_v17, %v5704_v38 }
 0x348   : > { %3548 = vpow2.f32 %v3004_v9  ;;  %v3020_v61 = vmul.f32 1.442695, %v2973_v27  ;;  %v2976_v52 = vsub.f32 %v5523_v7, %v5704_v38  ;;  %v2977_v44 = vsub.f32 %v5531_v15, %v5704_v38  ;;  %p3650_p11 = pnand %p3649_p10, %p3643_p7 }
 0x349   : > { %3550 = vpow2.f32 %v3006_v39  ;;  %v3022_v39 = vmul.f32 1.442695, %v2974_v35  ;;  %v2981_v48 = vsub.f32 %v5564_v41, %v5704_v38 }
 0x34a   : > { %3552 = vpow2.f32 %v3008_v25  ;;  %v3024_v25 = vmul.f32 1.442695, %v2975_v62 }
 0x34b   : > { %v3535_v63 = vpop.eup %3534  ;;  %3554 = vpow2.f32 %v3010_v2 }
 0x34c   : > { %v3537_v8 = vpop.eup %3536  ;;  %v3054_v5 = vsel %vm2843_vm2, %v3535_v63, 0.0  ;;  %3556 = vpow2.f32 %v3012_v24  ;;  %v2980_v24 = vsub.f32 %v5555_v37, %v5704_v38 }
 0x34d   : > { %v3539_v19 = vpop.eup %3538  ;;  %v3055_v22 = vsel %vm2843_vm2, %v3537_v8, 0.0  ;;  %3558 = vpow2.f32 %v3014_v54 }
 0x34e   : > { %v3541_v11 = vpop.eup %3540  ;;  %v3056_v3 = vadd.f32 %v3055_v22, %v3054_v5  ;;  %v3057_v33 = vsel %vm2843_vm2, %v3539_v19, 0.0  ;;  %3560 = vpow2.f32 %v3016_v30  ;;  %v2978_v22 = vsub.f32 %v5539_v18, %v5704_v38 }
 0x34f   : > { %v3543_v47 = vpop.eup %3542  ;;  %v3059_v4 = vsel %vm2843_vm2, %v3541_v11, 0.0  ;;  %3562 = vpow2.f32 %v3018_v58  ;;  %v3026_v11 = vmul.f32 1.442695, %v2976_v52  ;;  %v3034_v27 = vmul.f32 1.442695, %v2980_v24 }
 0x350   : > { %v3058_v40 = vadd.f32 %v3057_v33, %v3056_v3  ;;  %v3545_v0 = vpop.eup %3544  ;;  %v3061_v28 = vsel %vm2843_vm2, %v3543_v47, 0.0  ;;  %3564 = vpow2.f32 %v3020_v61  ;;  %v2979_v3 = vsub.f32 %v5547_v14, %v5704_v38 }
 0x351   : > { %v3547_v21 = vpop.eup %3546  ;;  %v3063_v49 = vsel %vm2843_vm2, %v3545_v0, 0.0  ;;  %3566 = vpow2.f32 %v3022_v39  ;;  %v3028_v33 = vmul.f32 1.442695, %v2977_v44  ;;  %v2985_v61 = vsub.f32 %v5623_v60, %v5704_v38 }
 0x352   : > { %v3060_v1 = vadd.f32 %v3059_v4, %v3058_v40  ;;  %v3549_v55 = vpop.eup %3548  ;;  %v3065_v13 = vsel %vm2843_vm2, %v3547_v21, 0.0  ;;  %3568 = vpow2.f32 %v3024_v25  ;;  %v3030_v40 = vmul.f32 1.442695, %v2978_v22 }
 0x353   : > { %v3551_v50 = vpop.eup %3550  ;;  %v3067_v59 = vsel %vm2843_vm2, %v3549_v55, 0.0  ;;  %3570 = vpow2.f32 %v3026_v11  ;;  %v3032_v54 = vmul.f32 1.442695, %v2979_v3  ;;  %v2982_v21 = vsub.f32 %v5571_v57, %v5704_v38 }
 0x354   : > { %v3062_v32 = vadd.f32 %v3061_v28, %v3060_v1  ;;  %v3553_v9 = vpop.eup %3552  ;;  %v3069_v63 = vsel %vm2843_vm2, %v3551_v50, 0.0  ;;  %3572 = vpow2.f32 %v3028_v33  ;;  %v3036_v55 = vmul.f32 1.442695, %v2981_v48 }
 0x355   : > { %v3555_v8 = vpop.eup %3554  ;;  %v3071_v5 = vsel %vm2843_vm2, %v3553_v9, 0.0  ;;  %3574 = vpow2.f32 %v3030_v40  ;;  %v3046_v60 = vmul.f32 1.442695, %v2986_v42  ;;  %v3048_v22 = vmul.f32 1.442695, %v2987_v29 }
 0x356   : > { %v3064_v51 = vadd.f32 %v3063_v49, %v3062_v32  ;;  %v3557_v19 = vpop.eup %3556  ;;  %v3073_v10 = vsel %vm2843_vm2, %v3555_v8, 0.0  ;;  %v2983_v49 = vsub.f32 %v5581_v53, %v5704_v38  ;;  %3576 = vpow2.f32 %v3032_v54 }
 0x357   : > { %v3559_v2 = vpop.eup %3558  ;;  %v3075_v47 = vsel %vm2843_vm2, %v3557_v19, 0.0  ;;  %3578 = vpow2.f32 %v3034_v27  ;;  %v3052_v33 = vmul.f32 1.442695, %v2989_v26 }
 0x358   : > { %v3066_v12 = vadd.f32 %v3065_v13, %v3064_v51  ;;  %v3561_v6 = vpop.eup %3560  ;;  %v3077_v4 = vsel %vm2843_vm2, %v3559_v2, 0.0  ;;  %v2984_v51 = vsub.f32 %v5608_v43, %v5704_v38  ;;  %v3038_v13 = vmul.f32 1.442695, %v2982_v21 }
 0x359   : > { %v3563_v0 = vpop.eup %3562  ;;  %v3079_v1 = vsel %vm2843_vm2, %v3561_v6, 0.0  ;;  %3580 = vpow2.f32 %v3036_v55  ;;  %v3050_v2 = vmul.f32 1.442695, %v2988_v45 }
 0x35a   : > { %v3068_v20 = vadd.f32 %v3067_v59, %v3066_v12  ;;  %v3565_v28 = vpop.eup %3564  ;;  %v3081_v30 = vsel %vm2843_vm2, %v3563_v0, 0.0  ;;  %v3040_v12 = vmul.f32 1.442695, %v2983_v49  ;;  %v3042_v52 = vmul.f32 1.442695, %v2984_v51 }
 0x35b   : > { %v3567_v32 = vpop.eup %3566  ;;  %v3083_v35 = vsel %vm2843_vm2, %v3565_v28, 0.0  ;;  %3582 = vpow2.f32 %v3038_v13  ;;  %v2949_v28 = vmul.f32 1.442695, %v2948_v56 }
 0x35c   : > { %v3070_v17 = vadd.f32 %v3069_v63, %v3068_v20  ;;  %v3569_v58 = vpop.eup %3568  ;;  %v3085_v50 = vsel %vm2843_vm2, %v3567_v32, 0.0  ;;  %v3044_v63 = vmul.f32 1.442695, %v2985_v61  ;;  %3584 = vpow2.f32 %v3040_v12 }
 0x35d   : > { %v3571_v62 = vpop.eup %3570  ;;  %v3087_v59 = vsel %vm2843_vm2, %v3569_v58, 0.0  ;;  %3586 = vpow2.f32 %v3042_v52 }
 0x35e   : > { %v3072_v7 = vadd.f32 %v3071_v5, %v3070_v17  ;;  %v3573_v9 = vpop.eup %3572  ;;  %v3089_v43 = vsel %vm2843_vm2, %v3571_v62, 0.0  ;;  %3588 = vpow2.f32 %v3044_v63 }
 0x35f   : > { %v3575_v20 = vpop.eup %3574  ;;  %v3091_v44 = vsel %vm2843_vm2, %v3573_v9, 0.0  ;;  %3590 = vpow2.f32 %v3046_v60 }
 0x360   : > { %v3074_v15 = vadd.f32 %v3073_v10, %v3072_v7  ;;  %v3577_v25 = vpop.eup %3576  ;;  %v3093_v5 = vsel %vm2843_vm2, %v3575_v20, 0.0  ;;  %3592 = vpow2.f32 %v3048_v22 }
 0x361   : > { %v3579_v19 = vpop.eup %3578  ;;  %v3095_v7 = vsel %vm2843_vm2, %v3577_v25, 0.0  ;;  %3594 = vpow2.f32 %v3050_v2 }
 0x362   : > { %v3076_v18 = vadd.f32 %v3075_v47, %v3074_v15  ;;  %v3097_v42 = vsel %vm2843_vm2, %v3579_v19, 0.0  ;;  %3596 = vpow2.f32 %v3052_v33 }
 0x363   : > { %v3581_v10 = vpop.eup %3580  ;;  %3598 = vpow2.f32 %v2949_v28 }
 0x364   : > { %v3078_v14 = vadd.f32 %v3077_v4, %v3076_v18  ;;  %v3099_v29 = vsel %vm2843_vm2, %v3581_v10, 0.0 }
 0x365   : > { %v3583_v3 = vpop.eup %3582 }
 0x366   : > { %v3080_v37 = vadd.f32 %v3079_v1, %v3078_v14  ;;  %v3585_v15 = vpop.eup %3584  ;;  %v3101_v6 = vsel %vm2843_vm2, %v3583_v3, 0.0 }
 0x367   : > { %v3587_v23 = vpop.eup %3586  ;;  %v3103_v24 = vsel %vm2843_vm2, %v3585_v15, 0.0 }
 0x368   : > { %v3082_v41 = vadd.f32 %v3081_v30, %v3080_v37  ;;  %v3589_v40 = vpop.eup %3588  ;;  %v3105_v4 = vsel %vm2843_vm2, %v3587_v23, 0.0 }
 0x369   : > { %v3591_v16 = vpop.eup %3590  ;;  %v3107_v26 = vsel %vm2843_vm2, %v3589_v40, 0.0 }
 0x36a   : > { %v3084_v57 = vadd.f32 %v3083_v35, %v3082_v41  ;;  %v3593_v0 = vpop.eup %3592  ;;  %v3109_v54 = vsel %vm2843_vm2, %v3591_v16, 0.0 }
 0x36b   : > { %v3595_v14 = vpop.eup %3594  ;;  %v3111_v21 = vsel %vm2843_vm2, %v3593_v0, 0.0 }
 0x36c   : > { %v3086_v53 = vadd.f32 %v3085_v50, %v3084_v57  ;;  %v3597_v27 = vpop.eup %3596  ;;  %v3113_v30 = vsel %vm2843_vm2, %v3595_v14, 0.0  ;;  %v2947_v57 = vld [vmem:[#allocation4] sm:$0x1] }
 0x36d   : > { %v3115_v49 = vsel %vm2843_vm2, %v3597_v27, 0.0  ;;  %v3599_v13 = vpop.eup %3598 }
 0x36e   : > { %v3088_v39 = vadd.f32 %v3087_v59, %v3086_v53  ;;  %v2951_v34 = vmul.f32 %v3599_v13, %v2947_v57 }
 0x370   : > { %v3090_v8 = vadd.f32 %v3089_v43, %v3088_v39 }
 0x372   : > { %v3092_v17 = vadd.f32 %v3091_v44, %v3090_v8 }
 0x374   : > { %v3094_v11 = vadd.f32 %v3093_v5, %v3092_v17 }
 0x376   : > { %v3096_v46 = vadd.f32 %v3095_v7, %v3094_v11 }
 0x378   : > { %v3098_v36 = vadd.f32 %v3097_v42, %v3096_v46 }
 0x37a   : > { %v3100_v47 = vadd.f32 %v3099_v29, %v3098_v36 }
 0x37c   : > { %v3102_v45 = vadd.f32 %v3101_v6, %v3100_v47 }
 0x37e   : > { %v3104_v18 = vadd.f32 %v3103_v24, %v3102_v45 }
 0x380   : > { %v3106_v38 = vadd.f32 %v3105_v4, %v3104_v18 }
 0x382   : > { %v3108_v48 = vadd.f32 %v3107_v26, %v3106_v38 }
 0x384   : > { %v3110_v1 = vadd.f32 %v3109_v54, %v3108_v48 }
 0x386   : > { %v3112_v37 = vadd.f32 %v3111_v21, %v3110_v1 }
 0x388   : > { %v3114_v32 = vadd.f32 %v3113_v30, %v3112_v37 }
 0x38a   : > { %v3116_v55 = vadd.f32 %v3115_v49, %v3114_v32 }
 0x38c   : > { %v3117_v41 = vrot.slane %v3116_v55, 4 }
 0x38e   : > { %v3118_v35 = vadd.f32 %v3117_v41, %v3116_v55 }
 0x390   : > { %v3119_v58 = vrot.slane %v3118_v35, 2 }
 0x392   : > { %v3120_v51 = vadd.f32 %v3119_v58, %v3118_v35 }
 0x394   : > { %v3121_v31 = vrot.slane %v3120_v51, 1 }
 0x396   : > { %v3122_v56 = vadd.f32 %v3121_v31, %v3120_v51 }
 0x398   : > { %v3123_v50 = vadd.f32 %v3122_v56, %v2951_v34 }
 0x39a   : > { %3125 = vst.msk [vmem:[#allocation4] sm:$0x1] %vm3124_vm4, %v3123_v50 }
 0x39b   : > { %3653 = shalt.err (!%p3650_p11)
}
 0x39c   : > { %s3654_s30 = scalar_lea.hbm %s5876_s7, 16 }
 0x39d   : > { %p3655_p12 = scmp.ne.s32.totalorder %s5876_s7, %s3654_s30  ;;  %p3660_p1 = scmp.lt.u32.totalorder %s3654_s30, %s5876_s7 }
 0x39f   : > { %p3656_p13 = pnand %p3655_p12, %p3418_p5 }
 0x3a1   : > { %p3657_p0 = pneg %p3656_p13 }
 0x3a3   : > { %p3662_p2 = pnand %p3660_p1, %p3657_p0 }
 0x3a5   : > { %3665 = shalt.err (!%p3662_p2)
}
 0x3a6   : > { %3413 = dma.vmem_to_hbm [thread:$0]  (%p3418_p5), %s3155_s14, 16, %s5876_s7, [#allocation5]  }
 0x3a7   : > { %3671 = dma.done.wait (%p3418_p5), [#allocation3], 16  }
 0x3a8   : > { %3673 = vsyncadd (%p3418_p5), [#allocation3], 4294967280 }
 0x3a9   : > { %3675 = dma.done.wait (%p3418_p5), [#allocation5], 16  }
 0x3aa   : > { %3677 = vsyncadd (%p3418_p5), [#allocation5], 4294967280 }
 0x3ab PF: > { %s20_s24 = sadd.s32 1, %s3680_s24  }
 0x3ac   : > { %p17_p3 = scmp.ge.s32.totalorder %s20_s24, 6  }
 0x3ae   :  { %19 = sbr.rel (!%p17_p3) target bundleno = 2 (0x2), region = 94 }
 0x3b5   :  { %3179 = vsyncpa [#allocation3], 1 }
 0x3b6   :  { %3181 = vsyncpa [#allocation3 + $0x1], 1 }
 0x3b7   :  { %3182 = vsyncpa [#allocation5], 1 }

</bundles_post_ra>
